<compile_context>
chip_gen: v6e
topology: v6e:2x2x1
jax: 0.10.0
libtpu: 0.0.40
codegen_flags: <defaults>
</compile_context>

<pallas_src>
import jax
import jax.numpy as jnp
from jax.experimental import pallas as pl
from jax.experimental.pallas import tpu as pltpu

EPS = 1e-5
_VMEM_LIMIT_BYTES = 32 * 1024 * 1024   # explicit scoped-VMEM budget; tiles below use << this
_ROW_TILE_H = 16                       # H rows per conv tile (re-derive smaller for huge W*C)
_ROW_TILE_EW = 512                     # rows per elementwise tile; each row is (W*C) lanes wide


def _largest_divisor(total, cap, align=1):
    """Largest divisor of `total` that is <= cap and a multiple of `align`.
    Falls back to `total` (a full-extent block dim is always legal)."""
    for d in range(min(cap, total), 0, -1):
        if total % d == 0 and d % align == 0:
            return d
    return total


# --------------------------------------------------------------------------- kernels

def _conv3x3_stats_kernel(xt_ref, w_ref, y_ref, stats_ref, patch_ref):
    """3x3 'same' conv on one haloed row tile + partial BN statistics.

    xt_ref:    (1, TH+2, W+2, Cin)  bf16  zero-padded / haloed input tile
    w_ref:     (9*Cin, Cout)        bf16  im2col weight matrix (tap order t = dy*3 + dx)
    y_ref:     (1, TH, W, Cout)     f32   conv output tile (bias dropped: cancelled by BN)
    stats_ref: (1, 2, Cout)         f32   per-tile [sum, sum-of-squares] for BN
    patch_ref: (TH*W, 9*Cin)        bf16  VMEM scratch: im2col patch matrix
    """
    _, th2, w2, cin = xt_ref.shape
    th, w = th2 - 2, w2 - 2
    cout = stats_ref.shape[-1]

    x = xt_ref[0]                                              # (TH+2, W+2, Cin)
    # im2col: pack the 9 shifted windows side-by-side -> one MXU matmul with K = 9*Cin.
    for t in range(9):
        dy, dx = t // 3, t % 3
        patch_ref[:, t * cin:(t + 1) * cin] = (
            x[dy:dy + th, dx:dx + w, :].reshape(th * w, cin))

    acc = jnp.dot(patch_ref[...], w_ref[...],
                  preferred_element_type=jnp.float32)          # (TH*W, Cout) f32

    # One-pass partial BN statistics (finalized in the wrapper: var = E[x^2] - E[x]^2).
    ssum = jnp.sum(acc, axis=0, keepdims=True)                 # (1, Cout)
    ssq = jnp.sum(acc * acc, axis=0, keepdims=True)            # (1, Cout)
    stats_ref[...] = jnp.concatenate([ssum, ssq], axis=0)[None]

    y_ref[...] = acc.reshape(1, th, w, cout)


def _scale_shift_relu_kernel(y_ref, s_ref, b_ref, o_ref):
    """Elementwise y*scale + shift -> ReLU on lane-dense (rows, W*C) slabs (f32 math)."""
    o_ref[...] = jnp.maximum(
        y_ref[...] * s_ref[...] + b_ref[...], 0.0).astype(o_ref.dtype)


# --------------------------------------------------------------------------- wrappers

def _conv3x3_with_stats(x_nhwc, w_mat, cout):
    """Tiled 3x3 'same' conv (bf16 MXU operands, f32 accum) + per-channel sum / sum-sq."""
    n, h, w, cin = x_nhwc.shape
    th = _largest_divisor(h, _ROW_TILE_H)
    nt = h // th

    # Zero 'same' padding once, then haloed row tiles so BlockSpecs are non-overlapping.
    xp = jnp.pad(x_nhwc, ((0, 0), (1, 1), (1, 1), (0, 0)))
    tiles = jnp.stack([xp[:, t * th:t * th + th + 2] for t in range(nt)], axis=1)
    tiles = tiles.reshape(n * nt, th + 2, w + 2, cin)

    y, stats = pl.pallas_call(
        _conv3x3_stats_kernel,
        grid=(n * nt,),
        in_specs=[
            pl.BlockSpec((1, th + 2, w + 2, cin), lambda i: (i, 0, 0, 0)),
            pl.BlockSpec((9 * cin, cout), lambda i: (0, 0)),
        ],
        out_specs=[
            pl.BlockSpec((1, th, w, cout), lambda i: (i, 0, 0, 0)),
            pl.BlockSpec((1, 2, cout), lambda i: (i, 0, 0)),
        ],
        out_shape=[
            jax.ShapeDtypeStruct((n * nt, th, w, cout), jnp.float32),
            jax.ShapeDtypeStruct((n * nt, 2, cout), jnp.float32),
        ],
        scratch_shapes=[pltpu.VMEM((th * w, 9 * cin), jnp.bfloat16)],
        compiler_params=pltpu.CompilerParams(
            dimension_semantics=("parallel",),
            vmem_limit_bytes=_VMEM_LIMIT_BYTES),
    )(tiles, w_mat)

    y = y.reshape(n, h, w, cout)
    ssum = jnp.sum(stats[:, 0, :], axis=0)
    ssq = jnp.sum(stats[:, 1, :], axis=0)
    return y, ssum, ssq


def _bn_scale_shift(ssum, ssq, count, gamma, beta):
    """Fold training-mode BatchNorm (biased variance, eps=1e-5) into scale/shift."""
    mean = ssum / count
    var = ssq / count - mean * mean
    scale = gamma * jax.lax.rsqrt(var + EPS)
    shift = beta - mean * scale
    return scale, shift


def _scale_shift_relu(y_nhwc, scale, shift, out_dtype):
    """Tiled, lane-dense elementwise scale*x + shift -> ReLU."""
    n, h, w, c = y_nhwc.shape
    rows, wc = n * h, w * c
    tb = _largest_divisor(rows, _ROW_TILE_EW, align=8)

    y2 = y_nhwc.reshape(rows, wc)                      # free reshape: lane axis = W*C
    s = jnp.tile(scale.astype(jnp.float32), w).reshape(1, wc)
    b = jnp.tile(shift.astype(jnp.float32), w).reshape(1, wc)

    out = pl.pallas_call(
        _scale_shift_relu_kernel,
        grid=(rows // tb,),
        in_specs=[
            pl.BlockSpec((tb, wc), lambda i: (i, 0)),
            pl.BlockSpec((1, wc), lambda i: (0, 0)),
            pl.BlockSpec((1, wc), lambda i: (0, 0)),
        ],
        out_specs=pl.BlockSpec((tb, wc), lambda i: (i, 0)),
        out_shape=jax.ShapeDtypeStruct((rows, wc), out_dtype),
        compiler_params=pltpu.CompilerParams(
            dimension_semantics=("parallel",),
            vmem_limit_bytes=_VMEM_LIMIT_BYTES),
    )(y2, s, b)
    return out.reshape(n, h, w, c)


@jax.jit
def conv_block_forward(x_nchw, params):
    """(N, Cin, H, W) f32 -> (N, Cout, H, W) f32.  PyTorch training-mode BN semantics;
    conv matmuls use bf16 operands with f32 accumulation."""
    x = jnp.transpose(x_nchw, (0, 2, 3, 1)).astype(jnp.float32)      # NHWC
    n, h, w, cin = x.shape
    cout = params["w1"].shape[0]
    count = jnp.float32(n * h * w)

    # PyTorch (Cout, Cin, 3, 3) -> im2col (9*Cin, Cout) with tap order t = dy*3 + dx.
    w1 = jnp.transpose(params["w1"], (2, 3, 1, 0)).reshape(9 * cin, cout)
    w2 = jnp.transpose(params["w2"], (2, 3, 1, 0)).reshape(9 * cout, cout)
    # Conv biases b1/b2 are intentionally unused: a per-channel constant added before
    # training-mode BatchNorm is cancelled exactly by the mean subtraction.

    y1, s1, q1 = _conv3x3_with_stats(x.astype(jnp.bfloat16), w1.astype(jnp.bfloat16), cout)
    sc1, sh1 = _bn_scale_shift(s1, q1, count, params["gamma1"], params["beta1"])
    a1 = _scale_shift_relu(y1, sc1, sh1, jnp.bfloat16)

    y2, s2, q2 = _conv3x3_with_stats(a1, w2.astype(jnp.bfloat16), cout)
    sc2, sh2 = _bn_scale_shift(s2, q2, count, params["gamma2"], params["beta2"])
    out = _scale_shift_relu(y2, sc2, sh2, jnp.float32)

    return jnp.transpose(out, (0, 3, 1, 2))                          # back to NCHW


# --------------------------------------------------------------------------- reference

def _reference_forward(x_nchw, params):
    """Pure-JAX reference with the same precision policy (bf16 conv operands, f32
    accumulation, f32 BN math) and the original conv biases (which cancel through BN)."""
    x = jnp.transpose(x_nchw, (0, 2, 3, 1)).astype(jnp.float32)

    def conv(y, wgt, bias):
        w_hwio = jnp.transpose(wgt, (2, 3, 1, 0)).astype(jnp.bfloat16)
        out = jax.lax.conv_general_dilated(
            y.astype(jnp.bfloat16), w_hwio, (1, 1), "SAME",
            dimension_numbers=("NHWC", "HWIO", "NHWC"),
            preferred_element_type=jnp.float32)
        return out + bias.reshape(1, 1, 1, -1)

    def bn_relu(y, g, be):
        m = jnp.mean(y, axis=(0, 1, 2), keepdims=True)
        v = jnp.mean((y - m) ** 2, axis=(0, 1, 2), keepdims=True)
        yn = (y - m) * jax.lax.rsqrt(v + EPS) * g.reshape(1, 1, 1, -1) + be.reshape(1, 1, 1, -1)
        return jnp.maximum(yn, 0.0)

    a1 = bn_relu(conv(x, params["w1"], params["b1"]), params["gamma1"], params["beta1"])
    y = bn_relu(conv(a1, params["w2"], params["b2"]), params["gamma2"], params["beta2"])
    return jnp.transpose(y, (0, 3, 1, 2))


def init_params(key, in_channels, out_channels):
    k1, k2, k3, k4 = jax.random.split(key, 4)
    return {
        "w1": 0.1 * jax.random.normal(k1, (out_channels, in_channels, 3, 3), jnp.float32),
        "b1": 0.05 * jax.random.normal(k2, (out_channels,), jnp.float32),
        "gamma1": jnp.ones((out_channels,), jnp.float32),
        "beta1": jnp.zeros((out_channels,), jnp.float32),
        "w2": 0.1 * jax.random.normal(k3, (out_channels, out_channels, 3, 3), jnp.float32),
        "b2": 0.05 * jax.random.normal(k4, (out_channels,), jnp.float32),
        "gamma2": jnp.ones((out_channels,), jnp.float32),
        "beta2": jnp.zeros((out_channels,), jnp.float32),
    }


if __name__ == "__main__":
    # TODO(synk): BatchNorm running_mean/running_var buffer updates (training-time side
    # effect) are not modeled; they do not affect the forward output.
    N, Cin, Cout, H, W = 2, 4, 8, 16, 16
    key = jax.random.PRNGKey(0)
    kx, kp = jax.random.split(key)
    x = jax.random.normal(kx, (N, Cin, H, W), jnp.float32)
    params = init_params(kp, Cin, Cout)

    out = jax.block_until_ready(conv_block_forward(x, params))
    ref = jax.block_until_ready(_reference_forward(x, params))

    assert out.shape == (N, Cout, H, W), out.shape
    assert bool(jnp.all(jnp.isfinite(out)))
    # Tolerance covers bf16-operand rounding-order differences between the im2col kernel
    # and lax.conv (both accumulate in f32); the algorithm itself is exact.
    assert jnp.allclose(out, ref, rtol=1e-2, atol=1e-2), float(jnp.max(jnp.abs(out - ref)))

    print("KERNEL_OK")
</pallas_src>

<mosaic_0001>
module attributes {stable_mosaic.version = 11 : i64} {
  func.func @_conv3x3_stats_kernel(%arg0: i32, %arg1: memref<1x18x18x4xbf16, #tpu.memory_space<vmem>>, %arg2: memref<36x8xbf16, #tpu.memory_space<vmem>>, %arg3: memref<1x16x16x8xf32, #tpu.memory_space<vmem>>, %arg4: memref<1x2x8xf32, #tpu.memory_space<vmem>>, %arg5: memref<256x36xbf16, #tpu.memory_space<vmem>>) attributes {dimension_semantics = [#tpu.dimension_semantics<parallel>], iteration_bounds = array<i64: 2>, scalar_prefetch = 0 : i64, scratch_operands = 1 : i64, tpu.core_type = #tpu.core_type<tc>, window_params = [{transform_indices = @transform_0, window_bounds = array<i64: 1, 18, 18, 4>}, {pipeline_mode = #tpu.pipeline_mode<synchronous>, transform_indices = @transform_1, window_bounds = array<i64: 36, 8>}, {transform_indices = @transform_2, window_bounds = array<i64: 1, 16, 16, 8>}, {transform_indices = @transform_3, window_bounds = array<i64: 1, 2, 8>}]} {
    %c0 = arith.constant 0 : index
    %c0_0 = arith.constant 0 : index
    %c0_1 = arith.constant 0 : index
    %c0_2 = arith.constant 0 : index
    %0 = vector.load %arg1[%c0, %c0_0, %c0_1, %c0_2] : memref<1x18x18x4xbf16, #tpu.memory_space<vmem>>, vector<1x18x18x4xbf16>
    %1 = vector.shape_cast %0 : vector<1x18x18x4xbf16> to vector<18x18x4xbf16>
    %2 = vector.extract_strided_slice %1 {offsets = [0, 0, 0], sizes = [16, 16, 4], strides = [1, 1, 1]} : vector<18x18x4xbf16> to vector<16x16x4xbf16>
    %3 = vector.shape_cast %2 : vector<16x16x4xbf16> to vector<256x4xbf16>
    %c0_3 = arith.constant 0 : index
    %c0_4 = arith.constant 0 : index
    %4 = vector.load %arg5[%c0_3, %c0_4] : memref<256x36xbf16, #tpu.memory_space<vmem>>, vector<256x4xbf16>
    tpu.vector_store %arg5[%c0_3, %c0_4], %3 {strides = array<i32>} : memref<256x36xbf16, #tpu.memory_space<vmem>>, vector<256x4xbf16>,
    %5 = vector.extract_strided_slice %1 {offsets = [0, 1, 0], sizes = [16, 16, 4], strides = [1, 1, 1]} : vector<18x18x4xbf16> to vector<16x16x4xbf16>
    %6 = vector.shape_cast %5 : vector<16x16x4xbf16> to vector<256x4xbf16>
    %c0_5 = arith.constant 0 : index
    %c4 = arith.constant 4 : index
    %7 = vector.load %arg5[%c0_5, %c4] : memref<256x36xbf16, #tpu.memory_space<vmem>>, vector<256x4xbf16>
    tpu.vector_store %arg5[%c0_5, %c4], %6 {strides = array<i32>} : memref<256x36xbf16, #tpu.memory_space<vmem>>, vector<256x4xbf16>,
    %8 = vector.extract_strided_slice %1 {offsets = [0, 2, 0], sizes = [16, 16, 4], strides = [1, 1, 1]} : vector<18x18x4xbf16> to vector<16x16x4xbf16>
    %9 = vector.shape_cast %8 : vector<16x16x4xbf16> to vector<256x4xbf16>
    %c0_6 = arith.constant 0 : index
    %c8 = arith.constant 8 : index
    %10 = vector.load %arg5[%c0_6, %c8] : memref<256x36xbf16, #tpu.memory_space<vmem>>, vector<256x4xbf16>
    tpu.vector_store %arg5[%c0_6, %c8], %9 {strides = array<i32>} : memref<256x36xbf16, #tpu.memory_space<vmem>>, vector<256x4xbf16>,
    %11 = vector.extract_strided_slice %1 {offsets = [1, 0, 0], sizes = [16, 16, 4], strides = [1, 1, 1]} : vector<18x18x4xbf16> to vector<16x16x4xbf16>
    %12 = vector.shape_cast %11 : vector<16x16x4xbf16> to vector<256x4xbf16>
    %c0_7 = arith.constant 0 : index
    %c12 = arith.constant 12 : index
    %13 = vector.load %arg5[%c0_7, %c12] : memref<256x36xbf16, #tpu.memory_space<vmem>>, vector<256x4xbf16>
    tpu.vector_store %arg5[%c0_7, %c12], %12 {strides = array<i32>} : memref<256x36xbf16, #tpu.memory_space<vmem>>, vector<256x4xbf16>,
    %14 = vector.extract_strided_slice %1 {offsets = [1, 1, 0], sizes = [16, 16, 4], strides = [1, 1, 1]} : vector<18x18x4xbf16> to vector<16x16x4xbf16>
    %15 = vector.shape_cast %14 : vector<16x16x4xbf16> to vector<256x4xbf16>
    %c0_8 = arith.constant 0 : index
    %c16 = arith.constant 16 : index
    %16 = vector.load %arg5[%c0_8, %c16] : memref<256x36xbf16, #tpu.memory_space<vmem>>, vector<256x4xbf16>
    tpu.vector_store %arg5[%c0_8, %c16], %15 {strides = array<i32>} : memref<256x36xbf16, #tpu.memory_space<vmem>>, vector<256x4xbf16>,
    %17 = vector.extract_strided_slice %1 {offsets = [1, 2, 0], sizes = [16, 16, 4], strides = [1, 1, 1]} : vector<18x18x4xbf16> to vector<16x16x4xbf16>
    %18 = vector.shape_cast %17 : vector<16x16x4xbf16> to vector<256x4xbf16>
    %c0_9 = arith.constant 0 : index
    %c20 = arith.constant 20 : index
    %19 = vector.load %arg5[%c0_9, %c20] : memref<256x36xbf16, #tpu.memory_space<vmem>>, vector<256x4xbf16>
    tpu.vector_store %arg5[%c0_9, %c20], %18 {strides = array<i32>} : memref<256x36xbf16, #tpu.memory_space<vmem>>, vector<256x4xbf16>,
    %20 = vector.extract_strided_slice %1 {offsets = [2, 0, 0], sizes = [16, 16, 4], strides = [1, 1, 1]} : vector<18x18x4xbf16> to vector<16x16x4xbf16>
    %21 = vector.shape_cast %20 : vector<16x16x4xbf16> to vector<256x4xbf16>
    %c0_10 = arith.constant 0 : index
    %c24 = arith.constant 24 : index
    %22 = vector.load %arg5[%c0_10, %c24] : memref<256x36xbf16, #tpu.memory_space<vmem>>, vector<256x4xbf16>
    tpu.vector_store %arg5[%c0_10, %c24], %21 {strides = array<i32>} : memref<256x36xbf16, #tpu.memory_space<vmem>>, vector<256x4xbf16>,
    %23 = vector.extract_strided_slice %1 {offsets = [2, 1, 0], sizes = [16, 16, 4], strides = [1, 1, 1]} : vector<18x18x4xbf16> to vector<16x16x4xbf16>
    %24 = vector.shape_cast %23 : vector<16x16x4xbf16> to vector<256x4xbf16>
    %c0_11 = arith.constant 0 : index
    %c28 = arith.constant 28 : index
    %25 = vector.load %arg5[%c0_11, %c28] : memref<256x36xbf16, #tpu.memory_space<vmem>>, vector<256x4xbf16>
    tpu.vector_store %arg5[%c0_11, %c28], %24 {strides = array<i32>} : memref<256x36xbf16, #tpu.memory_space<vmem>>, vector<256x4xbf16>,
    %26 = vector.extract_strided_slice %1 {offsets = [2, 2, 0], sizes = [16, 16, 4], strides = [1, 1, 1]} : vector<18x18x4xbf16> to vector<16x16x4xbf16>
    %27 = vector.shape_cast %26 : vector<16x16x4xbf16> to vector<256x4xbf16>
    %c0_12 = arith.constant 0 : index
    %c32 = arith.constant 32 : index
    %28 = vector.load %arg5[%c0_12, %c32] : memref<256x36xbf16, #tpu.memory_space<vmem>>, vector<256x4xbf16>
    tpu.vector_store %arg5[%c0_12, %c32], %27 {strides = array<i32>} : memref<256x36xbf16, #tpu.memory_space<vmem>>, vector<256x4xbf16>,
    %c0_13 = arith.constant 0 : index
    %c0_14 = arith.constant 0 : index
    %29 = vector.load %arg5[%c0_13, %c0_14] : memref<256x36xbf16, #tpu.memory_space<vmem>>, vector<256x36xbf16>
    %c0_15 = arith.constant 0 : index
    %c0_16 = arith.constant 0 : index
    %30 = vector.load %arg2[%c0_15, %c0_16] : memref<36x8xbf16, #tpu.memory_space<vmem>>, vector<36x8xbf16>
    %cst = arith.constant dense<0.000000e+00> : vector<256x8xf32>
    %31 = tpu.matmul %29, %30, %cst {dimension_numbers = #tpu.dot_dimension_numbers<[1], [0], [0], [1], [0, 0, 1, 1], [], []>} : vector<256x36xbf16>, vector<36x8xbf16>, vector<256x8xf32> -> vector<256x8xf32>
    %cst_17 = arith.constant dense<0.000000e+00> : vector<8xf32>
    %32 = vector.multi_reduction <add>, %31, %cst_17 [0] : vector<256x8xf32> to vector<8xf32>
    %33 = vector.shape_cast %32 : vector<8xf32> to vector<1x8xf32>
    %34 = arith.mulf %31, %31 : vector<256x8xf32>
    %cst_18 = arith.constant dense<0.000000e+00> : vector<8xf32>
    %35 = vector.multi_reduction <add>, %34, %cst_18 [0] : vector<256x8xf32> to vector<8xf32>
    %36 = vector.shape_cast %35 : vector<8xf32> to vector<1x8xf32>
    %37 = tpu.concatenate %33, %36 in 0 : vector<1x8xf32>, vector<1x8xf32> -> vector<2x8xf32>
    %38 = vector.shape_cast %37 : vector<2x8xf32> to vector<1x2x8xf32>
    %c0_19 = arith.constant 0 : index
    %c0_20 = arith.constant 0 : index
    %c0_21 = arith.constant 0 : index
    %39 = vector.load %arg4[%c0_19, %c0_20, %c0_21] : memref<1x2x8xf32, #tpu.memory_space<vmem>>, vector<1x2x8xf32>
    tpu.vector_store %arg4[%c0_19, %c0_20, %c0_21], %38 {strides = array<i32>} : memref<1x2x8xf32, #tpu.memory_space<vmem>>, vector<1x2x8xf32>,
    %40 = vector.shape_cast %31 : vector<256x8xf32> to vector<1x16x16x8xf32>
    %c0_22 = arith.constant 0 : index
    %c0_23 = arith.constant 0 : index
    %c0_24 = arith.constant 0 : index
    %c0_25 = arith.constant 0 : index
    %41 = vector.load %arg3[%c0_22, %c0_23, %c0_24, %c0_25] : memref<1x16x16x8xf32, #tpu.memory_space<vmem>>, vector<1x16x16x8xf32>
    tpu.vector_store %arg3[%c0_22, %c0_23, %c0_24, %c0_25], %40 {strides = array<i32>} : memref<1x16x16x8xf32, #tpu.memory_space<vmem>>, vector<1x16x16x8xf32>,
    return
  }
  func.func @transform_0(%arg0: i32) -> (i32, i32, i32, i32) {
    %c0_i32 = arith.constant 0 : i32
    %c0_i32_0 = arith.constant 0 : i32
    %c0_i32_1 = arith.constant 0 : i32
    %c0_i32_2 = arith.constant 0 : i32
    return %arg0, %c0_i32, %c0_i32_0, %c0_i32_1 : i32, i32, i32, i32
  }
  func.func @transform_1(%arg0: i32) -> (i32, i32) {
    %c0_i32 = arith.constant 0 : i32
    %c0_i32_0 = arith.constant 0 : i32
    %c0_i32_1 = arith.constant 0 : i32
    return %c0_i32, %c0_i32_0 : i32, i32
  }
  func.func @transform_2(%arg0: i32) -> (i32, i32, i32, i32) {
    %c0_i32 = arith.constant 0 : i32
    %c0_i32_0 = arith.constant 0 : i32
    %c0_i32_1 = arith.constant 0 : i32
    %c0_i32_2 = arith.constant 0 : i32
    return %arg0, %c0_i32, %c0_i32_0, %c0_i32_1 : i32, i32, i32, i32
  }
  func.func @transform_3(%arg0: i32) -> (i32, i32, i32) {
    %c0_i32 = arith.constant 0 : i32
    %c0_i32_0 = arith.constant 0 : i32
    %c0_i32_1 = arith.constant 0 : i32
    return %arg0, %c0_i32, %c0_i32_0 : i32, i32, i32
  }
}

module attributes {stable_mosaic.version = 11 : i64} {
  func.func @_scale_shift_relu_kernel(%arg0: i32, %arg1: memref<32x128xf32, #tpu.memory_space<vmem>>, %arg2: memref<1x128xf32, #tpu.memory_space<vmem>>, %arg3: memref<1x128xf32, #tpu.memory_space<vmem>>, %arg4: memref<32x128xbf16, #tpu.memory_space<vmem>>) attributes {dimension_semantics = [#tpu.dimension_semantics<parallel>], iteration_bounds = array<i64: 1>, scalar_prefetch = 0 : i64, scratch_operands = 0 : i64, tpu.core_type = #tpu.core_type<tc>, window_params = [{transform_indices = @transform_0, window_bounds = array<i64: 32, 128>}, {pipeline_mode = #tpu.pipeline_mode<synchronous>, transform_indices = @transform_1, window_bounds = array<i64: 1, 128>}, {pipeline_mode = #tpu.pipeline_mode<synchronous>, transform_indices = @transform_2, window_bounds = array<i64: 1, 128>}, {transform_indices = @transform_3, window_bounds = array<i64: 32, 128>}]} {
    %c0 = arith.constant 0 : index
    %c0_0 = arith.constant 0 : index
    %0 = vector.load %arg1[%c0, %c0_0] : memref<32x128xf32, #tpu.memory_space<vmem>>, vector<32x128xf32>
    %c0_1 = arith.constant 0 : index
    %c0_2 = arith.constant 0 : index
    %1 = vector.load %arg2[%c0_1, %c0_2] : memref<1x128xf32, #tpu.memory_space<vmem>>, vector<1x128xf32>
    %2 = vector.broadcast %1 : vector<1x128xf32> to vector<32x128xf32>
    %3 = arith.mulf %0, %2 : vector<32x128xf32>
    %c0_3 = arith.constant 0 : index
    %c0_4 = arith.constant 0 : index
    %4 = vector.load %arg3[%c0_3, %c0_4] : memref<1x128xf32, #tpu.memory_space<vmem>>, vector<1x128xf32>
    %5 = vector.broadcast %4 : vector<1x128xf32> to vector<32x128xf32>
    %6 = arith.addf %3, %5 : vector<32x128xf32>
    %cst = arith.constant 0.000000e+00 : f32
    %7 = vector.broadcast %cst : f32 to vector<32x128xf32>
    %8 = arith.maximumf %6, %7 : vector<32x128xf32>
    %9 = arith.truncf %8 : vector<32x128xf32> to vector<32x128xbf16>
    %c0_5 = arith.constant 0 : index
    %c0_6 = arith.constant 0 : index
    %10 = vector.load %arg4[%c0_5, %c0_6] : memref<32x128xbf16, #tpu.memory_space<vmem>>, vector<32x128xbf16>
    tpu.vector_store %arg4[%c0_5, %c0_6], %9 {strides = array<i32>} : memref<32x128xbf16, #tpu.memory_space<vmem>>, vector<32x128xbf16>,
    return
  }
  func.func @transform_0(%arg0: i32) -> (i32, i32) {
    %c0_i32 = arith.constant 0 : i32
    %c0_i32_0 = arith.constant 0 : i32
    return %arg0, %c0_i32 : i32, i32
  }
  func.func @transform_1(%arg0: i32) -> (i32, i32) {
    %c0_i32 = arith.constant 0 : i32
    %c0_i32_0 = arith.constant 0 : i32
    %c0_i32_1 = arith.constant 0 : i32
    return %c0_i32, %c0_i32_0 : i32, i32
  }
  func.func @transform_2(%arg0: i32) -> (i32, i32) {
    %c0_i32 = arith.constant 0 : i32
    %c0_i32_0 = arith.constant 0 : i32
    %c0_i32_1 = arith.constant 0 : i32
    return %c0_i32, %c0_i32_0 : i32, i32
  }
  func.func @transform_3(%arg0: i32) -> (i32, i32) {
    %c0_i32 = arith.constant 0 : i32
    %c0_i32_0 = arith.constant 0 : i32
    return %arg0, %c0_i32 : i32, i32
  }
}

module attributes {stable_mosaic.version = 11 : i64} {
  func.func @_scale_shift_relu_kernel(%arg0: i32, %arg1: memref<32x128xf32, #tpu.memory_space<vmem>>, %arg2: memref<1x128xf32, #tpu.memory_space<vmem>>, %arg3: memref<1x128xf32, #tpu.memory_space<vmem>>, %arg4: memref<32x128xf32, #tpu.memory_space<vmem>>) attributes {dimension_semantics = [#tpu.dimension_semantics<parallel>], iteration_bounds = array<i64: 1>, scalar_prefetch = 0 : i64, scratch_operands = 0 : i64, tpu.core_type = #tpu.core_type<tc>, window_params = [{transform_indices = @transform_0, window_bounds = array<i64: 32, 128>}, {pipeline_mode = #tpu.pipeline_mode<synchronous>, transform_indices = @transform_1, window_bounds = array<i64: 1, 128>}, {pipeline_mode = #tpu.pipeline_mode<synchronous>, transform_indices = @transform_2, window_bounds = array<i64: 1, 128>}, {transform_indices = @transform_3, window_bounds = array<i64: 32, 128>}]} {
    %c0 = arith.constant 0 : index
    %c0_0 = arith.constant 0 : index
    %0 = vector.load %arg1[%c0, %c0_0] : memref<32x128xf32, #tpu.memory_space<vmem>>, vector<32x128xf32>
    %c0_1 = arith.constant 0 : index
    %c0_2 = arith.constant 0 : index
    %1 = vector.load %arg2[%c0_1, %c0_2] : memref<1x128xf32, #tpu.memory_space<vmem>>, vector<1x128xf32>
    %2 = vector.broadcast %1 : vector<1x128xf32> to vector<32x128xf32>
    %3 = arith.mulf %0, %2 : vector<32x128xf32>
    %c0_3 = arith.constant 0 : index
    %c0_4 = arith.constant 0 : index
    %4 = vector.load %arg3[%c0_3, %c0_4] : memref<1x128xf32, #tpu.memory_space<vmem>>, vector<1x128xf32>
    %5 = vector.broadcast %4 : vector<1x128xf32> to vector<32x128xf32>
    %6 = arith.addf %3, %5 : vector<32x128xf32>
    %cst = arith.constant 0.000000e+00 : f32
    %7 = vector.broadcast %cst : f32 to vector<32x128xf32>
    %8 = arith.maximumf %6, %7 : vector<32x128xf32>
    %c0_5 = arith.constant 0 : index
    %c0_6 = arith.constant 0 : index
    %9 = vector.load %arg4[%c0_5, %c0_6] : memref<32x128xf32, #tpu.memory_space<vmem>>, vector<32x128xf32>
    tpu.vector_store %arg4[%c0_5, %c0_6], %8 {strides = array<i32>} : memref<32x128xf32, #tpu.memory_space<vmem>>, vector<32x128xf32>,
    return
  }
  func.func @transform_0(%arg0: i32) -> (i32, i32) {
    %c0_i32 = arith.constant 0 : i32
    %c0_i32_0 = arith.constant 0 : i32
    return %arg0, %c0_i32 : i32, i32
  }
  func.func @transform_1(%arg0: i32) -> (i32, i32) {
    %c0_i32 = arith.constant 0 : i32
    %c0_i32_0 = arith.constant 0 : i32
    %c0_i32_1 = arith.constant 0 : i32
    return %c0_i32, %c0_i32_0 : i32, i32
  }
  func.func @transform_2(%arg0: i32) -> (i32, i32) {
    %c0_i32 = arith.constant 0 : i32
    %c0_i32_0 = arith.constant 0 : i32
    %c0_i32_1 = arith.constant 0 : i32
    return %c0_i32, %c0_i32_0 : i32, i32
  }
  func.func @transform_3(%arg0: i32) -> (i32, i32) {
    %c0_i32 = arith.constant 0 : i32
    %c0_i32_0 = arith.constant 0 : i32
    return %arg0, %c0_i32 : i32, i32
  }
}

module attributes {stable_mosaic.version = 11 : i64} {
  func.func @_conv3x3_stats_kernel(%arg0: i32, %arg1: memref<1x18x18x8xbf16, #tpu.memory_space<vmem>>, %arg2: memref<72x8xbf16, #tpu.memory_space<vmem>>, %arg3: memref<1x16x16x8xf32, #tpu.memory_space<vmem>>, %arg4: memref<1x2x8xf32, #tpu.memory_space<vmem>>, %arg5: memref<256x72xbf16, #tpu.memory_space<vmem>>) attributes {dimension_semantics = [#tpu.dimension_semantics<parallel>], iteration_bounds = array<i64: 2>, scalar_prefetch = 0 : i64, scratch_operands = 1 : i64, tpu.core_type = #tpu.core_type<tc>, window_params = [{transform_indices = @transform_0, window_bounds = array<i64: 1, 18, 18, 8>}, {pipeline_mode = #tpu.pipeline_mode<synchronous>, transform_indices = @transform_1, window_bounds = array<i64: 72, 8>}, {transform_indices = @transform_2, window_bounds = array<i64: 1, 16, 16, 8>}, {transform_indices = @transform_3, window_bounds = array<i64: 1, 2, 8>}]} {
    %c0 = arith.constant 0 : index
    %c0_0 = arith.constant 0 : index
    %c0_1 = arith.constant 0 : index
    %c0_2 = arith.constant 0 : index
    %0 = vector.load %arg1[%c0, %c0_0, %c0_1, %c0_2] : memref<1x18x18x8xbf16, #tpu.memory_space<vmem>>, vector<1x18x18x8xbf16>
    %1 = vector.shape_cast %0 : vector<1x18x18x8xbf16> to vector<18x18x8xbf16>
    %2 = vector.extract_strided_slice %1 {offsets = [0, 0, 0], sizes = [16, 16, 8], strides = [1, 1, 1]} : vector<18x18x8xbf16> to vector<16x16x8xbf16>
    %3 = vector.shape_cast %2 : vector<16x16x8xbf16> to vector<256x8xbf16>
    %c0_3 = arith.constant 0 : index
    %c0_4 = arith.constant 0 : index
    %4 = vector.load %arg5[%c0_3, %c0_4] : memref<256x72xbf16, #tpu.memory_space<vmem>>, vector<256x8xbf16>
    tpu.vector_store %arg5[%c0_3, %c0_4], %3 {strides = array<i32>} : memref<256x72xbf16, #tpu.memory_space<vmem>>, vector<256x8xbf16>,
    %5 = vector.extract_strided_slice %1 {offsets = [0, 1, 0], sizes = [16, 16, 8], strides = [1, 1, 1]} : vector<18x18x8xbf16> to vector<16x16x8xbf16>
    %6 = vector.shape_cast %5 : vector<16x16x8xbf16> to vector<256x8xbf16>
    %c0_5 = arith.constant 0 : index
    %c8 = arith.constant 8 : index
    %7 = vector.load %arg5[%c0_5, %c8] : memref<256x72xbf16, #tpu.memory_space<vmem>>, vector<256x8xbf16>
    tpu.vector_store %arg5[%c0_5, %c8], %6 {strides = array<i32>} : memref<256x72xbf16, #tpu.memory_space<vmem>>, vector<256x8xbf16>,
    %8 = vector.extract_strided_slice %1 {offsets = [0, 2, 0], sizes = [16, 16, 8], strides = [1, 1, 1]} : vector<18x18x8xbf16> to vector<16x16x8xbf16>
    %9 = vector.shape_cast %8 : vector<16x16x8xbf16> to vector<256x8xbf16>
    %c0_6 = arith.constant 0 : index
    %c16 = arith.constant 16 : index
    %10 = vector.load %arg5[%c0_6, %c16] : memref<256x72xbf16, #tpu.memory_space<vmem>>, vector<256x8xbf16>
    tpu.vector_store %arg5[%c0_6, %c16], %9 {strides = array<i32>} : memref<256x72xbf16, #tpu.memory_space<vmem>>, vector<256x8xbf16>,
    %11 = vector.extract_strided_slice %1 {offsets = [1, 0, 0], sizes = [16, 16, 8], strides = [1, 1, 1]} : vector<18x18x8xbf16> to vector<16x16x8xbf16>
    %12 = vector.shape_cast %11 : vector<16x16x8xbf16> to vector<256x8xbf16>
    %c0_7 = arith.constant 0 : index
    %c24 = arith.constant 24 : index
    %13 = vector.load %arg5[%c0_7, %c24] : memref<256x72xbf16, #tpu.memory_space<vmem>>, vector<256x8xbf16>
    tpu.vector_store %arg5[%c0_7, %c24], %12 {strides = array<i32>} : memref<256x72xbf16, #tpu.memory_space<vmem>>, vector<256x8xbf16>,
    %14 = vector.extract_strided_slice %1 {offsets = [1, 1, 0], sizes = [16, 16, 8], strides = [1, 1, 1]} : vector<18x18x8xbf16> to vector<16x16x8xbf16>
    %15 = vector.shape_cast %14 : vector<16x16x8xbf16> to vector<256x8xbf16>
    %c0_8 = arith.constant 0 : index
    %c32 = arith.constant 32 : index
    %16 = vector.load %arg5[%c0_8, %c32] : memref<256x72xbf16, #tpu.memory_space<vmem>>, vector<256x8xbf16>
    tpu.vector_store %arg5[%c0_8, %c32], %15 {strides = array<i32>} : memref<256x72xbf16, #tpu.memory_space<vmem>>, vector<256x8xbf16>,
    %17 = vector.extract_strided_slice %1 {offsets = [1, 2, 0], sizes = [16, 16, 8], strides = [1, 1, 1]} : vector<18x18x8xbf16> to vector<16x16x8xbf16>
    %18 = vector.shape_cast %17 : vector<16x16x8xbf16> to vector<256x8xbf16>
    %c0_9 = arith.constant 0 : index
    %c40 = arith.constant 40 : index
    %19 = vector.load %arg5[%c0_9, %c40] : memref<256x72xbf16, #tpu.memory_space<vmem>>, vector<256x8xbf16>
    tpu.vector_store %arg5[%c0_9, %c40], %18 {strides = array<i32>} : memref<256x72xbf16, #tpu.memory_space<vmem>>, vector<256x8xbf16>,
    %20 = vector.extract_strided_slice %1 {offsets = [2, 0, 0], sizes = [16, 16, 8], strides = [1, 1, 1]} : vector<18x18x8xbf16> to vector<16x16x8xbf16>
    %21 = vector.shape_cast %20 : vector<16x16x8xbf16> to vector<256x8xbf16>
    %c0_10 = arith.constant 0 : index
    %c48 = arith.constant 48 : index
    %22 = vector.load %arg5[%c0_10, %c48] : memref<256x72xbf16, #tpu.memory_space<vmem>>, vector<256x8xbf16>
    tpu.vector_store %arg5[%c0_10, %c48], %21 {strides = array<i32>} : memref<256x72xbf16, #tpu.memory_space<vmem>>, vector<256x8xbf16>,
    %23 = vector.extract_strided_slice %1 {offsets = [2, 1, 0], sizes = [16, 16, 8], strides = [1, 1, 1]} : vector<18x18x8xbf16> to vector<16x16x8xbf16>
    %24 = vector.shape_cast %23 : vector<16x16x8xbf16> to vector<256x8xbf16>
    %c0_11 = arith.constant 0 : index
    %c56 = arith.constant 56 : index
    %25 = vector.load %arg5[%c0_11, %c56] : memref<256x72xbf16, #tpu.memory_space<vmem>>, vector<256x8xbf16>
    tpu.vector_store %arg5[%c0_11, %c56], %24 {strides = array<i32>} : memref<256x72xbf16, #tpu.memory_space<vmem>>, vector<256x8xbf16>,
    %26 = vector.extract_strided_slice %1 {offsets = [2, 2, 0], sizes = [16, 16, 8], strides = [1, 1, 1]} : vector<18x18x8xbf16> to vector<16x16x8xbf16>
    %27 = vector.shape_cast %26 : vector<16x16x8xbf16> to vector<256x8xbf16>
    %c0_12 = arith.constant 0 : index
    %c64 = arith.constant 64 : index
    %28 = vector.load %arg5[%c0_12, %c64] : memref<256x72xbf16, #tpu.memory_space<vmem>>, vector<256x8xbf16>
    tpu.vector_store %arg5[%c0_12, %c64], %27 {strides = array<i32>} : memref<256x72xbf16, #tpu.memory_space<vmem>>, vector<256x8xbf16>,
    %c0_13 = arith.constant 0 : index
    %c0_14 = arith.constant 0 : index
    %29 = vector.load %arg5[%c0_13, %c0_14] : memref<256x72xbf16, #tpu.memory_space<vmem>>, vector<256x72xbf16>
    %c0_15 = arith.constant 0 : index
    %c0_16 = arith.constant 0 : index
    %30 = vector.load %arg2[%c0_15, %c0_16] : memref<72x8xbf16, #tpu.memory_space<vmem>>, vector<72x8xbf16>
    %cst = arith.constant dense<0.000000e+00> : vector<256x8xf32>
    %31 = tpu.matmul %29, %30, %cst {dimension_numbers = #tpu.dot_dimension_numbers<[1], [0], [0], [1], [0, 0, 1, 1], [], []>} : vector<256x72xbf16>, vector<72x8xbf16>, vector<256x8xf32> -> vector<256x8xf32>
    %cst_17 = arith.constant dense<0.000000e+00> : vector<8xf32>
    %32 = vector.multi_reduction <add>, %31, %cst_17 [0] : vector<256x8xf32> to vector<8xf32>
    %33 = vector.shape_cast %32 : vector<8xf32> to vector<1x8xf32>
    %34 = arith.mulf %31, %31 : vector<256x8xf32>
    %cst_18 = arith.constant dense<0.000000e+00> : vector<8xf32>
    %35 = vector.multi_reduction <add>, %34, %cst_18 [0] : vector<256x8xf32> to vector<8xf32>
    %36 = vector.shape_cast %35 : vector<8xf32> to vector<1x8xf32>
    %37 = tpu.concatenate %33, %36 in 0 : vector<1x8xf32>, vector<1x8xf32> -> vector<2x8xf32>
    %38 = vector.shape_cast %37 : vector<2x8xf32> to vector<1x2x8xf32>
    %c0_19 = arith.constant 0 : index
    %c0_20 = arith.constant 0 : index
    %c0_21 = arith.constant 0 : index
    %39 = vector.load %arg4[%c0_19, %c0_20, %c0_21] : memref<1x2x8xf32, #tpu.memory_space<vmem>>, vector<1x2x8xf32>
    tpu.vector_store %arg4[%c0_19, %c0_20, %c0_21], %38 {strides = array<i32>} : memref<1x2x8xf32, #tpu.memory_space<vmem>>, vector<1x2x8xf32>,
    %40 = vector.shape_cast %31 : vector<256x8xf32> to vector<1x16x16x8xf32>
    %c0_22 = arith.constant 0 : index
    %c0_23 = arith.constant 0 : index
    %c0_24 = arith.constant 0 : index
    %c0_25 = arith.constant 0 : index
    %41 = vector.load %arg3[%c0_22, %c0_23, %c0_24, %c0_25] : memref<1x16x16x8xf32, #tpu.memory_space<vmem>>, vector<1x16x16x8xf32>
    tpu.vector_store %arg3[%c0_22, %c0_23, %c0_24, %c0_25], %40 {strides = array<i32>} : memref<1x16x16x8xf32, #tpu.memory_space<vmem>>, vector<1x16x16x8xf32>,
    return
  }
  func.func @transform_0(%arg0: i32) -> (i32, i32, i32, i32) {
    %c0_i32 = arith.constant 0 : i32
    %c0_i32_0 = arith.constant 0 : i32
    %c0_i32_1 = arith.constant 0 : i32
    %c0_i32_2 = arith.constant 0 : i32
    return %arg0, %c0_i32, %c0_i32_0, %c0_i32_1 : i32, i32, i32, i32
  }
  func.func @transform_1(%arg0: i32) -> (i32, i32) {
    %c0_i32 = arith.constant 0 : i32
    %c0_i32_0 = arith.constant 0 : i32
    %c0_i32_1 = arith.constant 0 : i32
    return %c0_i32, %c0_i32_0 : i32, i32
  }
  func.func @transform_2(%arg0: i32) -> (i32, i32, i32, i32) {
    %c0_i32 = arith.constant 0 : i32
    %c0_i32_0 = arith.constant 0 : i32
    %c0_i32_1 = arith.constant 0 : i32
    %c0_i32_2 = arith.constant 0 : i32
    return %arg0, %c0_i32, %c0_i32_0, %c0_i32_1 : i32, i32, i32, i32
  }
  func.func @transform_3(%arg0: i32) -> (i32, i32, i32) {
    %c0_i32 = arith.constant 0 : i32
    %c0_i32_0 = arith.constant 0 : i32
    %c0_i32_1 = arith.constant 0 : i32
    return %arg0, %c0_i32, %c0_i32_0 : i32, i32, i32
  }
}

</mosaic_0001>

<bundles_post_ra>
// kernel: tile.23
= control target key start
LH: loop header
LB: loop body
LE: loop exit
PB: predicated region body
PF: predicated region fallthrough
CT: control target
= control target key end

     0   :  { %s28_s0 = inlined_call_operand.vmem [shape: f32[8], index: 0, kind: input, shape index: {}]   ;;  %s29_s1 = inlined_call_operand.vmem [shape: f32[16,8], index: 1, kind: output, shape index: {}]  }
   0x1   :  { %v4_v0 = vld [vmem:[%s28_s0] ss:$0 sm:$0xff] }
   0x2   :  { %5 = vst [vmem:[%s29_s1] sm:$0xff] %v4_v0  ;;  %8 = vst [vmem:[%s29_s1 + $0x8] sm:$0xff] %v4_v0 }

// kernel: tile.24
= control target key start
LH: loop header
LB: loop body
LE: loop exit
PB: predicated region body
PF: predicated region fallthrough
CT: control target
= control target key end

     0   :  { %s133_s10 = smov 120   ;;  %s134_s11 = smov 104   ;;  %vm3_vm0 = vcmask 64512   ;;  %vm9_vm1 = vcmask 1048512   ;;  %vm15_vm2 = vcmask 982912   ;;  %vm21_vm3 = vcmask 917312   ;;  %s209_s0 = inlined_call_operand.vmem [shape: f32[16,8], index: 0, kind: input, shape index: {}]   ;;  %s210_s1 = inlined_call_operand.vmem [shape: f32[1,128], index: 1, kind: output, shape index: {}]  }
   0x1   :  { %v103_v0 = vld [vmem:[%s209_s0 + $0xf] sm:$0x1]   ;;  %v105_v1 = vld [vmem:[%s209_s0 + $0xd] sm:$0x1]   ;;  %v104_v2 = vld [vmem:[%s209_s0 + $0xe] sm:$0x1]  }
   0x2   :  { %7 = vrot.lane.b32.xlu0 %v103_v0, %s133_s10  ;;  %19 = vrot.lane.b32.xlu1 %v105_v1, %s134_s11  ;;  %v106_v3 = vld [vmem:[%s209_s0 + $0xc] sm:$0x1]   ;;  %s135_s16 = smov 112   ;;  %s136_s17 = smov 96   ;;  %v107_v4 = vld [vmem:[%s209_s0 + $0xb] sm:$0x1]  }
   0x3   :  { %v108_v5 = vld [vmem:[%s209_s0 + $0xa] sm:$0x1]   ;;  %v2_v6 = vld [vmem:[%s209_s0] sm:$0x1]   ;;  %s137_s24 = smov 88   ;;  %s138_s25 = smov 80  }
   0x4   :  { %4 = vst.msk [vmem:[#allocation0] sm:$0x1] %vm3_vm0, %v2_v6   ;;  %v109_v7 = vld [vmem:[%s209_s0 + $0x9] sm:$0x1]   ;;  %v110_v8 = vld [vmem:[%s209_s0 + $0x8] sm:$0x1]  }
   0x5   :  { %s139_s30 = smov 72   ;;  %s140_s2 = smov 64   ;;  %v111_v9 = vld [vmem:[%s209_s0 + $0x7] sm:$0x1]   ;;  %v112_v10 = vld [vmem:[%s209_s0 + $0x6] sm:$0x1]  }
   0x6   :  { %13 = vrot.lane.b32.xlu0 %v104_v2, %s135_s16  ;;  %25 = vrot.lane.b32.xlu1 %v106_v3, %s136_s17  ;;  %s141_s7 = smov 56   ;;  %s142_s8 = smov 48   ;;  %v113_v11 = vld [vmem:[%s209_s0 + $0x5] sm:$0x1]   ;;  %v114_v12 = vld [vmem:[%s209_s0 + $0x4] sm:$0x1]  }
   0x7   :  { %s143_s13 = smov 40   ;;  %s144_s14 = smov 32   ;;  %v115_v13 = vld [vmem:[%s209_s0 + $0x3] sm:$0x1]   ;;  %v116_v14 = vld [vmem:[%s209_s0 + $0x2] sm:$0x1]  }
   0x8   :  { %s145_s19 = smov 24   ;;  %s146_s20 = smov 16   ;;  %v117_v15 = vld [vmem:[%s209_s0 + $0x1] sm:$0x1]   ;;  %vm27_vm4 = vcmask 851712   ;;  %vm33_vm5 = vcmask 786112  }
   0x9   :  { %s147_s0 = smov 8   ;;  %vm39_vm6 = vcmask 720512   ;;  %vm45_vm7 = vcmask 654912   ;;  %vm51_vm8 = vcmask 589312   ;;  %vm57_vm9 = vcmask 523712  }
   0xa   :  { %31 = vrot.lane.b32.xlu0 %v107_v4, %s137_s24  ;;  %37 = vrot.lane.b32.xlu1 %v108_v5, %s138_s25  ;;  %vm63_vm10 = vcmask 458112   ;;  %vm69_vm11 = vcmask 392512   ;;  %vm75_vm12 = vcmask 326912   ;;  %vm81_vm13 = vcmask 261312  }
   0xb   :  { %vm87_vm14 = vcmask 195712   ;;  %vm93_vm15 = vcmask 130112  }
   0xe   :  { %43 = vrot.lane.b32.xlu0 %v109_v7, %s139_s30  ;;  %49 = vrot.lane.b32.xlu1 %v110_v8, %s140_s2 }
  0x12   :  { %55 = vrot.lane.b32.xlu0 %v111_v9, %s141_s7  ;;  %61 = vrot.lane.b32.xlu1 %v112_v10, %s142_s8 }
  0x16   :  { %67 = vrot.lane.b32.xlu0 %v113_v11, %s143_s13  ;;  %73 = vrot.lane.b32.xlu1 %v114_v12, %s144_s14 }
  0x1a   :  { %79 = vrot.lane.b32.xlu0 %v115_v13, %s145_s19  ;;  %85 = vrot.lane.b32.xlu1 %v116_v14, %s146_s20 }
  0x1e   :  { %91 = vrot.lane.b32.xlu0 %v117_v15, %s147_s0 }
  0x74   :  { %v8_v16 = vpop.permute.xlu0 %7   ;;  %v20_v17 = vpop.permute.xlu1 %19  }
  0x75   :  { %10 = vst.msk [vmem:[#allocation0] sm:$0x1] %vm9_vm1, %v8_v16  }
  0x78   :  { %v14_v18 = vpop.permute.xlu0 %13   ;;  %v26_v19 = vpop.permute.xlu1 %25  }
  0x79   :  { %16 = vst.msk [vmem:[#allocation0] sm:$0x1] %vm15_vm2, %v14_v18  }
  0x7a   :  { %22 = vst.msk [vmem:[#allocation0] sm:$0x1] %vm21_vm3, %v20_v17  }
  0x7b   :  { %28 = vst.msk [vmem:[#allocation0] sm:$0x1] %vm27_vm4, %v26_v19  }
  0x7c   :  { %v32_v20 = vpop.permute.xlu0 %31   ;;  %v38_v21 = vpop.permute.xlu1 %37  }
  0x7d   :  { %34 = vst.msk [vmem:[#allocation0] sm:$0x1] %vm33_vm5, %v32_v20  }
  0x7e   :  { %40 = vst.msk [vmem:[#allocation0] sm:$0x1] %vm39_vm6, %v38_v21  }
  0x80   :  { %v44_v22 = vpop.permute.xlu0 %43   ;;  %v50_v23 = vpop.permute.xlu1 %49  }
  0x81   :  { %46 = vst.msk [vmem:[#allocation0] sm:$0x1] %vm45_vm7, %v44_v22  }
  0x82   :  { %52 = vst.msk [vmem:[#allocation0] sm:$0x1] %vm51_vm8, %v50_v23  }
  0x84   :  { %v56_v24 = vpop.permute.xlu0 %55   ;;  %v62_v25 = vpop.permute.xlu1 %61  }
  0x85   :  { %58 = vst.msk [vmem:[#allocation0] sm:$0x1] %vm57_vm9, %v56_v24  }
  0x86   :  { %64 = vst.msk [vmem:[#allocation0] sm:$0x1] %vm63_vm10, %v62_v25  }
  0x88   :  { %v68_v26 = vpop.permute.xlu0 %67   ;;  %v74_v27 = vpop.permute.xlu1 %73  }
  0x89   :  { %70 = vst.msk [vmem:[#allocation0] sm:$0x1] %vm69_vm11, %v68_v26  }
  0x8a   :  { %76 = vst.msk [vmem:[#allocation0] sm:$0x1] %vm75_vm12, %v74_v27  }
  0x8c   :  { %v80_v28 = vpop.permute.xlu0 %79   ;;  %v86_v29 = vpop.permute.xlu1 %85  }
  0x8d   :  { %82 = vst.msk [vmem:[#allocation0] sm:$0x1] %vm81_vm13, %v80_v28  }
  0x8e   :  { %88 = vst.msk [vmem:[#allocation0] sm:$0x1] %vm87_vm14, %v86_v29  }
  0x90   :  { %v92_v30 = vpop.permute.xlu0 %91  }
  0x91   :  { %94 = vst.msk [vmem:[#allocation0] sm:$0x1] %vm93_vm15, %v92_v30  }
  0x98   :  { %v99_v31 = vld [vmem:[#allocation0] sm:$0x1] }
  0x99   :  { %102 = vst [vmem:[%s210_s1] sm:$0x1] %v99_v31 }

// kernel: conv_block_forward.5
= control target key start
LH: loop header
LB: loop body
LE: loop exit
PB: predicated region body
PF: predicated region fallthrough
CT: control target
= control target key end

     0   :  { %s133_s0 = inlined_call_operand.vmem [shape: f32[32,128], index: 0, kind: input, shape index: {}]   ;;  %s134_s1 = inlined_call_operand.vmem [shape: f32[1,128], index: 1, kind: input, shape index: {}]   ;;  %s135_s2 = inlined_call_operand.vmem [shape: f32[1,128], index: 2, kind: input, shape index: {}]   ;;  %s136_s3 = inlined_call_operand.vmem [shape: bf16[32,128], index: 3, kind: output, shape index: {}]  }
   0x1   :  { %v14_v0 = vld [vmem:[%s133_s0] sm:$0xff]  ;;  %v15_v1 = vld [vmem:[%s133_s0 + $0x8] sm:$0xff]  ;;  %v16_v6 = vld [vmem:[%s133_s0 + $0x10] sm:$0xff] }
   0x2   :  { %v68_v2 = vld [vmem:[%s134_s1] ss:$0 sm:$0xff]  ;;  %v17_v7 = vld [vmem:[%s133_s0 + $0x18] sm:$0xff] }
   0x3   :  { %v25_v3 = vmul.f32 %v68_v2, %v14_v0  ;;  %v26_v4 = vmul.f32 %v68_v2, %v15_v1  ;;  %v69_v5 = vld [vmem:[%s135_s2] ss:$0 sm:$0xff]  ;;  %v27_v8 = vmul.f32 %v68_v2, %v16_v6  ;;  %v28_v9 = vmul.f32 %v68_v2, %v17_v7 }
   0x5   :  { %v36_v10 = vadd.f32 %v69_v5, %v25_v3  ;;  %v37_v11 = vadd.f32 %v69_v5, %v26_v4  ;;  %v38_v12 = vadd.f32 %v69_v5, %v27_v8  ;;  %v39_v13 = vadd.f32 %v69_v5, %v28_v9 }
   0x7   :  { %v40_v14 = vmax.f32 %v36_v10, 0.0  ;;  %v41_v15 = vmax.f32 %v37_v11, 0.0  ;;  %v42_v16 = vmax.f32 %v38_v12, 0.0  ;;  %v43_v17 = vmax.f32 %v39_v13, 0.0 }
   0x9   :  { %v81_v18 = vpack.c.bf16 %v41_v15, %v40_v14  ;;  %v86_v19 = vpack.c.bf16 %v43_v17, %v42_v16 }
   0xb   :  { %82 = vst [vmem:[%s136_s3] sm:$0xff] %v81_v18   ;;  %88 = vst [vmem:[%s136_s3 + $0x8] sm:$0xff] %v86_v19  }

// kernel: conv_block_forward.7
= control target key start
LH: loop header
LB: loop body
LE: loop exit
PB: predicated region body
PF: predicated region fallthrough
CT: control target
= control target key end

     0   :  { %s104_s0 = inlined_call_operand.vmem [shape: f32[32,128], index: 0, kind: input, shape index: {}]   ;;  %s105_s1 = inlined_call_operand.vmem [shape: f32[1,128], index: 1, kind: input, shape index: {}]   ;;  %s106_s2 = inlined_call_operand.vmem [shape: f32[1,128], index: 2, kind: input, shape index: {}]   ;;  %s107_s3 = inlined_call_operand.vmem [shape: f32[32,128], index: 3, kind: output, shape index: {}]  }
   0x1   :  { %v14_v0 = vld [vmem:[%s104_s0] sm:$0xff]  ;;  %v15_v4 = vld [vmem:[%s104_s0 + $0x8] sm:$0xff]  ;;  %v16_v5 = vld [vmem:[%s104_s0 + $0x10] sm:$0xff] }
   0x2   :  { %v52_v1 = vld [vmem:[%s105_s1] ss:$0 sm:$0xff]  ;;  %v17_v6 = vld [vmem:[%s104_s0 + $0x18] sm:$0xff] }
   0x3   :  { %v53_v2 = vld [vmem:[%s106_s2] ss:$0 sm:$0xff]  ;;  %v25_v3 = vmul.f32 %v52_v1, %v14_v0  ;;  %v26_v7 = vmul.f32 %v52_v1, %v15_v4  ;;  %v27_v8 = vmul.f32 %v52_v1, %v16_v5  ;;  %v28_v9 = vmul.f32 %v52_v1, %v17_v6 }
   0x5   :  { %v36_v10 = vadd.f32 %v53_v2, %v25_v3  ;;  %v37_v11 = vadd.f32 %v53_v2, %v26_v7  ;;  %v38_v12 = vadd.f32 %v53_v2, %v27_v8  ;;  %v39_v13 = vadd.f32 %v53_v2, %v28_v9 }
   0x7   :  { %v40_v14 = vmax.f32 %v36_v10, 0.0  ;;  %v41_v15 = vmax.f32 %v37_v11, 0.0  ;;  %v42_v16 = vmax.f32 %v38_v12, 0.0  ;;  %v43_v17 = vmax.f32 %v39_v13, 0.0 }
   0x9   :  { %44 = vst [vmem:[%s107_s3] sm:$0xff] %v40_v14  ;;  %45 = vst [vmem:[%s107_s3 + $0x8] sm:$0xff] %v41_v15 }
   0xa   :  { %46 = vst [vmem:[%s107_s3 + $0x10] sm:$0xff] %v42_v16  ;;  %47 = vst [vmem:[%s107_s3 + $0x18] sm:$0xff] %v43_v17 }

// kernel: conv_block_forward.4
= control target key start
LH: loop header
LB: loop body
LE: loop exit
PB: predicated region body
PF: predicated region fallthrough
CT: control target
= control target key end

     0   :  { %s2761_s12 = smov 0   ;;  %s4341_s0 = inlined_call_operand.vmem [shape: bf16[2,18,18,4], index: 0, kind: input, shape index: {}]   ;;  %s4342_s1 = inlined_call_operand.vmem [shape: bf16[36,8], index: 1, kind: input, shape index: {}]   ;;  %s4343_s2 = inlined_call_operand.vmem [shape: f32[2,16,16,8], index: 2, kind: output, shape index: {0}]   ;;  %s4344_s3 = inlined_call_operand.vmem [shape: f32[2,2,8], index: 3, kind: output, shape index: {1}]  }
   0x1 LB: > { %s2559_s13 = sadd.s32 4294967295, %s2731_s12   ;;  %p2563_p0 = scmp.ge.s32.totalorder %s2731_s12, 1  ;;  %s2731_s12 = sphi %s2761_s12, %s14_s12  }
   0x2   : > { %p140_p1 = scmp.lt.s32.totalorder %s2731_s12, 3 }
   0x4   : > { %p141_p2 = pnand %p2563_p0, %p140_p1 }
   0x6   : > { %144 = sbr.rel (%p141_p2) target bundleno = 891 (0x37b), region = 28 }
   0xb   : > { %p168_p3 = scmp.lt.s32.totalorder %s2559_s13, 1  ;;  %vm237_vm0 = vcmask 27648   ;;  %vm270_vm1 = vsmask.f32 3328  ;;  %vm271_vm2 = vsmask.f32 7440 }
   0xc   : > { %vm2824_vm3 = vmor %vm270_vm1, %vm271_vm2  ;;  %v4427_v28 = vmov 0  ;;  %s2733_s18 = smov 4   ;;  %vm834_vm4 = vcmask 1042432   ;;  %vm835_vm5 = vcmask 1046532   ;;  %s2734_s19 = smov 8   ;;  %vm753_vm7 = vcmask 60448  }
   0xd   : > { %s4519_s13 = smov (!%p168_p3, %s2559_s13), 1  ;;  %v4428_v28 = vsel %vm2824_vm3, 4294967295, %v4427_v28  ;;  %vm3243_vm6 = vmor %vm834_vm4, %vm835_vm5  ;;  %s2735_s20 = smov 12   ;;  %vm1045_vm8 = vcmask 93248   ;;  %vm2101_vm9 = vcmask 1041408   ;;  %vm1176_vm10 = vcmask 126048  }
   0xe   : > { %s2689_s14 = smul.u32 216, %s4519_s13  ;;  %4429 = vst [vmem:[#allocation3_spill] sm:$0xff] %v4428_v28  ;;  %s2736_s21 = smov 16   ;;  %vm1329_vm11 = vcmask 158848   ;;  %vm1466_vm12 = vcmask 191648   ;;  %vm1597_vm13 = vcmask 224448  }
   0xf   : > { %s2737_s22 = smov 20   ;;  %s2738_s23 = smov 24   ;;  %vm1750_vm14 = vcmask 257248   ;;  %vm1887_vm15 = vcmask 290048   ;;  %vm2266_vm1 = vcmask 64512   ;;  %vm2437_vm2 = vcmask 1040384  }
  0x10   : > { %s2775_s17 = scalar_lea.vmem %s4341_s0, %s2689_s14  ;;  %s2739_s26 = smov 28  }
  0x11   : > { %v2778_v0 = vld [vmem:[%s2775_s17 + $0xc] sm:$0xf]  ;;  %v2781_v1 = vld [vmem:[%s2775_s17 + $0x10] sm:$0xf]  ;;  %v2784_v2 = vld [vmem:[%s2775_s17] sm:$0xf] }
  0x12   : > { %v298_v3 = vshrl.u32 %v2778_v0, 16  ;;  %v301_v4 = vshll.u32 %v2778_v0, 16  ;;  %v307_v5 = vshll.u32 %v2781_v1, 16  ;;  %v2790_v6 = vld [vmem:[%s2775_s17 + $0x4] sm:$0xf]  ;;  %v274_v7 = vshrl.u32 %v2784_v2, 16 }
  0x13   : > { %240 = vst.msk [vmem:[#allocation2 + $0x8] sm:$0xf] %vm237_vm0, %v2778_v0  ;;  %238 = vst.msk [vmem:[#allocation2] sm:$0xf] %vm237_vm0, %v2784_v2  ;;  %v277_v8 = vshll.u32 %v2784_v2, 16  ;;  %v283_v9 = vshll.u32 %v2790_v6, 16 }
  0x14   : > { %241 = vst.msk [vmem:[#allocation2 + $0xc] sm:$0xf] %vm237_vm0, %v2781_v1  ;;  %v2802_v10 = vld [vmem:[%s2775_s17 + $0x14] sm:$0x1]  ;;  %v311_v11 = vshrl.u32 %v2781_v1, 16  ;;  %v287_v12 = vshrl.u32 %v2790_v6, 16 }
  0x15   : > { %239 = vst.msk [vmem:[#allocation2 + $0x4] sm:$0xf] %vm237_vm0, %v2790_v6  ;;  %v300_v13 = vrot.slane %v298_v3, 4  ;;  %v303_v14 = vrot.slane %v301_v4, 5  ;;  %v309_v15 = vrot.slane %v307_v5, 5  ;;  %v276_v16 = vrot.slane %v274_v7, 4 }
  0x16   : > { %v2809_v17 = vld [vmem:[%s2775_s17 + $0x8] sm:$0x1]  ;;  %v279_v18 = vrot.slane %v277_v8, 5  ;;  %v285_v19 = vrot.slane %v283_v9, 5  ;;  %v313_v20 = vrot.slane %v311_v11, 4  ;;  %v317_v21 = vshll.u32 %v2802_v10, 16 }
  0x17   : > { %v2813_v22 = vld [vmem:[%s2775_s17 + $0x1c] sm:$0xf]  ;;  %v304_v23 = vor.u32 %v303_v14, %v300_v13  ;;  %v289_v24 = vrot.slane %v287_v12, 4  ;;  %v293_v25 = vshll.u32 %v2809_v17, 16  ;;  %v2817_v26 = vld [vmem:[%s2775_s17 + $0x20] sm:$0x1] }
  0x18   : > { %v331_v27 = vshll.u32 %v2813_v22, 16  ;;  %243 = vst.msk [vmem:[#allocation2 + $0x14] sm:$0xf] %vm237_vm0, %v2813_v22  ;;  %v280_v29 = vor.u32 %v279_v18, %v276_v16  ;;  %v314_v30 = vor.u32 %v313_v20, %v309_v15  ;;  %v319_v31 = vrot.slane %v317_v21, 5  ;;  %v2830_v33 = vld [vmem:[%s2775_s17 + $0x18] sm:$0xf] }
  0x19   : > { %v335_v32 = vshrl.u32 %v2813_v22, 16  ;;  %v2833_v34 = vld [vmem:[%s2775_s17 + $0x28] sm:$0xf]  ;;  %v305_v35 = vrot.slane %v304_v23, 4  ;;  %v290_v36 = vor.u32 %v289_v24, %v285_v19  ;;  %v295_v37 = vrot.slane %v293_v25, 5  ;;  %s2740_s4 = smov 32  }
  0x1a   : > { %v333_v38 = vrot.slane %v331_v27, 5  ;;  %v2836_v39 = vld [vmem:[%s2775_s17 + $0x2c] sm:$0x1]  ;;  %242 = vst.msk [vmem:[#allocation2 + $0x10] sm:$0xf] %vm237_vm0, %v2830_v33  ;;  %v281_v40 = vrot.slane %v280_v29, 4 }
  0x1b   : > { %245 = vst.msk [vmem:[#allocation2 + $0x1c] sm:$0xf] %vm237_vm0, %v2833_v34  ;;  %v315_v41 = vrot.slane %v314_v30, 4  ;;  %v337_v42 = vrot.slane %v335_v32, 4  ;;  %v341_v43 = vshll.u32 %v2817_v26, 16  ;;  %v2848_v45 = vsel %vm2824_vm3, %v305_v35, %v309_v15  ;;  %s2623_s5 = sshll.u32 %s4519_s13, 8 }
  0x1c   : > { %v2844_v44 = vld [vmem:[%s2775_s17 + $0x24] sm:$0xf]  ;;  %4430 = vst [vmem:[#allocation4_spill] sm:$0xff] %v2848_v45  ;;  %v291_v46 = vrot.slane %v290_v36, 4  ;;  %v322_v47 = vshrl.u32 %v2830_v33, 16  ;;  %v325_v48 = vshll.u32 %v2830_v33, 16  ;;  %661 = vrot.lane.b32.xlu1 %v2848_v45, %s2733_s18  ;;  %v286_v50 = vsel %vm2824_vm3, %v281_v40, %v285_v19  ;;  %s4143_s8 = scalar_lea.vmem %s4343_s2, %s2623_s5 }
  0x1d   : > { %v2853_v49 = vld [vmem:[%s2775_s17 + $0x34] sm:$0xf]  ;;  %244 = vst.msk [vmem:[#allocation2 + $0x18] sm:$0xf] %vm237_vm0, %v2844_v44  ;;  %v2863_v51 = vsel %vm2824_vm3, %v315_v41, %v319_v31  ;;  %v338_v52 = vor.u32 %v337_v42, %v333_v38  ;;  %v343_v53 = vrot.slane %v341_v43, 5  ;;  %657 = vrot.lane.b32.xlu0 %v286_v50, %s2733_s18  ;;  %v355_v58 = vshll.u32 %v2833_v34, 16 }
  0x1e   : > { %4431 = vst [vmem:[#allocation5_spill] sm:$0xff] %v2863_v51  ;;  %v2866_v54 = vld [vmem:[%s2775_s17 + $0x30] sm:$0xf]  ;;  %247 = vst.msk [vmem:[#allocation2 + $0x24] sm:$0xf] %vm237_vm0, %v2853_v49  ;;  %v296_v55 = vsel %vm2824_vm3, %v291_v46, %v295_v37  ;;  %v324_v56 = vrot.slane %v322_v47, 4 }
  0x1f   : > { %v327_v57 = vrot.slane %v325_v48, 5  ;;  %v2875_v59 = vld [vmem:[%s2775_s17 + $0x40] sm:$0xf]  ;;  %246 = vst.msk [vmem:[#allocation2 + $0x20] sm:$0xf] %vm237_vm0, %v2866_v54  ;;  %v339_v60 = vrot.slane %v338_v52, 4 }
  0x20   : > { %v359_v61 = vshrl.u32 %v2833_v34, 16  ;;  %v365_v62 = vshll.u32 %v2836_v39, 16  ;;  %v346_v63 = vshrl.u32 %v2844_v44, 16  ;;  %v2883_v3 = vld [vmem:[%s2775_s17 + $0x38] sm:$0x1]  ;;  %v357_v5 = vrot.slane %v355_v58, 5  ;;  %663 = vrot.lane.b32.xlu1 %v2863_v51, %s2733_s18 }
  0x21   : > { %249 = vst.msk [vmem:[#allocation2 + $0x2c] sm:$0xf] %vm237_vm0, %v2875_v59  ;;  %v328_v4 = vor.u32 %v327_v57, %v324_v56  ;;  %v349_v7 = vshll.u32 %v2844_v44, 16  ;;  %v379_v8 = vshll.u32 %v2853_v49, 16  ;;  %v2890_v9 = vld [vmem:[%s2775_s17 + $0x3c] sm:$0xf]  ;;  %v2896_v11 = vsel %vm2824_vm3, %v339_v60, %v343_v53  ;;  %659 = vrot.lane.b32.xlu0 %v296_v55, %s2733_s18 }
  0x22   : > { %4432 = vst [vmem:[#allocation6_spill] sm:$0xff] %v2896_v11  ;;  %v361_v12 = vrot.slane %v359_v61, 4  ;;  %v367_v13 = vrot.slane %v365_v62, 5  ;;  %v348_v14 = vrot.slane %v346_v63, 4  ;;  %v2899_v15 = vld [vmem:[%s2775_s17 + $0x4c] sm:$0xf] }
  0x23   : > { %248 = vst.msk [vmem:[#allocation2 + $0x28] sm:$0xf] %vm237_vm0, %v2890_v9  ;;  %v329_v16 = vrot.slane %v328_v4, 4  ;;  %v351_v18 = vrot.slane %v349_v7, 5  ;;  %v381_v19 = vrot.slane %v379_v8, 5  ;;  %v383_v20 = vshrl.u32 %v2853_v49, 16 }
  0x24   : > { %251 = vst.msk [vmem:[#allocation2 + $0x34] sm:$0xf] %vm237_vm0, %v2899_v15  ;;  %v362_v21 = vor.u32 %v361_v12, %v357_v5  ;;  %v389_v23 = vshll.u32 %v2883_v3, 16  ;;  %v370_v24 = vshrl.u32 %v2866_v54, 16  ;;  %v373_v25 = vshll.u32 %v2866_v54, 16  ;;  %667 = vrot.lane.b32.xlu1 %v2896_v11, %s2733_s18  ;;  %s2567_s9 = sshll.u32 %s4519_s13, 1 }
  0x25   : > { %v2911_v27 = vld [vmem:[%s2775_s17 + $0x48] sm:$0xf]  ;;  %v2915_v29 = vsel %vm2824_vm3, %v329_v16, %v333_v38  ;;  %v352_v30 = vor.u32 %v351_v18, %v348_v14  ;;  %v385_v31 = vrot.slane %v383_v20, 4  ;;  %v2918_v32 = vld [vmem:[%s2775_s17 + $0x44] sm:$0x1]  ;;  %v403_v35 = vshll.u32 %v2875_v59, 16  ;;  %s181_s14 = scalar_lea.vmem %s4344_s3, %s2567_s9 }
  0x26   : > { %4433 = vst [vmem:[#allocation7_spill] sm:$0xff] %v2915_v29  ;;  %v2922_v36 = vld [vmem:[%s2775_s17 + $0x58] sm:$0xf]  ;;  %250 = vst.msk [vmem:[#allocation2 + $0x30] sm:$0xf] %vm237_vm0, %v2911_v27  ;;  %v363_v37 = vrot.slane %v362_v21, 4  ;;  %665 = vrot.lane.b32.xlu0 %v2915_v29, %s2733_s18 }
  0x27   : > { %v391_v40 = vrot.slane %v389_v23, 5  ;;  %v372_v38 = vrot.slane %v370_v24, 4  ;;  %v375_v41 = vrot.slane %v373_v25, 5  ;;  %v2929_v42 = vld [vmem:[%s2775_s17 + $0x54] sm:$0xf]  ;;  %v353_v43 = vrot.slane %v352_v30, 4 }
  0x28   : > { %253 = vst.msk [vmem:[#allocation2 + $0x3c] sm:$0xf] %vm237_vm0, %v2922_v36  ;;  %v386_v46 = vor.u32 %v385_v31, %v381_v19  ;;  %v2935_v47 = vrot.slane %v403_v35, 5  ;;  %v407_v48 = vshrl.u32 %v2875_v59, 16  ;;  %v2939_v50 = vld [vmem:[%s2775_s17 + $0x64] sm:$0xf]  ;;  %v2945_v52 = vsel %vm2824_vm3, %v363_v37, %v367_v13 }
  0x29   : > { %252 = vst.msk [vmem:[#allocation2 + $0x38] sm:$0xf] %vm237_vm0, %v2929_v42  ;;  %4434 = vst [vmem:[#allocation8_spill] sm:$0xff] %v2945_v52  ;;  %v376_v53 = vor.u32 %v375_v41, %v372_v38  ;;  %v413_v55 = vshll.u32 %v2918_v32, 16  ;;  %v394_v56 = vshrl.u32 %v2890_v9, 16  ;;  %v2959_v60 = vsel %vm2824_vm3, %v353_v43, %v357_v5  ;;  %671 = vrot.lane.b32.xlu1 %v2945_v52, %s2733_s18 }
  0x2a   : > { %v2950_v57 = vld [vmem:[%s2775_s17 + $0x50] sm:$0x1]  ;;  %v2953_v58 = vld [vmem:[%s2775_s17 + $0x60] sm:$0xf]  ;;  %255 = vst.msk [vmem:[#allocation2 + $0x44] sm:$0xf] %vm237_vm0, %v2939_v50  ;;  %669 = vrot.lane.b32.xlu0 %v2959_v60, %s2733_s18 }
  0x2b   : > { %4435 = vst [vmem:[#allocation9_spill] sm:$0xff] %v2959_v60  ;;  %v387_v61 = vrot.slane %v386_v46, 4  ;;  %v409_v62 = vrot.slane %v407_v48, 4  ;;  %v397_v63 = vshll.u32 %v2890_v9, 16  ;;  %v2963_v4 = vld [vmem:[%s2775_s17 + $0x70] sm:$0xf] }
  0x2c   : > { %254 = vst.msk [vmem:[#allocation2 + $0x40] sm:$0xf] %vm237_vm0, %v2953_v58  ;;  %v377_v7 = vrot.slane %v376_v53, 4  ;;  %v415_v8 = vrot.slane %v413_v55, 5  ;;  %v396_v12 = vrot.slane %v394_v56, 4  ;;  %v427_v5 = vshll.u32 %v2899_v15, 16 }
  0x2d   : > { %257 = vst.msk [vmem:[#allocation2 + $0x4c] sm:$0xf] %vm237_vm0, %v2963_v4  ;;  %v2976_v13 = vsel %vm2824_vm3, %v387_v61, %v391_v40  ;;  %v410_v14 = vor.u32 %v409_v62, %v2935_v47  ;;  %v399_v16 = vrot.slane %v397_v63, 5  ;;  %v431_v18 = vshrl.u32 %v2899_v15, 16  ;;  %v2981_v20 = vld [vmem:[%s2775_s17 + $0x6c] sm:$0xf] }
  0x2e   : > { %4436 = vst [vmem:[#allocation10_spill] sm:$0xff] %v2976_v13  ;;  %4437 = vst [vmem:[#allocation11_spill] sm:$0xff] %v2981_v20  ;;  %v2984_v21 = vld [vmem:[%s2775_s17 + $0x7c] sm:$0xf]  ;;  %v2988_v23 = vsel %vm2824_vm3, %v377_v7, %v381_v19  ;;  %v429_v24 = vrot.slane %v427_v5, 5  ;;  %v437_v25 = vshll.u32 %v2950_v57, 16  ;;  %675 = vrot.lane.b32.xlu1 %v2976_v13, %s2733_s18 }
  0x2f   : > { %4438 = vst [vmem:[#allocation12_spill] sm:$0xff] %v2988_v23  ;;  %v418_v30 = vshrl.u32 %v2911_v27, 16  ;;  %v2993_v31 = vld [vmem:[%s2775_s17 + $0x5c] sm:$0x1]  ;;  %256 = vst.msk [vmem:[#allocation2 + $0x48] sm:$0xf] %vm237_vm0, %v2981_v20  ;;  %v400_v37 = vor.u32 %v399_v16, %v396_v12  ;;  %673 = vrot.lane.b32.xlu0 %v2988_v23, %s2733_s18 }
  0x30   : > { %259 = vst.msk [vmem:[#allocation2 + $0x54] sm:$0xf] %vm237_vm0, %v2984_v21  ;;  %v411_v35 = vrot.slane %v410_v14, 4  ;;  %v433_v40 = vrot.slane %v431_v18, 4  ;;  %v421_v19 = vshll.u32 %v2911_v27, 16  ;;  %v439_v41 = vrot.slane %v437_v25, 5 }
  0x31   : > { %v3001_v38 = vld [vmem:[%s2775_s17 + $0x78] sm:$0xf]  ;;  %v420_v43 = vrot.slane %v418_v30, 4  ;;  %v451_v46 = vshll.u32 %v2922_v36, 16  ;;  %v455_v48 = vshrl.u32 %v2922_v36, 16  ;;  %v401_v56 = vrot.slane %v400_v37, 4 }
  0x32   : > { %4439 = vst [vmem:[#allocation13_spill] sm:$0xff] %v3001_v38  ;;  %v3008_v53 = vld [vmem:[%s2775_s17 + $0x88] sm:$0xf]  ;;  %258 = vst.msk [vmem:[#allocation2 + $0x50] sm:$0xf] %vm237_vm0, %v3001_v38  ;;  %v3016_v55 = vsel %vm2824_vm3, %v411_v35, %v415_v8  ;;  %v434_v61 = vor.u32 %v433_v40, %v429_v24  ;;  %v423_v62 = vrot.slane %v421_v19, 5 }
  0x33   : > { %4440 = vst [vmem:[#allocation14_spill] sm:$0xff] %v3016_v55  ;;  %v3019_v63 = vld [vmem:[%s2775_s17 + $0x84] sm:$0xf]  ;;  %261 = vst.msk [vmem:[#allocation2 + $0x5c] sm:$0xf] %vm237_vm0, %v3008_v53  ;;  %v453_v7 = vrot.slane %v451_v46, 5  ;;  %v3033_v8 = vsel %vm2824_vm3, %v401_v56, %v2935_v47  ;;  %679 = vrot.lane.b32.xlu1 %v3016_v55, %s2733_s18 }
  0x34   : > { %4441 = vst [vmem:[#allocation15_spill] sm:$0xff] %v3019_v63  ;;  %v457_v12 = vrot.slane %v455_v48, 4  ;;  %v461_v5 = vshll.u32 %v2993_v31, 16  ;;  %v442_v14 = vshrl.u32 %v2929_v42, 16  ;;  %v3026_v16 = vld [vmem:[%s2775_s17 + $0x94] sm:$0xf]  ;;  %v424_v25 = vor.u32 %v423_v62, %v420_v43  ;;  %677 = vrot.lane.b32.xlu0 %v3033_v8, %s2733_s18 }
  0x35   : > { %4442 = vst [vmem:[#allocation16_spill] sm:$0xff] %v3026_v16  ;;  %260 = vst.msk [vmem:[#allocation2 + $0x58] sm:$0xf] %vm237_vm0, %v3019_v63  ;;  %v435_v18 = vrot.slane %v434_v61, 4  ;;  %v445_v30 = vshll.u32 %v2929_v42, 16  ;;  %v475_v47 = vshll.u32 %v2939_v50, 16 }
  0x36   : > { %4443 = vst [vmem:[#allocation17_spill] sm:$0xff] %v3033_v8  ;;  %v3037_v35 = vld [vmem:[%s2775_s17 + $0x68] sm:$0x1]  ;;  %v3040_v37 = vld [vmem:[%s2775_s17 + $0x90] sm:$0xf]  ;;  %v458_v40 = vor.u32 %v457_v12, %v453_v7  ;;  %v463_v19 = vrot.slane %v461_v5, 5 }
  0x37   : > { %4444 = vst [vmem:[#allocation18_spill] sm:$0xff] %v3040_v37  ;;  %263 = vst.msk [vmem:[#allocation2 + $0x64] sm:$0xf] %vm237_vm0, %v3026_v16  ;;  %v444_v46 = vrot.slane %v442_v14, 4  ;;  %v3048_v48 = vld [vmem:[%s2775_s17 + $0xa0] sm:$0xf]  ;;  %v3056_v43 = vsel %vm2824_vm3, %v435_v18, %v439_v41 }
  0x38   : > { %4445 = vst [vmem:[#allocation19_spill] sm:$0xff] %v3048_v48  ;;  %262 = vst.msk [vmem:[#allocation2 + $0x60] sm:$0xf] %vm237_vm0, %v3040_v37  ;;  %v425_v56 = vrot.slane %v424_v25, 4  ;;  %v447_v61 = vrot.slane %v445_v30, 5  ;;  %v479_v62 = vshrl.u32 %v2939_v50, 16  ;;  %683 = vrot.lane.b32.xlu1 %v3056_v43, %s2733_s18 }
  0x39   : > { %4446 = vst [vmem:[#allocation20_spill] sm:$0xff] %v3056_v43  ;;  %265 = vst.msk [vmem:[#allocation2 + $0x6c] sm:$0xf] %vm237_vm0, %v3048_v48  ;;  %v459_v12 = vrot.slane %v458_v40, 4  ;;  %v477_v5 = vrot.slane %v475_v47, 5  ;;  %v485_v14 = vshll.u32 %v3037_v35, 16 }
  0x3a   : > { %v466_v55 = vshrl.u32 %v2953_v58, 16  ;;  %v3064_v8 = vld [vmem:[%s2775_s17 + $0x9c] sm:$0xf]  ;;  %v3068_v41 = vsel %vm2824_vm3, %v425_v56, %v429_v24  ;;  %v448_v18 = vor.u32 %v447_v61, %v444_v46  ;;  %v481_v25 = vrot.slane %v479_v62, 4  ;;  %v3072_v13 = vld [vmem:[%s2775_s17 + $0x74] sm:$0x1] }
  0x3b   : > { %4447 = vst [vmem:[#allocation21_spill] sm:$0xff] %v3064_v8  ;;  %4448 = vst [vmem:[#allocation22_spill] sm:$0xff] %v3068_v41  ;;  %v469_v30 = vshll.u32 %v2953_v58, 16  ;;  %v3075_v40 = vld [vmem:[%s2775_s17 + $0xac] sm:$0xf]  ;;  %v3083_v47 = vsel %vm2824_vm3, %v459_v12, %v463_v19  ;;  %v487_v24 = vrot.slane %v485_v14, 5  ;;  %681 = vrot.lane.b32.xlu0 %v3068_v41, %s2733_s18 }
  0x3c   : > { %4449 = vst [vmem:[#allocation23_spill] sm:$0xff] %v3072_v13  ;;  %4450 = vst [vmem:[#allocation24_spill] sm:$0xff] %v3075_v40  ;;  %v468_v46 = vrot.slane %v466_v55, 4  ;;  %v499_v56 = vshll.u32 %v2963_v4, 16  ;;  %v3087_v61 = vld [vmem:[%s2775_s17 + $0xa8] sm:$0xf]  ;;  %v482_v43 = vor.u32 %v481_v25, %v477_v5  ;;  %687 = vrot.lane.b32.xlu1 %v3083_v47, %s2733_s18 }
  0x3d   : > { %264 = vst.msk [vmem:[#allocation2 + $0x68] sm:$0xf] %vm237_vm0, %v3064_v8  ;;  %4451 = vst [vmem:[#allocation25_spill] sm:$0xff] %v3083_v47  ;;  %v449_v62 = vrot.slane %v448_v18, 4  ;;  %v471_v23 = vrot.slane %v469_v30, 5  ;;  %v503_v19 = vshrl.u32 %v2963_v4, 16 }
  0x3e   : > { %4452 = vst [vmem:[#allocation26_spill] sm:$0xff] %v3087_v61  ;;  %267 = vst.msk [vmem:[#allocation2 + $0x74] sm:$0xf] %vm237_vm0, %v3075_v40  ;;  %v3095_v12 = vld [vmem:[%s2775_s17 + $0xb8] sm:$0xf]  ;;  %v501_v55 = vrot.slane %v499_v56, 5 }
  0x3f   : > { %266 = vst.msk [vmem:[#allocation2 + $0x70] sm:$0xf] %vm237_vm0, %v3087_v61  ;;  %v509_v14 = vshll.u32 %v3072_v13, 16  ;;  %v490_v52 = vshrl.u32 %v2981_v20, 16  ;;  %v493_v60 = vshll.u32 %v2981_v20, 16  ;;  %v3106_v18 = vsel %vm2824_vm3, %v449_v62, %v453_v7 }
  0x40   : > { %269 = vst.msk [vmem:[#allocation2 + $0x7c] sm:$0xf] %vm237_vm0, %v3095_v12  ;;  %4453 = vst [vmem:[#allocation27_spill] sm:$0xff] %v3106_v18  ;;  %v483_v25 = vrot.slane %v482_v43, 4  ;;  %v472_v30 = vor.u32 %v471_v23, %v468_v46  ;;  %v505_v41 = vrot.slane %v503_v19, 4  ;;  %v523_v20 = vshll.u32 %v2984_v21, 16  ;;  %685 = vrot.lane.b32.xlu0 %v3106_v18, %s2733_s18 }
  0x41   : > { %v3109_v11 = vld [vmem:[%s2775_s17 + $0x80] sm:$0x1]  ;;  %v3112_v51 = vld [vmem:[%s2775_s17 + $0xb4] sm:$0xf]  ;;  %v511_v56 = vrot.slane %v509_v14, 5  ;;  %v492_v29 = vrot.slane %v490_v52, 4 }
  0x42   : > { %v495_v45 = vrot.slane %v493_v60, 5  ;;  %268 = vst.msk [vmem:[#allocation2 + $0x78] sm:$0xf] %vm237_vm0, %v3112_v51  ;;  %v3123_v23 = vsel %vm2824_vm3, %v483_v25, %v487_v24  ;;  %v473_v7 = vrot.slane %v472_v30, 4  ;;  %v506_v43 = vor.u32 %v505_v41, %v501_v55  ;;  %v3134_v24 = vld [vmem:[%s2775_s17 + $0x8c] sm:$0x1] }
  0x43   : > { %4454 = vst [vmem:[#allocation28_spill] sm:$0xff] %v3123_v23  ;;  %v527_v46 = vshrl.u32 %v2984_v21, 16  ;;  %v525_v52 = vrot.slane %v523_v20, 5  ;;  %v533_v60 = vshll.u32 %v3109_v11, 16  ;;  %v514_v19 = vshrl.u32 %v3001_v38, 16  ;;  %4456 = vst [vmem:[#allocation30_spill] sm:$0xff] %v3134_v24  ;;  %691 = vrot.lane.b32.xlu1 %v3123_v23, %s2733_s18 }
  0x44   : > { %v496_v62 = vor.u32 %v495_v45, %v492_v29  ;;  %v3130_v14 = vsel %vm2824_vm3, %v473_v7, %v477_v5  ;;  %v507_v47 = vrot.slane %v506_v43, 4  ;;  %v517_v13 = vshll.u32 %v3001_v38, 16 }
  0x45   : > { %4455 = vst [vmem:[#allocation29_spill] sm:$0xff] %v3130_v14  ;;  %v529_v18 = vrot.slane %v527_v46, 4  ;;  %v535_v45 = vrot.slane %v533_v60, 5  ;;  %v516_v29 = vrot.slane %v514_v19, 4  ;;  %v547_v20 = vshll.u32 %v3008_v53, 16  ;;  %689 = vrot.lane.b32.xlu0 %v3130_v14, %s2733_s18 }
  0x46   : > { %v497_v41 = vrot.slane %v496_v62, 4  ;;  %v3143_v5 = vsel %vm2824_vm3, %v507_v47, %v511_v56  ;;  %v519_v30 = vrot.slane %v517_v13, 5  ;;  %v551_v7 = vshrl.u32 %v3008_v53, 16  ;;  %v3154_v47 = vld [vmem:[%s2775_s17 + $0x98] sm:$0x1] }
  0x47   : > { %4457 = vst [vmem:[#allocation31_spill] sm:$0xff] %v3143_v5  ;;  %v530_v25 = vor.u32 %v529_v18, %v525_v52  ;;  %v549_v46 = vrot.slane %v547_v20, 5  ;;  %v557_v62 = vshll.u32 %v3134_v24, 16  ;;  %v538_v60 = vshrl.u32 %v3019_v63, 16  ;;  %695 = vrot.lane.b32.xlu1 %v3143_v5, %s2733_s18  ;;  %v3174_v24 = vld [vmem:[%s2775_s17 + $0xa4] sm:$0x1] }
  0x48   : > { %v3148_v43 = vsel %vm2824_vm3, %v497_v41, %v501_v55  ;;  %v520_v23 = vor.u32 %v519_v30, %v516_v29  ;;  %v553_v14 = vrot.slane %v551_v7, 4  ;;  %v541_v38 = vshll.u32 %v3019_v63, 16 }
  0x49   : > { %4458 = vst [vmem:[#allocation32_spill] sm:$0xff] %v3148_v43  ;;  %v531_v19 = vrot.slane %v530_v25, 4  ;;  %v559_v13 = vrot.slane %v557_v62, 5  ;;  %v540_v18 = vrot.slane %v538_v60, 4  ;;  %v571_v55 = vshll.u32 %v3026_v16, 16  ;;  %693 = vrot.lane.b32.xlu0 %v3148_v43, %s2733_s18 }
  0x4a   : > { %v575_v56 = vshrl.u32 %v3026_v16, 16  ;;  %v521_v29 = vrot.slane %v520_v23, 4  ;;  %v554_v20 = vor.u32 %v553_v14, %v549_v46  ;;  %v543_v25 = vrot.slane %v541_v38, 5 }
  0x4b   : > { %v3164_v41 = vsel %vm2824_vm3, %v531_v19, %v535_v45  ;;  %v573_v30 = vrot.slane %v571_v55, 5  ;;  %v581_v62 = vshll.u32 %v3154_v47, 16  ;;  %v562_v60 = vshrl.u32 %v3040_v37, 16 }
  0x4c   : > { %4459 = vst [vmem:[#allocation33_spill] sm:$0xff] %v3164_v41  ;;  %v577_v7 = vrot.slane %v575_v56, 4  ;;  %v3170_v5 = vsel %vm2824_vm3, %v521_v29, %v525_v52  ;;  %v555_v63 = vrot.slane %v554_v20, 4  ;;  %v544_v16 = vor.u32 %v543_v25, %v540_v18  ;;  %699 = vrot.lane.b32.xlu1 %v3164_v41, %s2733_s18 }
  0x4d   : > { %4460 = vst [vmem:[#allocation34_spill] sm:$0xff] %v3170_v5  ;;  %v565_v43 = vshll.u32 %v3040_v37, 16  ;;  %v583_v23 = vrot.slane %v581_v62, 5  ;;  %v564_v14 = vrot.slane %v562_v60, 4  ;;  %v595_v45 = vshll.u32 %v3048_v48, 16  ;;  %697 = vrot.lane.b32.xlu0 %v3170_v5, %s2733_s18 }
  0x4e   : > { %v578_v38 = vor.u32 %v577_v7, %v573_v30  ;;  %v3183_v52 = vsel %vm2824_vm3, %v555_v63, %v559_v13  ;;  %v545_v19 = vrot.slane %v544_v16, 4  ;;  %v599_v55 = vshrl.u32 %v3048_v48, 16  ;;  %v3194_v16 = vld [vmem:[%s2775_s17 + $0xb0] sm:$0x1] }
  0x4f   : > { %4461 = vst [vmem:[#allocation35_spill] sm:$0xff] %v3183_v52  ;;  %v567_v18 = vrot.slane %v565_v43, 5  ;;  %v597_v29 = vrot.slane %v595_v45, 5  ;;  %v605_v20 = vshll.u32 %v3174_v24, 16  ;;  %v586_v25 = vshrl.u32 %v3064_v8, 16 }
  0x50   : > { %v579_v56 = vrot.slane %v578_v38, 4  ;;  %v3190_v7 = vsel %vm2824_vm3, %v545_v19, %v549_v46  ;;  %v601_v60 = vrot.slane %v599_v55, 4  ;;  %v589_v63 = vshll.u32 %v3064_v8, 16  ;;  %703 = vrot.lane.b32.xlu1 %v3183_v52, %s2733_s18 }
  0x51   : > { %4462 = vst [vmem:[#allocation36_spill] sm:$0xff] %v3190_v7  ;;  %v568_v62 = vor.u32 %v567_v18, %v564_v14  ;;  %v607_v13 = vrot.slane %v605_v20, 5  ;;  %v588_v38 = vrot.slane %v586_v25, 4  ;;  %v619_v45 = vshll.u32 %v3075_v40, 16  ;;  %701 = vrot.lane.b32.xlu0 %v3190_v7, %s2733_s18  ;;  %v3214_v7 = vld [vmem:[%s2775_s17 + $0xbc] sm:$0x1] }
  0x52   : > { %v3200_v43 = vsel %vm2824_vm3, %v579_v56, %v583_v23  ;;  %v602_v14 = vor.u32 %v601_v60, %v597_v29  ;;  %v591_v19 = vrot.slane %v589_v63, 5  ;;  %v623_v18 = vshrl.u32 %v3075_v40, 16 }
  0x53   : > { %4463 = vst [vmem:[#allocation37_spill] sm:$0xff] %v3200_v43  ;;  %v569_v46 = vrot.slane %v568_v62, 4  ;;  %v621_v55 = vrot.slane %v619_v45, 5  ;;  %v629_v52 = vshll.u32 %v3194_v16, 16  ;;  %v610_v5 = vshrl.u32 %v3087_v61, 16 }
  0x54   : > { %v613_v23 = vshll.u32 %v3087_v61, 16  ;;  %v603_v20 = vrot.slane %v602_v14, 4  ;;  %v592_v25 = vor.u32 %v591_v19, %v588_v38  ;;  %v625_v41 = vrot.slane %v623_v18, 4  ;;  %707 = vrot.lane.b32.xlu1 %v3200_v43, %s2733_s18 }
  0x55   : > { %v3211_v56 = vsel %vm2824_vm3, %v569_v46, %v573_v30  ;;  %v631_v62 = vrot.slane %v629_v52, 5  ;;  %v612_v60 = vrot.slane %v610_v5, 4  ;;  %v643_v45 = vshll.u32 %v3095_v12, 16 }
  0x56   : > { %4464 = vst [vmem:[#allocation38_spill] sm:$0xff] %v3211_v56  ;;  %v615_v63 = vrot.slane %v613_v23, 5  ;;  %705 = vrot.lane.b32.xlu0 %v3211_v56, %s2733_s18  ;;  %v3223_v30 = vsel %vm2824_vm3, %v603_v20, %v607_v13  ;;  %v593_v46 = vrot.slane %v592_v25, 4  ;;  %v626_v38 = vor.u32 %v625_v41, %v621_v55 }
  0x57   : > { %4465 = vst [vmem:[#allocation39_spill] sm:$0xff] %v3223_v30  ;;  %v647_v14 = vshrl.u32 %v3095_v12, 16  ;;  %v645_v18 = vrot.slane %v643_v45, 5  ;;  %v653_v43 = vshll.u32 %v3214_v7, 16  ;;  %v634_v5 = vshrl.u32 %v3112_v51, 16 }
  0x58   : > { %v616_v19 = vor.u32 %v615_v63, %v612_v60  ;;  %v3230_v52 = vsel %vm2824_vm3, %v593_v46, %v597_v29  ;;  %v627_v23 = vrot.slane %v626_v38, 4  ;;  %v637_v61 = vshll.u32 %v3112_v51, 16  ;;  %711 = vrot.lane.b32.xlu1 %v3223_v30, %s2733_s18 }
  0x59   : > { %4466 = vst [vmem:[#allocation40_spill] sm:$0xff] %v3230_v52  ;;  %v649_v56 = vrot.slane %v647_v14, 4  ;;  %v655_v13 = vrot.slane %v653_v43, 5  ;;  %v636_v20 = vrot.slane %v634_v5, 4  ;;  %v839_v45 = vrot.slane %v2790_v6, 5 }
  0x5a   : > { %v617_v41 = vrot.slane %v616_v19, 4  ;;  %709 = vrot.lane.b32.xlu0 %v3230_v52, %s2733_s18  ;;  %v3239_v25 = vsel %vm2824_vm3, %v627_v23, %v631_v62  ;;  %v639_v29 = vrot.slane %v637_v61, 5  ;;  %v2568_v46 = vrot.slane %v2784_v2, 9 }
  0x5b   : > { %4467 = vst [vmem:[#allocation41_spill] sm:$0xff] %v3239_v25  ;;  %v650_v60 = vor.u32 %v649_v56, %v645_v18  ;;  %v842_v61 = vrot.slane %v2809_v17, 5  ;;  %v841_v62 = vrot.slane %v839_v45, 4  ;;  %v846_v2 = vrot.slane %v2781_v1, 5 }
  0x5c   : > { %v3250_v43 = vsel %vm2824_vm3, %v617_v41, %v621_v55  ;;  %v640_v14 = vor.u32 %v639_v29, %v636_v20  ;;  %715 = vrot.lane.b32.xlu1 %v3239_v25, %s2733_s18  ;;  %v840_v56 = vsel %vm3243_vm6, %v2568_v46, %v839_v45  ;;  %v849_v23 = vrot.slane %v2802_v10, 5  ;;  %v4477_v25 = vld [vmem:[#allocation16_spill] sm:$0xff] }
  0x5d   : > { %4470 = vst [vmem:[#allocation42_spill] sm:$0xff] %v3250_v43  ;;  %v651_v38 = vrot.slane %v650_v60, 4  ;;  %v843_v17 = vsel %vm3243_vm6, %v841_v62, %v842_v61  ;;  %v848_v5 = vrot.slane %v846_v2, 4  ;;  %v853_v41 = vrot.slane %v2813_v22, 5 }
  0x5e   : > { %713 = vrot.lane.b32.xlu0 %v3250_v43, %s2733_s18  ;;  %v641_v55 = vrot.slane %v640_v14, 4  ;;  %v856_v60 = vrot.slane %v2817_v26, 5  ;;  %v860_v29 = vrot.slane %v2833_v34, 5  ;;  %v2570_v45 = vrot.slane %v2830_v33, 9 }
  0x5f   : > { %v3262_v6 = vsel %vm2824_vm3, %v651_v38, %v655_v13  ;;  %v2569_v13 = vrot.slane %v2778_v0, 9  ;;  %v855_v20 = vrot.slane %v853_v41, 4  ;;  %v863_v26 = vrot.slane %v2836_v39, 5 }
  0x60   : > { %4471 = vst [vmem:[#allocation43_spill] sm:$0xff] %v3262_v6  ;;  %v3267_v19 = vsel %vm2824_vm3, %v641_v55, %v645_v18  ;;  %719 = vrot.lane.b32.xlu1 %v3262_v6, %s2733_s18  ;;  %v3282_v18 = vsel %vm3243_vm6, %v848_v5, %v849_v23  ;;  %v862_v38 = vrot.slane %v860_v29, 4  ;;  %v867_v14 = vrot.slane %v2853_v49, 5 }
  0x61   : > { %4472 = vst [vmem:[#allocation44_spill] sm:$0xff] %v3267_v19  ;;  %v3288_v10 = vsel %vm3243_vm6, %v2569_v13, %v846_v2  ;;  %v3297_v46 = vsel %vm3243_vm6, %v855_v20, %v856_v60  ;;  %v3303_v61 = vsel %vm3243_vm6, %v2570_v45, %v853_v41  ;;  %v870_v39 = vrot.slane %v2883_v3, 5 }
  0x62   : > { %717 = vrot.lane.b32.xlu0 %v3267_v19, %s2733_s18  ;;  %v3312_v55 = vsel %vm3243_vm6, %v862_v38, %v863_v26  ;;  %v869_v62 = vrot.slane %v867_v14, 4  ;;  %v874_v2 = vrot.slane %v2875_v59, 5  ;;  %v2572_v5 = vrot.slane %v2866_v54, 9 }
  0x63   : > { %v877_v3 = vrot.slane %v2918_v32, 5  ;;  %v881_v13 = vrot.slane %v2899_v15, 5  ;;  %v2573_v60 = vrot.slane %v2890_v9, 9  ;;  %v884_v32 = vrot.slane %v2950_v57, 5 }
  0x64   : > { %951 = vrot.lane.b32.xlu1 %v843_v17, %s2734_s19  ;;  %v3327_v23 = vsel %vm3243_vm6, %v869_v62, %v870_v39  ;;  %v876_v41 = vrot.slane %v874_v2, 4  ;;  %v3333_v20 = vsel %vm3243_vm6, %v2572_v5, %v867_v14  ;;  %v888_v38 = vrot.slane %v2922_v36, 5 }
  0x65   : > { %v883_v45 = vrot.slane %v881_v13, 4  ;;  %v3348_v26 = vsel %vm3243_vm6, %v2573_v60, %v874_v2  ;;  %v2574_v14 = vrot.slane %v2911_v27, 9  ;;  %v891_v57 = vrot.slane %v2993_v31, 5 }
  0x66   : > { %949 = vrot.lane.b32.xlu0 %v840_v56, %s2734_s19  ;;  %v2571_v56 = vrot.slane %v2844_v44, 9  ;;  %v890_v62 = vrot.slane %v888_v38, 4  ;;  %v895_v39 = vrot.slane %v2939_v50, 5  ;;  %v2575_v5 = vrot.slane %v2929_v42, 9 }
  0x67   : > { %v3363_v2 = vsel %vm3243_vm6, %v2574_v14, %v881_v13  ;;  %v898_v31 = vrot.slane %v3037_v35, 5  ;;  %v902_v60 = vrot.slane %v2963_v4, 5  ;;  %v4473_v35 = vld [vmem:[#allocation23_spill] sm:$0xff]  ;;  %v916_v19 = vrot.slane %v3008_v53, 5 }
  0x68   : > { %955 = vrot.lane.b32.xlu1 %v3282_v18, %s2734_s19  ;;  %v3318_v17 = vsel %vm3243_vm6, %v2571_v56, %v860_v29  ;;  %v3342_v29 = vsel %vm3243_vm6, %v876_v41, %v877_v3  ;;  %v3357_v56 = vsel %vm3243_vm6, %v883_v45, %v884_v32  ;;  %v3372_v41 = vsel %vm3243_vm6, %v890_v62, %v891_v57 }
  0x69   : > { %v897_v3 = vrot.slane %v895_v39, 4  ;;  %v3378_v13 = vsel %vm3243_vm6, %v2575_v5, %v888_v38  ;;  %v2576_v45 = vrot.slane %v2953_v58, 9  ;;  %v904_v14 = vrot.slane %v902_v60, 4  ;;  %v4474_v5 = vld [vmem:[#allocation11_spill] sm:$0xff] }
  0x6a   : > { %953 = vrot.lane.b32.xlu0 %v3288_v10, %s2734_s19  ;;  %v905_v62 = vrot.slane %v4473_v35, 5  ;;  %v909_v57 = vrot.slane %v2984_v21, 5  ;;  %v2577_v28 = vrot.slane %v4474_v5, 9  ;;  %v912_v35 = vrot.slane %v3109_v11, 5  ;;  %v4476_v11 = vld [vmem:[#allocation30_spill] sm:$0xff] }
  0x6b   : > { %v3387_v32 = vsel %vm3243_vm6, %v897_v3, %v898_v31  ;;  %v3393_v38 = vsel %vm3243_vm6, %v2576_v45, %v895_v39  ;;  %v4475_v45 = vld [vmem:[#allocation13_spill] sm:$0xff]  ;;  %v919_v43 = vrot.slane %v4476_v11, 5  ;;  %v923_v52 = vrot.slane %v4477_v25, 5 }
  0x6c   : > { %959 = vrot.lane.b32.xlu1 %v3297_v46, %s2734_s19  ;;  %v3402_v3 = vsel %vm3243_vm6, %v904_v14, %v905_v62  ;;  %v911_v31 = vrot.slane %v909_v57, 4  ;;  %v3408_v39 = vsel %vm3243_vm6, %v2577_v28, %v902_v60  ;;  %v2578_v6 = vrot.slane %v4475_v45, 9  ;;  %v4478_v60 = vld [vmem:[#allocation15_spill] sm:$0xff] }
  0x6d   : > { %v918_v62 = vrot.slane %v916_v19, 4  ;;  %v2579_v30 = vrot.slane %v4478_v60, 9  ;;  %v926_v11 = vrot.slane %v3154_v47, 5  ;;  %v930_v25 = vrot.slane %v3048_v48, 5 }
  0x6e   : > { %957 = vrot.lane.b32.xlu0 %v3303_v61, %s2734_s19  ;;  %v3417_v14 = vsel %vm3243_vm6, %v911_v31, %v912_v35  ;;  %v3423_v28 = vsel %vm3243_vm6, %v2578_v6, %v909_v57  ;;  %v925_v35 = vrot.slane %v923_v52, 4  ;;  %v2580_v57 = vrot.slane %v3040_v37, 9 }
  0x6f   : > { %v3432_v31 = vsel %vm3243_vm6, %v918_v62, %v919_v43  ;;  %v3438_v6 = vsel %vm3243_vm6, %v2579_v30, %v916_v19  ;;  %v932_v62 = vrot.slane %v930_v25, 4  ;;  %v933_v47 = vrot.slane %v3174_v24, 5 }
  0x70   : > { %963 = vrot.lane.b32.xlu1 %v3312_v55, %s2734_s19  ;;  %v3447_v43 = vsel %vm3243_vm6, %v925_v35, %v926_v11  ;;  %v937_v48 = vrot.slane %v3075_v40, 5  ;;  %v3453_v30 = vsel %vm3243_vm6, %v2580_v57, %v923_v52  ;;  %v2581_v19 = vrot.slane %v3064_v8, 9  ;;  %v4480_v8 = vld [vmem:[#allocation26_spill] sm:$0xff] }
  0x71   : > { %4479 = vst [vmem:[#allocation23_spill] sm:$0xff] %v3447_v43  ;;  %v3462_v35 = vsel %vm3243_vm6, %v932_v62, %v933_v47  ;;  %v940_v11 = vrot.slane %v3194_v16, 5  ;;  %v944_v40 = vrot.slane %v3095_v12, 5  ;;  %vm2052_vm0 = vcmask 293888  }
  0x72   : > { %961 = vrot.lane.b32.xlu0 %v3318_v17, %s2734_s19  ;;  %v939_v24 = vrot.slane %v937_v48, 4  ;;  %v3468_v57 = vsel %vm3243_vm6, %v2581_v19, %v930_v25  ;;  %v947_v25 = vrot.slane %v3214_v7, 5 }
  0x73   : > { %v946_v62 = vrot.slane %v944_v40, 4 }
  0x74   : > { %967 = vrot.lane.b32.xlu1 %v3327_v23, %s2734_s19  ;;  %v3479_v16 = vsel %vm3243_vm6, %v939_v24, %v940_v11 }
  0x75   : > { %v3495_v7 = vsel %vm3243_vm6, %v946_v62, %v947_v25 }
  0x76   : > { %965 = vrot.lane.b32.xlu0 %v3333_v20, %s2734_s19 }
  0x78   : > { %971 = vrot.lane.b32.xlu1 %v3342_v29, %s2734_s19 }
  0x7a   : > { %969 = vrot.lane.b32.xlu0 %v3348_v26, %s2734_s19 }
  0x7c   : > { %975 = vrot.lane.b32.xlu1 %v3357_v56, %s2734_s19 }
  0x7e   : > { %973 = vrot.lane.b32.xlu0 %v3363_v2, %s2734_s19 }
  0x80   : > { %979 = vrot.lane.b32.xlu1 %v3372_v41, %s2734_s19 }
  0x82   : > { %977 = vrot.lane.b32.xlu0 %v3378_v13, %s2734_s19 }
  0x84   : > { %983 = vrot.lane.b32.xlu1 %v3387_v32, %s2734_s19 }
  0x86   : > { %981 = vrot.lane.b32.xlu0 %v3393_v38, %s2734_s19 }
  0x88   : > { %987 = vrot.lane.b32.xlu1 %v3402_v3, %s2734_s19 }
  0x8a   : > { %985 = vrot.lane.b32.xlu0 %v3408_v39, %s2734_s19 }
  0x8c   : > { %991 = vrot.lane.b32.xlu1 %v3417_v14, %s2734_s19 }
  0x8e   : > { %989 = vrot.lane.b32.xlu0 %v3423_v28, %s2734_s19  ;;  %v662_v52 = vpop.permute.xlu1 %661 }
  0x8f   : > { %756 = vst.msk [vmem:[#allocation2 + $0x8] sm:$0xf] %vm753_vm7, %v662_v52  ;;  %v658_v37 = vpop.permute.xlu0 %657 }
  0x90   : > { %995 = vrot.lane.b32.xlu1 %v3432_v31, %s2734_s19  ;;  %754 = vst.msk [vmem:[#allocation2] sm:$0xf] %vm753_vm7, %v658_v37  ;;  %v2583_v37 = vrot.slane %v3112_v51, 9 }
  0x92   : > { %993 = vrot.lane.b32.xlu0 %v3438_v6, %s2734_s19  ;;  %v664_v47 = vpop.permute.xlu1 %663 }
  0x93   : > { %757 = vst.msk [vmem:[#allocation2 + $0xc] sm:$0xf] %vm753_vm7, %v664_v47  ;;  %v660_v52 = vpop.permute.xlu0 %659 }
  0x94   : > { %999 = vrot.lane.b32.xlu1 %v3447_v43, %s2734_s19  ;;  %v2582_v43 = vrot.slane %v4480_v8, 9  ;;  %755 = vst.msk [vmem:[#allocation2 + $0x4] sm:$0xf] %vm753_vm7, %v660_v52 }
  0x96   : > { %997 = vrot.lane.b32.xlu0 %v3453_v30, %s2734_s19  ;;  %v3484_v19 = vsel %vm3243_vm6, %v2582_v43, %v937_v48  ;;  %v668_v24 = vpop.permute.xlu1 %667  ;;  %v3499_v48 = vsel %vm3243_vm6, %v2583_v37, %v944_v40 }
  0x97   : > { %759 = vst.msk [vmem:[#allocation2 + $0x14] sm:$0xf] %vm753_vm7, %v668_v24 }
  0x98   : > { %1003 = vrot.lane.b32.xlu1 %v3462_v35, %s2734_s19  ;;  %v666_v43 = vpop.permute.xlu0 %665 }
  0x99   : > { %758 = vst.msk [vmem:[#allocation2 + $0x10] sm:$0xf] %vm753_vm7, %v666_v43 }
  0x9a   : > { %1001 = vrot.lane.b32.xlu0 %v3468_v57, %s2734_s19 }
  0x9b   : > { %v672_v11 = vpop.permute.xlu1 %671 }
  0x9c   : > { %1007 = vrot.lane.b32.xlu1 %v3479_v16, %s2734_s19  ;;  %761 = vst.msk [vmem:[#allocation2 + $0x1c] sm:$0xf] %vm753_vm7, %v672_v11  ;;  %v670_v62 = vpop.permute.xlu0 %669 }
  0x9d   : > { %760 = vst.msk [vmem:[#allocation2 + $0x18] sm:$0xf] %vm753_vm7, %v670_v62 }
  0x9e   : > { %1005 = vrot.lane.b32.xlu0 %v3484_v19, %s2734_s19 }
  0xa0   : > { %1011 = vrot.lane.b32.xlu1 %v3495_v7, %s2734_s19  ;;  %v676_v40 = vpop.permute.xlu1 %675 }
  0xa1   : > { %763 = vst.msk [vmem:[#allocation2 + $0x24] sm:$0xf] %vm753_vm7, %v676_v40  ;;  %v674_v25 = vpop.permute.xlu0 %673 }
  0xa2   : > { %1009 = vrot.lane.b32.xlu0 %v3499_v48, %s2734_s19  ;;  %762 = vst.msk [vmem:[#allocation2 + $0x20] sm:$0xf] %vm753_vm7, %v674_v25 }
  0xa4   : > { %1082 = vrot.lane.b32.xlu1 %v2781_v1, %s2735_s20 }
  0xa5   : > { %v680_v47 = vpop.permute.xlu1 %679 }
  0xa6   : > { %1080 = vrot.lane.b32.xlu0 %v2778_v0, %s2735_s20  ;;  %765 = vst.msk [vmem:[#allocation2 + $0x2c] sm:$0xf] %vm753_vm7, %v680_v47  ;;  %v678_v37 = vpop.permute.xlu0 %677 }
  0xa7   : > { %764 = vst.msk [vmem:[#allocation2 + $0x28] sm:$0xf] %vm753_vm7, %v678_v37 }
  0xa8   : > { %1086 = vrot.lane.b32.xlu1 %v2813_v22, %s2735_s20 }
  0xaa   : > { %1084 = vrot.lane.b32.xlu0 %v2830_v33, %s2735_s20  ;;  %v684_v0 = vpop.permute.xlu1 %683 }
  0xab   : > { %767 = vst.msk [vmem:[#allocation2 + $0x34] sm:$0xf] %vm753_vm7, %v684_v0 }
  0xac   : > { %1090 = vrot.lane.b32.xlu1 %v2833_v34, %s2735_s20 }
  0xad   : > { %v682_v1 = vpop.permute.xlu0 %681 }
  0xae   : > { %1088 = vrot.lane.b32.xlu0 %v2844_v44, %s2735_s20  ;;  %766 = vst.msk [vmem:[#allocation2 + $0x30] sm:$0xf] %vm753_vm7, %v682_v1  ;;  %v688_v52 = vpop.permute.xlu1 %687  ;;  %v4481_v1 = vld [vmem:[#allocation4_spill] sm:$0xff] }
  0xaf   : > { %769 = vst.msk [vmem:[#allocation2 + $0x3c] sm:$0xf] %vm753_vm7, %v688_v52 }
  0xb0   : > { %1094 = vrot.lane.b32.xlu1 %v2853_v49, %s2735_s20 }
  0xb2   : > { %1092 = vrot.lane.b32.xlu0 %v2866_v54, %s2735_s20  ;;  %v686_v24 = vpop.permute.xlu0 %685 }
  0xb3   : > { %768 = vst.msk [vmem:[#allocation2 + $0x38] sm:$0xf] %vm753_vm7, %v686_v24 }
  0xb4   : > { %1098 = vrot.lane.b32.xlu1 %v2875_v59, %s2735_s20 }
  0xb5   : > { %v692_v43 = vpop.permute.xlu1 %691 }
  0xb6   : > { %1096 = vrot.lane.b32.xlu0 %v2890_v9, %s2735_s20  ;;  %771 = vst.msk [vmem:[#allocation2 + $0x44] sm:$0xf] %vm753_vm7, %v692_v43  ;;  %v4482_v43 = vld [vmem:[#allocation7_spill] sm:$0xff] }
  0xb7   : > { %v690_v11 = vpop.permute.xlu0 %689 }
  0xb8   : > { %770 = vst.msk [vmem:[#allocation2 + $0x40] sm:$0xf] %vm753_vm7, %v690_v11  ;;  %1102 = vrot.lane.b32.xlu1 %v2899_v15, %s2735_s20  ;;  %v4483_v11 = vld [vmem:[#allocation5_spill] sm:$0xff] }
  0xb9   : > { %v696_v62 = vpop.permute.xlu1 %695 }
  0xba   : > { %1100 = vrot.lane.b32.xlu0 %v2911_v27, %s2735_s20  ;;  %773 = vst.msk [vmem:[#allocation2 + $0x4c] sm:$0xf] %vm753_vm7, %v696_v62 }
  0xbb   : > { %v694_v40 = vpop.permute.xlu0 %693 }
  0xbc   : > { %772 = vst.msk [vmem:[#allocation2 + $0x48] sm:$0xf] %vm753_vm7, %v694_v40  ;;  %1106 = vrot.lane.b32.xlu1 %v2922_v36, %s2735_s20 }
  0xbe   : > { %1104 = vrot.lane.b32.xlu0 %v2929_v42, %s2735_s20  ;;  %v700_v25 = vpop.permute.xlu1 %699 }
  0xbf   : > { %775 = vst.msk [vmem:[#allocation2 + $0x54] sm:$0xf] %vm753_vm7, %v700_v25  ;;  %v698_v47 = vpop.permute.xlu0 %697  ;;  %v4484_v25 = vld [vmem:[#allocation6_spill] sm:$0xff] }
  0xc0   : > { %774 = vst.msk [vmem:[#allocation2 + $0x50] sm:$0xf] %vm753_vm7, %v698_v47  ;;  %1110 = vrot.lane.b32.xlu1 %v2939_v50, %s2735_s20 }
  0xc2   : > { %1108 = vrot.lane.b32.xlu0 %v2953_v58, %s2735_s20  ;;  %v704_v37 = vpop.permute.xlu1 %703 }
  0xc3   : > { %777 = vst.msk [vmem:[#allocation2 + $0x5c] sm:$0xf] %vm753_vm7, %v704_v37  ;;  %v702_v0 = vpop.permute.xlu0 %701 }
  0xc4   : > { %776 = vst.msk [vmem:[#allocation2 + $0x58] sm:$0xf] %vm753_vm7, %v702_v0  ;;  %1233 = vrot.lane.b32.xlu1 %v4481_v1, %s2736_s21 }
  0xc6   : > { %1112 = vrot.lane.b32.xlu0 %v4474_v5, %s2735_s20  ;;  %v708_v52 = vpop.permute.xlu1 %707 }
  0xc7   : > { %779 = vst.msk [vmem:[#allocation2 + $0x64] sm:$0xf] %vm753_vm7, %v708_v52 }
  0xc8   : > { %v706_v24 = vpop.permute.xlu0 %705  ;;  %1237 = vrot.lane.b32.xlu1 %v4482_v43, %s2736_s21 }
  0xc9   : > { %778 = vst.msk [vmem:[#allocation2 + $0x60] sm:$0xf] %vm753_vm7, %v706_v24  ;;  %v2706_v24 = vld [vmem:[%s4342_s1 + $0x10] ss:$0 sps:$4 sm:$0x33]  }
  0xca   : > { %1235 = vrot.lane.b32.xlu0 %v4483_v11, %s2736_s21  ;;  %v712_v62 = vpop.permute.xlu1 %711  ;;  %2687 = vmatprep.subr.msk.bf16.mxu0 %vm2101_vm9, %v2706_v24 }
  0xcb   : > { %781 = vst.msk [vmem:[#allocation2 + $0x6c] sm:$0xf] %vm753_vm7, %v712_v62  ;;  %2688 = vmatprep.subr.msk.bf16.mxu1 %vm2101_vm9, %v2706_v24  ;;  %v2707_v62 = vld [vmem:[%s4342_s1 + $0x8] sm:$0xff]  }
  0xcc   : > { %v710_v40 = vpop.permute.xlu0 %709  ;;  %1370 = vrot.lane.b32.xlu1 %v3288_v10, %s2737_s22 }
  0xcd   : > { %780 = vst.msk [vmem:[#allocation2 + $0x68] sm:$0xf] %vm753_vm7, %v710_v40 }
  0xce   : > { %1239 = vrot.lane.b32.xlu0 %v4484_v25, %s2736_s21  ;;  %v716_v47 = vpop.permute.xlu1 %715 }
  0xcf   : > { %783 = vst.msk [vmem:[#allocation2 + $0x74] sm:$0xf] %vm753_vm7, %v716_v47  ;;  %v2708_v47 = vld [vmem:[%s4342_s1] sm:$0xff]  }
  0xd0   : > { %v714_v37 = vpop.permute.xlu0 %713  ;;  %1374 = vrot.lane.b32.xlu1 %v3303_v61, %s2737_s22 }
  0xd1   : > { %782 = vst.msk [vmem:[#allocation2 + $0x70] sm:$0xf] %vm753_vm7, %v714_v37 }
  0xd2   : > { %1372 = vrot.lane.b32.xlu0 %v3282_v18, %s2737_s22  ;;  %v720_v0 = vpop.permute.xlu1 %719 }
  0xd3   : > { %785 = vst.msk [vmem:[#allocation2 + $0x7c] sm:$0xf] %vm753_vm7, %v720_v0 }
  0xd4   : > { %v718_v1 = vpop.permute.xlu0 %717  ;;  %1501 = vrot.lane.b32.xlu1 %v2830_v33, %s2738_s23 }
  0xd5   : > { %784 = vst.msk [vmem:[#allocation2 + $0x78] sm:$0xf] %vm753_vm7, %v718_v1 }
  0xd6   : > { %1376 = vrot.lane.b32.xlu0 %v3297_v46, %s2737_s22  ;;  %v952_v10 = vpop.permute.xlu1 %951 }
  0xd7   : > { %1047 = vst.msk [vmem:[#allocation2 + $0x4] sm:$0xf] %vm1045_vm8, %v952_v10 }
  0xd8   : > { %v950_v52 = vpop.permute.xlu0 %949  ;;  %1505 = vrot.lane.b32.xlu1 %v2844_v44, %s2738_s23 }
  0xd9   : > { %1046 = vst.msk [vmem:[#allocation2] sm:$0xf] %vm1045_vm8, %v950_v52 }
  0xda   : > { %1503 = vrot.lane.b32.xlu0 %v2813_v22, %s2738_s23  ;;  %v956_v18 = vpop.permute.xlu1 %955  ;;  %v2103_v22 = vsel %vm2101_vm9, %v2706_v24, 0  ;;  %v4488_v24 = vld [vmem:[#allocation10_spill] sm:$0xff] }
  0xdb   : > { %1049 = vst.msk [vmem:[#allocation2 + $0xc] sm:$0xf] %vm1045_vm8, %v956_v18  ;;  %2644 = vmatpush3.bf16.msra.mxu0 %v2103_v22  ;;  %2684 = vmatpush3.bf16.msra.mxu1 %v2103_v22 }
  0xdc   : > { %v954_v33 = vpop.permute.xlu0 %953  ;;  %1654 = vrot.lane.b32.xlu1 %v4482_v43, %s2739_s26  ;;  %v4485_v43 = vld [vmem:[#allocation9_spill] sm:$0xff]  ;;  %2645 = vmatprep.subr.bf16.mxu0 %v2707_v62 }
  0xdd   : > { %1048 = vst.msk [vmem:[#allocation2 + $0x8] sm:$0xf] %vm1045_vm8, %v954_v33  ;;  %2682 = vmatprep.subr.bf16.mxu1 %v2707_v62 }
  0xde   : > { %1507 = vrot.lane.b32.xlu0 %v2833_v34, %s2738_s23  ;;  %v960_v44 = vpop.permute.xlu1 %959 }
  0xdf   : > { %1051 = vst.msk [vmem:[#allocation2 + $0x14] sm:$0xf] %vm1045_vm8, %v960_v44  ;;  %2646 = vmatpush3.bf16.msra.mxu0 %v2707_v62  ;;  %2685 = vmatpush3.bf16.msra.mxu1 %v2707_v62 }
  0xe0   : > { %v958_v11 = vpop.permute.xlu0 %957  ;;  %1658 = vrot.lane.b32.xlu1 %v4485_v43, %s2739_s26  ;;  %2647 = vmatprep.subr.bf16.mxu0 %v2708_v47 }
  0xe1   : > { %1050 = vst.msk [vmem:[#allocation2 + $0x10] sm:$0xf] %vm1045_vm8, %v958_v11  ;;  %2683 = vmatprep.subr.bf16.mxu1 %v2708_v47 }
  0xe2   : > { %1656 = vrot.lane.b32.xlu0 %v4484_v25, %s2739_s26  ;;  %v964_v34 = vpop.permute.xlu1 %963  ;;  %v4486_v25 = vld [vmem:[#allocation8_spill] sm:$0xff] }
  0xe3   : > { %1053 = vst.msk [vmem:[#allocation2 + $0x1c] sm:$0xf] %vm1045_vm8, %v964_v34  ;;  %2648 = vmatpush3.bf16.msra.mxu0 %v2708_v47  ;;  %2686 = vmatpush3.bf16.msra.mxu1 %v2708_v47 }
  0xe4   : > { %v962_v40 = vpop.permute.xlu0 %961  ;;  %1791 = vrot.lane.b32.xlu1 %v3303_v61, %s2740_s4 }
  0xe5   : > { %1052 = vst.msk [vmem:[#allocation2 + $0x18] sm:$0xf] %vm1045_vm8, %v962_v40 }
  0xe6   : > { %1660 = vrot.lane.b32.xlu0 %v4486_v25, %s2739_s26  ;;  %v968_v37 = vpop.permute.xlu1 %967 }
  0xe7   : > { %1055 = vst.msk [vmem:[#allocation2 + $0x24] sm:$0xf] %vm1045_vm8, %v968_v37 }
  0xe8   : > { %v966_v0 = vpop.permute.xlu0 %965  ;;  %1795 = vrot.lane.b32.xlu1 %v3318_v17, %s2740_s4 }
  0xe9   : > { %1054 = vst.msk [vmem:[#allocation2 + $0x20] sm:$0xf] %vm1045_vm8, %v966_v0 }
  0xea   : > { %1793 = vrot.lane.b32.xlu0 %v3297_v46, %s2740_s4  ;;  %v972_v61 = vpop.permute.xlu1 %971  ;;  %v4487_v46 = vld [vmem:[#allocation12_spill] sm:$0xff] }
  0xeb   : > { %1057 = vst.msk [vmem:[#allocation2 + $0x2c] sm:$0xf] %vm1045_vm8, %v972_v61 }
  0xec   : > { %v970_v1 = vpop.permute.xlu0 %969  ;;  %1241 = vrot.lane.b32.xlu1 %v4485_v43, %s2736_s21 }
  0xed   : > { %1056 = vst.msk [vmem:[#allocation2 + $0x28] sm:$0xf] %vm1045_vm8, %v970_v1 }
  0xee   : > { %1797 = vrot.lane.b32.xlu0 %v3312_v55, %s2740_s4  ;;  %v976_v10 = vpop.permute.xlu1 %975 }
  0xef   : > { %1059 = vst.msk [vmem:[#allocation2 + $0x34] sm:$0xf] %vm1045_vm8, %v976_v10 }
  0xf0   : > { %v974_v52 = vpop.permute.xlu0 %973  ;;  %1245 = vrot.lane.b32.xlu1 %v4487_v46, %s2736_s21 }
  0xf1   : > { %1058 = vst.msk [vmem:[#allocation2 + $0x30] sm:$0xf] %vm1045_vm8, %v974_v52 }
  0xf2   : > { %1243 = vrot.lane.b32.xlu0 %v4486_v25, %s2736_s21  ;;  %v980_v18 = vpop.permute.xlu1 %979 }
  0xf3   : > { %1061 = vst.msk [vmem:[#allocation2 + $0x3c] sm:$0xf] %vm1045_vm8, %v980_v18 }
  0xf4   : > { %v978_v33 = vpop.permute.xlu0 %977  ;;  %1378 = vrot.lane.b32.xlu1 %v3318_v17, %s2737_s22 }
  0xf5   : > { %1060 = vst.msk [vmem:[#allocation2 + $0x38] sm:$0xf] %vm1045_vm8, %v978_v33 }
  0xf6   : > { %1247 = vrot.lane.b32.xlu0 %v4488_v24, %s2736_s21  ;;  %v984_v22 = vpop.permute.xlu1 %983 }
  0xf7   : > { %1063 = vst.msk [vmem:[#allocation2 + $0x44] sm:$0xf] %vm1045_vm8, %v984_v22 }
  0xf8   : > { %v982_v44 = vpop.permute.xlu0 %981  ;;  %1382 = vrot.lane.b32.xlu1 %v3333_v20, %s2737_s22 }
  0xf9   : > { %1062 = vst.msk [vmem:[#allocation2 + $0x40] sm:$0xf] %vm1045_vm8, %v982_v44 }
  0xfa   : > { %1380 = vrot.lane.b32.xlu0 %v3312_v55, %s2737_s22  ;;  %v988_v11 = vpop.permute.xlu1 %987 }
  0xfb   : > { %1065 = vst.msk [vmem:[#allocation2 + $0x4c] sm:$0xf] %vm1045_vm8, %v988_v11 }
  0xfc   : > { %v986_v62 = vpop.permute.xlu0 %985  ;;  %1509 = vrot.lane.b32.xlu1 %v2866_v54, %s2738_s23 }
  0xfd   : > { %1064 = vst.msk [vmem:[#allocation2 + $0x48] sm:$0xf] %vm1045_vm8, %v986_v62 }
  0xfe   : > { %1384 = vrot.lane.b32.xlu0 %v3327_v23, %s2737_s22  ;;  %v992_v17 = vpop.permute.xlu1 %991 }
  0xff   : > { %1067 = vst.msk [vmem:[#allocation2 + $0x54] sm:$0xf] %vm1045_vm8, %v992_v17 }
 0x100   : > { %v990_v43 = vpop.permute.xlu0 %989  ;;  %1513 = vrot.lane.b32.xlu1 %v2890_v9, %s2738_s23 }
 0x101   : > { %1066 = vst.msk [vmem:[#allocation2 + $0x50] sm:$0xf] %vm1045_vm8, %v990_v43 }
 0x102   : > { %1511 = vrot.lane.b32.xlu0 %v2853_v49, %s2738_s23  ;;  %v996_v55 = vpop.permute.xlu1 %995  ;;  %v4489_v49 = vld [vmem:[#allocation17_spill] sm:$0xff] }
 0x103   : > { %1069 = vst.msk [vmem:[#allocation2 + $0x5c] sm:$0xf] %vm1045_vm8, %v996_v55 }
 0x104   : > { %v994_v34 = vpop.permute.xlu0 %993  ;;  %1662 = vrot.lane.b32.xlu1 %v4487_v46, %s2739_s26  ;;  %v4492_v46 = vld [vmem:[#allocation20_spill] sm:$0xff] }
 0x105   : > { %1068 = vst.msk [vmem:[#allocation2 + $0x58] sm:$0xf] %vm1045_vm8, %v994_v34 }
 0x106   : > { %1515 = vrot.lane.b32.xlu0 %v2875_v59, %s2738_s23  ;;  %v1000_v54 = vpop.permute.xlu1 %999  ;;  %v4490_v59 = vld [vmem:[#allocation14_spill] sm:$0xff] }
 0x107   : > { %1071 = vst.msk [vmem:[#allocation2 + $0x64] sm:$0xf] %vm1045_vm8, %v1000_v54 }
 0x108   : > { %v998_v40 = vpop.permute.xlu0 %997  ;;  %1666 = vrot.lane.b32.xlu1 %v4489_v49, %s2739_s26 }
 0x109   : > { %1070 = vst.msk [vmem:[#allocation2 + $0x60] sm:$0xf] %vm1045_vm8, %v998_v40 }
 0x10a   : > { %1664 = vrot.lane.b32.xlu0 %v4488_v24, %s2739_s26  ;;  %v1004_v9 = vpop.permute.xlu1 %1003 }
 0x10b   : > { %1073 = vst.msk [vmem:[#allocation2 + $0x6c] sm:$0xf] %vm1045_vm8, %v1004_v9 }
 0x10c   : > { %v1002_v47 = vpop.permute.xlu0 %1001  ;;  %1799 = vrot.lane.b32.xlu1 %v3333_v20, %s2740_s4 }
 0x10d   : > { %1072 = vst.msk [vmem:[#allocation2 + $0x68] sm:$0xf] %vm1045_vm8, %v1002_v47  ;;  %v4496_v47 = vld [vmem:[#allocation28_spill] sm:$0xff] }
 0x10e   : > { %1668 = vrot.lane.b32.xlu0 %v4490_v59, %s2739_s26  ;;  %v1008_v25 = vpop.permute.xlu1 %1007 }
 0x10f   : > { %1075 = vst.msk [vmem:[#allocation2 + $0x74] sm:$0xf] %vm1045_vm8, %v1008_v25 }
 0x110   : > { %v1006_v37 = vpop.permute.xlu0 %1005  ;;  %1803 = vrot.lane.b32.xlu1 %v3348_v26, %s2740_s4 }
 0x111   : > { %1074 = vst.msk [vmem:[#allocation2 + $0x70] sm:$0xf] %vm1045_vm8, %v1006_v37 }
 0x112   : > { %1801 = vrot.lane.b32.xlu0 %v3327_v23, %s2740_s4  ;;  %v1012_v0 = vpop.permute.xlu1 %1011  ;;  %v4491_v23 = vld [vmem:[#allocation22_spill] sm:$0xff] }
 0x113   : > { %1077 = vst.msk [vmem:[#allocation2 + $0x7c] sm:$0xf] %vm1045_vm8, %v1012_v0 }
 0x114   : > { %v1010_v61 = vpop.permute.xlu0 %1009  ;;  %1249 = vrot.lane.b32.xlu1 %v4489_v49, %s2736_s21 }
 0x115   : > { %1076 = vst.msk [vmem:[#allocation2 + $0x78] sm:$0xf] %vm1045_vm8, %v1010_v61 }
 0x116   : > { %1805 = vrot.lane.b32.xlu0 %v3342_v29, %s2740_s4  ;;  %v1083_v20 = vpop.permute.xlu1 %1082 }
 0x117   : > { %1178 = vst.msk [vmem:[#allocation2 + $0x4] sm:$0xf] %vm1176_vm10, %v1083_v20 }
 0x118   : > { %v1081_v1 = vpop.permute.xlu0 %1080  ;;  %1253 = vrot.lane.b32.xlu1 %v4491_v23, %s2736_s21 }
 0x119   : > { %1177 = vst.msk [vmem:[#allocation2] sm:$0xf] %vm1176_vm10, %v1081_v1 }
 0x11a   : > { %1251 = vrot.lane.b32.xlu0 %v4490_v59, %s2736_s21  ;;  %v1087_v10 = vpop.permute.xlu1 %1086 }
 0x11b   : > { %1180 = vst.msk [vmem:[#allocation2 + $0xc] sm:$0xf] %vm1176_vm10, %v1087_v10  ;;  %v4498_v10 = vld [vmem:[#allocation31_spill] sm:$0xff] }
 0x11c   : > { %v1085_v52 = vpop.permute.xlu0 %1084  ;;  %1386 = vrot.lane.b32.xlu1 %v3348_v26, %s2737_s22 }
 0x11d   : > { %1179 = vst.msk [vmem:[#allocation2 + $0x8] sm:$0xf] %vm1176_vm10, %v1085_v52 }
 0x11e   : > { %1255 = vrot.lane.b32.xlu0 %v4492_v46, %s2736_s21  ;;  %v1091_v18 = vpop.permute.xlu1 %1090 }
 0x11f   : > { %1182 = vst.msk [vmem:[#allocation2 + $0x14] sm:$0xf] %vm1176_vm10, %v1091_v18 }
 0x120   : > { %v1089_v33 = vpop.permute.xlu0 %1088  ;;  %1390 = vrot.lane.b32.xlu1 %v3363_v2, %s2737_s22 }
 0x121   : > { %1181 = vst.msk [vmem:[#allocation2 + $0x10] sm:$0xf] %vm1176_vm10, %v1089_v33 }
 0x122   : > { %1388 = vrot.lane.b32.xlu0 %v3342_v29, %s2737_s22  ;;  %v1095_v24 = vpop.permute.xlu1 %1094 }
 0x123   : > { %1184 = vst.msk [vmem:[#allocation2 + $0x1c] sm:$0xf] %vm1176_vm10, %v1095_v24 }
 0x124   : > { %v1093_v22 = vpop.permute.xlu0 %1092  ;;  %1517 = vrot.lane.b32.xlu1 %v2911_v27, %s2738_s23 }
 0x125   : > { %1183 = vst.msk [vmem:[#allocation2 + $0x18] sm:$0xf] %vm1176_vm10, %v1093_v22 }
 0x126   : > { %1392 = vrot.lane.b32.xlu0 %v3357_v56, %s2737_s22  ;;  %v1099_v26 = vpop.permute.xlu1 %1098 }
 0x127   : > { %1186 = vst.msk [vmem:[#allocation2 + $0x24] sm:$0xf] %vm1176_vm10, %v1099_v26 }
 0x128   : > { %v1097_v44 = vpop.permute.xlu0 %1096  ;;  %1521 = vrot.lane.b32.xlu1 %v2929_v42, %s2738_s23 }
 0x129   : > { %1185 = vst.msk [vmem:[#allocation2 + $0x20] sm:$0xf] %vm1176_vm10, %v1097_v44 }
 0x12a   : > { %1519 = vrot.lane.b32.xlu0 %v2899_v15, %s2738_s23  ;;  %v1103_v29 = vpop.permute.xlu1 %1102  ;;  %v4493_v15 = vld [vmem:[#allocation27_spill] sm:$0xff] }
 0x12b   : > { %1188 = vst.msk [vmem:[#allocation2 + $0x2c] sm:$0xf] %vm1176_vm10, %v1103_v29 }
 0x12c   : > { %v1101_v11 = vpop.permute.xlu0 %1100  ;;  %1670 = vrot.lane.b32.xlu1 %v4491_v23, %s2739_s26 }
 0x12d   : > { %1187 = vst.msk [vmem:[#allocation2 + $0x28] sm:$0xf] %vm1176_vm10, %v1101_v11  ;;  %v4499_v11 = vld [vmem:[#allocation33_spill] sm:$0xff] }
 0x12e   : > { %1523 = vrot.lane.b32.xlu0 %v2922_v36, %s2738_s23  ;;  %v1107_v27 = vpop.permute.xlu1 %1106  ;;  %v4494_v36 = vld [vmem:[#allocation25_spill] sm:$0xff] }
 0x12f   : > { %1190 = vst.msk [vmem:[#allocation2 + $0x34] sm:$0xf] %vm1176_vm10, %v1107_v27  ;;  %v4500_v27 = vld [vmem:[#allocation34_spill] sm:$0xff] }
 0x130   : > { %v1105_v62 = vpop.permute.xlu0 %1104  ;;  %1674 = vrot.lane.b32.xlu1 %v4493_v15, %s2739_s26 }
 0x131   : > { %1189 = vst.msk [vmem:[#allocation2 + $0x30] sm:$0xf] %vm1176_vm10, %v1105_v62 }
 0x132   : > { %1672 = vrot.lane.b32.xlu0 %v4492_v46, %s2739_s26  ;;  %v1111_v42 = vpop.permute.xlu1 %1110 }
 0x133   : > { %1192 = vst.msk [vmem:[#allocation2 + $0x3c] sm:$0xf] %vm1176_vm10, %v1111_v42 }
 0x134   : > { %v1109_v17 = vpop.permute.xlu0 %1108  ;;  %1807 = vrot.lane.b32.xlu1 %v3363_v2, %s2740_s4 }
 0x135   : > { %1191 = vst.msk [vmem:[#allocation2 + $0x38] sm:$0xf] %vm1176_vm10, %v1109_v17 }
 0x136   : > { %1676 = vrot.lane.b32.xlu0 %v4494_v36, %s2739_s26  ;;  %v1234_v43 = vpop.permute.xlu1 %1233 }
 0x137   : > { %1330 = vst.msk [vmem:[#allocation2] sm:$0xf] %vm1329_vm11, %v1234_v43 }
 0x138   : > { %v1113_v55 = vpop.permute.xlu0 %1112  ;;  %1811 = vrot.lane.b32.xlu1 %v3378_v13, %s2740_s4 }
 0x139   : > { %1193 = vst.msk [vmem:[#allocation2 + $0x40] sm:$0xf] %vm1176_vm10, %v1113_v55 }
 0x13a   : > { %1809 = vrot.lane.b32.xlu0 %v3357_v56, %s2740_s4  ;;  %v1238_v34 = vpop.permute.xlu1 %1237  ;;  %v4495_v56 = vld [vmem:[#allocation29_spill] sm:$0xff] }
 0x13b   : > { %1332 = vst.msk [vmem:[#allocation2 + $0x8] sm:$0xf] %vm1329_vm11, %v1238_v34 }
 0x13c   : > { %v1236_v2 = vpop.permute.xlu0 %1235  ;;  %1257 = vrot.lane.b32.xlu1 %v4493_v15, %s2736_s21 }
 0x13d   : > { %1331 = vst.msk [vmem:[#allocation2 + $0x4] sm:$0xf] %vm1329_vm11, %v1236_v2  ;;  %v4501_v2 = vld [vmem:[#allocation35_spill] sm:$0xff] }
 0x13e   : > { %1813 = vrot.lane.b32.xlu0 %v3372_v41, %s2740_s4  ;;  %v1371_v54 = vpop.permute.xlu1 %1370 }
 0x13f   : > { %1467 = vst.msk [vmem:[#allocation2] sm:$0xf] %vm1466_vm12, %v1371_v54  ;;  %v4502_v54 = vld [vmem:[#allocation36_spill] sm:$0xff] }
 0x140   : > { %v1240_v40 = vpop.permute.xlu0 %1239  ;;  %1261 = vrot.lane.b32.xlu1 %v4495_v56, %s2736_s21 }
 0x141   : > { %1333 = vst.msk [vmem:[#allocation2 + $0xc] sm:$0xf] %vm1329_vm11, %v1240_v40 }
 0x142   : > { %1259 = vrot.lane.b32.xlu0 %v4494_v36, %s2736_s21  ;;  %v1375_v49 = vpop.permute.xlu1 %1374 }
 0x143   : > { %1469 = vst.msk [vmem:[#allocation2 + $0x8] sm:$0xf] %vm1466_vm12, %v1375_v49 }
 0x144   : > { %v1373_v9 = vpop.permute.xlu0 %1372  ;;  %1394 = vrot.lane.b32.xlu1 %v3378_v13, %s2737_s22 }
 0x145   : > { %1468 = vst.msk [vmem:[#allocation2 + $0x4] sm:$0xf] %vm1466_vm12, %v1373_v9 }
 0x146   : > { %1263 = vrot.lane.b32.xlu0 %v4496_v47, %s2736_s21  ;;  %v1502_v59 = vpop.permute.xlu1 %1501 }
 0x147   : > { %1598 = vst.msk [vmem:[#allocation2] sm:$0xf] %vm1597_vm13, %v1502_v59 }
 0x148   : > { %v1377_v25 = vpop.permute.xlu0 %1376  ;;  %1398 = vrot.lane.b32.xlu1 %v3393_v38, %s2737_s22 }
 0x149   : > { %1470 = vst.msk [vmem:[#allocation2 + $0xc] sm:$0xf] %vm1466_vm12, %v1377_v25 }
 0x14a   : > { %1396 = vrot.lane.b32.xlu0 %v3372_v41, %s2737_s22  ;;  %v1506_v37 = vpop.permute.xlu1 %1505 }
 0x14b   : > { %1600 = vst.msk [vmem:[#allocation2 + $0x8] sm:$0xf] %vm1597_vm13, %v1506_v37 }
 0x14c   : > { %v1504_v13 = vpop.permute.xlu0 %1503  ;;  %1525 = vrot.lane.b32.xlu1 %v2953_v58, %s2738_s23 }
 0x14d   : > { %1599 = vst.msk [vmem:[#allocation2 + $0x4] sm:$0xf] %vm1597_vm13, %v1504_v13  ;;  %v4503_v13 = vld [vmem:[#allocation16_spill] sm:$0xff] }
 0x14e   : > { %1400 = vrot.lane.b32.xlu0 %v3387_v32, %s2737_s22  ;;  %v1655_v0 = vpop.permute.xlu1 %1654 }
 0x14f   : > { %1751 = vst.msk [vmem:[#allocation2] sm:$0xf] %vm1750_vm14, %v1655_v0  ;;  %v4504_v0 = vld [vmem:[#allocation18_spill] sm:$0xff] }
 0x150   : > { %v1508_v61 = vpop.permute.xlu0 %1507  ;;  %1529 = vrot.lane.b32.xlu1 %v4474_v5, %s2738_s23 }
 0x151   : > { %1601 = vst.msk [vmem:[#allocation2 + $0xc] sm:$0xf] %vm1597_vm13, %v1508_v61 }
 0x152   : > { %1527 = vrot.lane.b32.xlu0 %v2939_v50, %s2738_s23  ;;  %v1659_v41 = vpop.permute.xlu1 %1658  ;;  %v4497_v50 = vld [vmem:[#allocation32_spill] sm:$0xff] }
 0x153   : > { %1753 = vst.msk [vmem:[#allocation2 + $0x8] sm:$0xf] %vm1750_vm14, %v1659_v41 }
 0x154   : > { %v1657_v58 = vpop.permute.xlu0 %1656  ;;  %1678 = vrot.lane.b32.xlu1 %v4495_v56, %s2739_s26 }
 0x155   : > { %1752 = vst.msk [vmem:[#allocation2 + $0x4] sm:$0xf] %vm1750_vm14, %v1657_v58  ;;  %v4505_v58 = vld [vmem:[#allocation37_spill] sm:$0xff] }
 0x156   : > { %1531 = vrot.lane.b32.xlu0 %v2963_v4, %s2738_s23  ;;  %v1792_v20 = vpop.permute.xlu1 %1791 }
 0x157   : > { %1888 = vst.msk [vmem:[#allocation2] sm:$0xf] %vm1887_vm15, %v1792_v20  ;;  %v4506_v20 = vld [vmem:[#allocation38_spill] sm:$0xff] }
 0x158   : > { %v1661_v5 = vpop.permute.xlu0 %1660  ;;  %1682 = vrot.lane.b32.xlu1 %v4497_v50, %s2739_s26 }
 0x159   : > { %1754 = vst.msk [vmem:[#allocation2 + $0xc] sm:$0xf] %vm1750_vm14, %v1661_v5 }
 0x15a   : > { %1680 = vrot.lane.b32.xlu0 %v4496_v47, %s2739_s26  ;;  %v1796_v1 = vpop.permute.xlu1 %1795 }
 0x15b   : > { %1890 = vst.msk [vmem:[#allocation2 + $0x8] sm:$0xf] %vm1887_vm15, %v1796_v1 }
 0x15c   : > { %v1794_v23 = vpop.permute.xlu0 %1793  ;;  %1815 = vrot.lane.b32.xlu1 %v3393_v38, %s2740_s4 }
 0x15d   : > { %1889 = vst.msk [vmem:[#allocation2 + $0x4] sm:$0xf] %vm1887_vm15, %v1794_v23 }
 0x15e   : > { %1684 = vrot.lane.b32.xlu0 %v4498_v10, %s2739_s26  ;;  %v1242_v52 = vpop.permute.xlu1 %1241 }
 0x15f   : > { %1334 = vst.msk [vmem:[#allocation2 + $0x10] sm:$0xf] %vm1329_vm11, %v1242_v52 }
 0x160   : > { %v1798_v46 = vpop.permute.xlu0 %1797  ;;  %1819 = vrot.lane.b32.xlu1 %v3408_v39, %s2740_s4 }
 0x161   : > { %1891 = vst.msk [vmem:[#allocation2 + $0xc] sm:$0xf] %vm1887_vm15, %v1798_v46 }
 0x162   : > { %1817 = vrot.lane.b32.xlu0 %v3387_v32, %s2740_s4  ;;  %v1246_v18 = vpop.permute.xlu1 %1245 }
 0x163   : > { %1336 = vst.msk [vmem:[#allocation2 + $0x18] sm:$0xf] %vm1329_vm11, %v1246_v18  ;;  %v4508_v18 = vld [vmem:[#allocation19_spill] sm:$0xff] }
 0x164   : > { %v1244_v38 = vpop.permute.xlu0 %1243  ;;  %v2709_v33 = vld [vmem:[#allocation2] sm:$0xff]   ;;  %1114 = vrot.lane.b32.xlu1 %v2963_v4, %s2735_s20 }
 0x165   : > { %1335 = vst.msk [vmem:[#allocation2 + $0x14] sm:$0xf] %vm1329_vm11, %v1244_v38  ;;  %2649 = vmatprep.mubr.msk.bf16.mxu0 %vm2052_vm0, %v2709_v33  ;;  %v4509_v38 = vld [vmem:[#allocation21_spill] sm:$0xff] }
 0x166   : > { %1821 = vrot.lane.b32.xlu0 %v3402_v3, %s2740_s4  ;;  %v1379_v24 = vpop.permute.xlu1 %1378 }
 0x167   : > { %1471 = vst.msk [vmem:[#allocation2 + $0x10] sm:$0xf] %vm1466_vm12, %v1379_v24 }
 0x168   : > { %v1248_v32 = vpop.permute.xlu0 %1247  ;;  %v2710_v22 = vld [vmem:[#allocation2 + $0x8] sm:$0xff]   ;;  %1118 = vrot.lane.b32.xlu1 %v2984_v21, %s2735_s20 }
 0x169   : > { %1337 = vst.msk [vmem:[#allocation2 + $0x1c] sm:$0xf] %vm1329_vm11, %v1248_v32  ;;  %2650 = vmatmul.mubr.msk.bf16.vlgmr.msra.gmra.mxu0 %vm2052_vm0, %v2710_v22 }
 0x16a   : > { %1116 = vrot.lane.b32.xlu0 %v4475_v45, %s2735_s20  ;;  %v1383_v4 = vpop.permute.xlu1 %1382 }
 0x16b   : > { %1473 = vst.msk [vmem:[#allocation2 + $0x18] sm:$0xf] %vm1466_vm12, %v1383_v4 }
 0x16c   : > { %v1381_v26 = vpop.permute.xlu0 %1380  ;;  %1267 = vrot.lane.b32.xlu1 %v4498_v10, %s2736_s21  ;;  %v4507_v10 = vld [vmem:[#allocation23_spill] sm:$0xff] }
 0x16d   : > { %1472 = vst.msk [vmem:[#allocation2 + $0x14] sm:$0xf] %vm1466_vm12, %v1381_v26 }
 0x16e   : > { %1265 = vrot.lane.b32.xlu0 %v4497_v50, %s2736_s21  ;;  %v1510_v44 = vpop.permute.xlu1 %1509 }
 0x16f   : > { %1602 = vst.msk [vmem:[#allocation2 + $0x10] sm:$0xf] %vm1597_vm13, %v1510_v44  ;;  %v4510_v44 = vld [vmem:[#allocation39_spill] sm:$0xff] }
 0x170   : > { %v1385_v29 = vpop.permute.xlu0 %1384  ;;  %1271 = vrot.lane.b32.xlu1 %v4499_v11, %s2736_s21 }
 0x171   : > { %1474 = vst.msk [vmem:[#allocation2 + $0x1c] sm:$0xf] %vm1466_vm12, %v1385_v29  ;;  %v4511_v29 = vld [vmem:[#allocation40_spill] sm:$0xff] }
 0x172   : > { %1269 = vrot.lane.b32.xlu0 %v4500_v27, %s2736_s21  ;;  %v1514_v62 = vpop.permute.xlu1 %1513 }
 0x173   : > { %1604 = vst.msk [vmem:[#allocation2 + $0x18] sm:$0xf] %vm1597_vm13, %v1514_v62 }
 0x174   : > { %v1512_v15 = vpop.permute.xlu0 %1511  ;;  %1404 = vrot.lane.b32.xlu1 %v3402_v3, %s2737_s22 }
 0x175   : > { %1603 = vst.msk [vmem:[#allocation2 + $0x14] sm:$0xf] %vm1597_vm13, %v1512_v15 }
 0x176   : > { %1402 = vrot.lane.b32.xlu0 %v3408_v39, %s2737_s22  ;;  %v1663_v42 = vpop.permute.xlu1 %1662 }
 0x177   : > { %1755 = vst.msk [vmem:[#allocation2 + $0x10] sm:$0xf] %vm1750_vm14, %v1663_v42 }
 0x178   : > { %v1516_v17 = vpop.permute.xlu0 %1515  ;;  %1408 = vrot.lane.b32.xlu1 %v3417_v14, %s2737_s22 }
 0x179   : > { %1605 = vst.msk [vmem:[#allocation2 + $0x1c] sm:$0xf] %vm1597_vm13, %v1516_v17 }
 0x17a   : > { %1406 = vrot.lane.b32.xlu0 %v3423_v28, %s2737_s22  ;;  %v1667_v36 = vpop.permute.xlu1 %1666 }
 0x17b   : > { %1757 = vst.msk [vmem:[#allocation2 + $0x18] sm:$0xf] %vm1750_vm14, %v1667_v36 }
 0x17c   : > { %v1665_v43 = vpop.permute.xlu0 %1664  ;;  %1535 = vrot.lane.b32.xlu1 %v2984_v21, %s2738_s23 }
 0x17d   : > { %1756 = vst.msk [vmem:[#allocation2 + $0x14] sm:$0xf] %vm1750_vm14, %v1665_v43  ;;  %v4512_v43 = vld [vmem:[#allocation24_spill] sm:$0xff] }
 0x17e   : > { %1533 = vrot.lane.b32.xlu0 %v4475_v45, %s2738_s23  ;;  %v1800_v3 = vpop.permute.xlu1 %1799 }
 0x17f   : > { %1892 = vst.msk [vmem:[#allocation2 + $0x10] sm:$0xf] %vm1887_vm15, %v1800_v3 }
 0x180   : > { %v1669_v39 = vpop.permute.xlu0 %1668  ;;  %1539 = vrot.lane.b32.xlu1 %v3008_v53, %s2738_s23 }
 0x181   : > { %1758 = vst.msk [vmem:[#allocation2 + $0x1c] sm:$0xf] %vm1750_vm14, %v1669_v39 }
 0x182   : > { %1537 = vrot.lane.b32.xlu0 %v4478_v60, %s2738_s23  ;;  %v1804_v55 = vpop.permute.xlu1 %1803 }
 0x183   : > { %1894 = vst.msk [vmem:[#allocation2 + $0x18] sm:$0xf] %vm1887_vm15, %v1804_v55 }
 0x184   : > { %v1802_v34 = vpop.permute.xlu0 %1801  ;;  %1688 = vrot.lane.b32.xlu1 %v4499_v11, %s2739_s26 }
 0x185   : > { %1893 = vst.msk [vmem:[#allocation2 + $0x14] sm:$0xf] %vm1887_vm15, %v1802_v34 }
 0x186   : > { %1686 = vrot.lane.b32.xlu0 %v4500_v27, %s2739_s26  ;;  %v1250_v21 = vpop.permute.xlu1 %1249 }
 0x187   : > { %1338 = vst.msk [vmem:[#allocation2 + $0x20] sm:$0xf] %vm1329_vm11, %v1250_v21  ;;  %v4513_v21 = vld [vmem:[#allocation41_spill] sm:$0xff] }
 0x188   : > { %v1806_v45 = vpop.permute.xlu0 %1805  ;;  %1692 = vrot.lane.b32.xlu1 %v4501_v2, %s2739_s26 }
 0x189   : > { %1895 = vst.msk [vmem:[#allocation2 + $0x1c] sm:$0xf] %vm1887_vm15, %v1806_v45  ;;  %v4514_v45 = vld [vmem:[#allocation42_spill] sm:$0xff] }
 0x18a   : > { %1690 = vrot.lane.b32.xlu0 %v4502_v54, %s2739_s26  ;;  %v1254_v40 = vpop.permute.xlu1 %1253 }
 0x18b   : > { %1340 = vst.msk [vmem:[#allocation2 + $0x28] sm:$0xf] %vm1329_vm11, %v1254_v40 }
 0x18c   : > { %v1252_v56 = vpop.permute.xlu0 %1251  ;;  %v2711_v49 = vld [vmem:[#allocation2 + $0x10] sm:$0xff]   ;;  %1825 = vrot.lane.b32.xlu1 %v3417_v14, %s2740_s4 }
 0x18d   : > { %1339 = vst.msk [vmem:[#allocation2 + $0x24] sm:$0xf] %vm1329_vm11, %v1252_v56  ;;  %2653 = vmatprep.mubr.msk.bf16.mxu0 %vm2052_vm0, %v2711_v49 }
 0x18e   : > { %1823 = vrot.lane.b32.xlu0 %v3423_v28, %s2740_s4  ;;  %v1387_v9 = vpop.permute.xlu1 %1386 }
 0x18f   : > { %1475 = vst.msk [vmem:[#allocation2 + $0x20] sm:$0xf] %vm1466_vm12, %v1387_v9 }
 0x190   : > { %v1256_v47 = vpop.permute.xlu0 %1255  ;;  %v2712_v59 = vld [vmem:[#allocation2 + $0x18] sm:$0xff]   ;;  %1829 = vrot.lane.b32.xlu1 %v3432_v31, %s2740_s4 }
 0x191   : > { %1341 = vst.msk [vmem:[#allocation2 + $0x2c] sm:$0xf] %vm1329_vm11, %v1256_v47  ;;  %2654 = vmatmul.mubr.msk.bf16.gmra.mxu0 %vm2052_vm0, %v2712_v59 }
 0x192   : > { %1827 = vrot.lane.b32.xlu0 %v3438_v6, %s2740_s4  ;;  %v1391_v14 = vpop.permute.xlu1 %1390 }
 0x193   : > { %1477 = vst.msk [vmem:[#allocation2 + $0x28] sm:$0xf] %vm1466_vm12, %v1391_v14 }
 0x194   : > { %v1389_v28 = vpop.permute.xlu0 %1388  ;;  %1122 = vrot.lane.b32.xlu1 %v3008_v53, %s2735_s20 }
 0x195   : > { %1476 = vst.msk [vmem:[#allocation2 + $0x24] sm:$0xf] %vm1466_vm12, %v1389_v28 }
 0x196   : > { %1120 = vrot.lane.b32.xlu0 %v4478_v60, %s2735_s20  ;;  %v1518_v25 = vpop.permute.xlu1 %1517 }
 0x197   : > { %1606 = vst.msk [vmem:[#allocation2 + $0x20] sm:$0xf] %vm1597_vm13, %v1518_v25 }
 0x198   : > { %v1393_v37 = vpop.permute.xlu0 %1392  ;;  %1126 = vrot.lane.b32.xlu1 %v4503_v13, %s2735_s20 }
 0x199   : > { %1478 = vst.msk [vmem:[#allocation2 + $0x2c] sm:$0xf] %vm1466_vm12, %v1393_v37  ;;  %v4515_v37 = vld [vmem:[#allocation43_spill] sm:$0xff] }
 0x19a   : > { %1124 = vrot.lane.b32.xlu0 %v4504_v0, %s2735_s20  ;;  %v1522_v61 = vpop.permute.xlu1 %1521 }
 0x19b   : > { %1608 = vst.msk [vmem:[#allocation2 + $0x28] sm:$0xf] %vm1597_vm13, %v1522_v61  ;;  %v4017_v61 = vld [vmem:[%s2775_s17 + $0xc4] sm:$0xf] }
 0x19c   : > { %v1520_v41 = vpop.permute.xlu0 %1519  ;;  %1275 = vrot.lane.b32.xlu1 %v4501_v2, %s2736_s21 }
 0x19d   : > { %1607 = vst.msk [vmem:[#allocation2 + $0x24] sm:$0xf] %vm1597_vm13, %v1520_v41 }
 0x19e   : > { %1273 = vrot.lane.b32.xlu0 %v4502_v54, %s2736_s21  ;;  %v1671_v53 = vpop.permute.xlu1 %1670 }
 0x19f   : > { %1759 = vst.msk [vmem:[#allocation2 + $0x20] sm:$0xf] %vm1750_vm14, %v1671_v53  ;;  %v4021_v53 = vld [vmem:[%s2775_s17 + $0xc0] sm:$0xf] }
 0x1a0   : > { %v1524_v60 = vpop.permute.xlu0 %1523  ;;  %1279 = vrot.lane.b32.xlu1 %v4505_v58, %s2736_s21 }
 0x1a1   : > { %1609 = vst.msk [vmem:[#allocation2 + $0x2c] sm:$0xf] %vm1597_vm13, %v1524_v60  ;;  %v1219_v60 = vshll.u32 %v4017_v61, 16 }
 0x1a2   : > { %1277 = vrot.lane.b32.xlu0 %v4506_v20, %s2736_s21  ;;  %v1675_v5 = vpop.permute.xlu1 %1674 }
 0x1a3   : > { %1761 = vst.msk [vmem:[#allocation2 + $0x28] sm:$0xf] %vm1750_vm14, %v1675_v5  ;;  %v1210_v5 = vshrl.u32 %v4021_v53, 16 }
 0x1a4   : > { %v1673_v50 = vpop.permute.xlu0 %1672  ;;  %1412 = vrot.lane.b32.xlu1 %v3432_v31, %s2737_s22 }
 0x1a5   : > { %1760 = vst.msk [vmem:[#allocation2 + $0x24] sm:$0xf] %vm1750_vm14, %v1673_v50  ;;  %v1213_v50 = vshll.u32 %v4021_v53, 16 }
 0x1a6   : > { %1410 = vrot.lane.b32.xlu0 %v3438_v6, %s2737_s22  ;;  %v1808_v1 = vpop.permute.xlu1 %1807 }
 0x1a7   : > { %1896 = vst.msk [vmem:[#allocation2 + $0x20] sm:$0xf] %vm1887_vm15, %v1808_v1 }
 0x1a8   : > { %v1677_v23 = vpop.permute.xlu0 %1676  ;;  %1416 = vrot.lane.b32.xlu1 %v4507_v10, %s2737_s22 }
 0x1a9   : > { %1762 = vst.msk [vmem:[#allocation2 + $0x2c] sm:$0xf] %vm1750_vm14, %v1677_v23 }
 0x1aa   : > { %1414 = vrot.lane.b32.xlu0 %v3453_v30, %s2737_s22  ;;  %v1812_v52 = vpop.permute.xlu1 %1811 }
 0x1ab   : > { %1898 = vst.msk [vmem:[#allocation2 + $0x28] sm:$0xf] %vm1887_vm15, %v1812_v52  ;;  %v1212_v52 = vrot.slane %v1210_v5, 4 }
 0x1ac   : > { %v1810_v46 = vpop.permute.xlu0 %1809  ;;  %1543 = vrot.lane.b32.xlu1 %v4503_v13, %s2738_s23  ;;  %v4516_v13 = vld [vmem:[#allocation44_spill] sm:$0xff] }
 0x1ad   : > { %1897 = vst.msk [vmem:[#allocation2 + $0x24] sm:$0xf] %vm1887_vm15, %v1810_v46  ;;  %v1215_v46 = vrot.slane %v1213_v50, 5 }
 0x1ae   : > { %1541 = vrot.lane.b32.xlu0 %v4504_v0, %s2738_s23  ;;  %v1258_v31 = vpop.permute.xlu1 %1257 }
 0x1af   : > { %1342 = vst.msk [vmem:[#allocation2 + $0x30] sm:$0xf] %vm1329_vm11, %v1258_v31 }
 0x1b0   : > { %v1814_v6 = vpop.permute.xlu0 %1813  ;;  %1547 = vrot.lane.b32.xlu1 %v4508_v18, %s2738_s23 }
 0x1b1   : > { %1899 = vst.msk [vmem:[#allocation2 + $0x2c] sm:$0xf] %vm1887_vm15, %v1814_v6 }
 0x1b2   : > { %1545 = vrot.lane.b32.xlu0 %v4509_v38, %s2738_s23  ;;  %v1262_v33 = vpop.permute.xlu1 %1261 }
 0x1b3   : > { %1344 = vst.msk [vmem:[#allocation2 + $0x38] sm:$0xf] %vm1329_vm11, %v1262_v33  ;;  %v1216_v33 = vor.u32 %v1215_v46, %v1212_v52 }
 0x1b4   : > { %v1260_v24 = vpop.permute.xlu0 %1259  ;;  %v2713_v32 = vld [vmem:[#allocation2 + $0x20] sm:$0xff]   ;;  %1696 = vrot.lane.b32.xlu1 %v4505_v58, %s2739_s26  ;;  %v1223_v58 = vshrl.u32 %v4017_v61, 16 }
 0x1b5   : > { %1343 = vst.msk [vmem:[#allocation2 + $0x34] sm:$0xf] %vm1329_vm11, %v1260_v24  ;;  %2657 = vmatprep.mubr.msk.bf16.mxu0 %vm2052_vm0, %v2713_v32 }
 0x1b6   : > { %1694 = vrot.lane.b32.xlu0 %v4506_v20, %s2739_s26  ;;  %v1395_v22 = vpop.permute.xlu1 %1394 }
 0x1b7   : > { %1479 = vst.msk [vmem:[#allocation2 + $0x30] sm:$0xf] %vm1466_vm12, %v1395_v22 }
 0x1b8   : > { %v1264_v4 = vpop.permute.xlu0 %1263  ;;  %v2714_v26 = vld [vmem:[#allocation2 + $0x28] sm:$0xff]   ;;  %1700 = vrot.lane.b32.xlu1 %v4510_v44, %s2739_s26 }
 0x1b9   : > { %1345 = vst.msk [vmem:[#allocation2 + $0x3c] sm:$0xf] %vm1329_vm11, %v1264_v4  ;;  %2658 = vmatmul.mubr.msk.bf16.gmra.mxu0 %vm2052_vm0, %v2714_v26  ;;  %v1217_v4 = vrot.slane %v1216_v33, 4 }
 0x1ba   : > { %1698 = vrot.lane.b32.xlu0 %v4511_v29, %s2739_s26  ;;  %v1399_v11 = vpop.permute.xlu1 %1398 }
 0x1bb   : > { %1481 = vst.msk [vmem:[#allocation2 + $0x38] sm:$0xf] %vm1466_vm12, %v1399_v11 }
 0x1bc   : > { %v1397_v27 = vpop.permute.xlu0 %1396  ;;  %1833 = vrot.lane.b32.xlu1 %v4507_v10, %s2740_s4  ;;  %v233_v10 = vld [vmem:[%s2775_s17 + $0xc8] sm:$0x1] }
 0x1bd   : > { %1480 = vst.msk [vmem:[#allocation2 + $0x34] sm:$0xf] %vm1466_vm12, %v1397_v27 }
 0x1be   : > { %1831 = vrot.lane.b32.xlu0 %v3453_v30, %s2740_s4  ;;  %v1526_v62 = vpop.permute.xlu1 %1525 }
 0x1bf   : > { %1610 = vst.msk [vmem:[#allocation2 + $0x30] sm:$0xf] %vm1597_vm13, %v1526_v62 }
 0x1c0   : > { %v1401_v15 = vpop.permute.xlu0 %1400  ;;  %1837 = vrot.lane.b32.xlu1 %v3462_v35, %s2740_s4 }
 0x1c1   : > { %1482 = vst.msk [vmem:[#allocation2 + $0x3c] sm:$0xf] %vm1466_vm12, %v1401_v15 }
 0x1c2   : > { %1835 = vrot.lane.b32.xlu0 %v3468_v57, %s2740_s4  ;;  %v1530_v42 = vpop.permute.xlu1 %1529 }
 0x1c3   : > { %1612 = vst.msk [vmem:[#allocation2 + $0x38] sm:$0xf] %vm1597_vm13, %v1530_v42  ;;  %v1368_v42 = vrot.slane %v233_v10, 5 }
 0x1c4   : > { %v1528_v17 = vpop.permute.xlu0 %1527  ;;  %1130 = vrot.lane.b32.xlu1 %v4508_v18, %s2735_s20  ;;  %v1229_v18 = vshll.u32 %v233_v10, 16 }
 0x1c5   : > { %1611 = vst.msk [vmem:[#allocation2 + $0x34] sm:$0xf] %vm1597_vm13, %v1528_v17 }
 0x1c6   : > { %1128 = vrot.lane.b32.xlu0 %v4509_v38, %s2735_s20  ;;  %v1679_v30 = vpop.permute.xlu1 %1678 }
 0x1c7   : > { %1763 = vst.msk [vmem:[#allocation2 + $0x30] sm:$0xf] %vm1750_vm14, %v1679_v30  ;;  %v2584_v30 = vrot.slane %v4021_v53, 9 }
 0x1c8   : > { %v1532_v36 = vpop.permute.xlu0 %1531  ;;  %1134 = vrot.lane.b32.xlu1 %v4512_v43, %s2735_s20 }
 0x1c9   : > { %1613 = vst.msk [vmem:[#allocation2 + $0x3c] sm:$0xf] %vm1597_vm13, %v1532_v36  ;;  %v4071_v36 = vld [vmem:[%s2775_s17 + $0xd0] sm:$0xf] }
 0x1ca   : > { %1132 = vrot.lane.b32.xlu0 %v4480_v8, %s2735_s20  ;;  %v1683_v3 = vpop.permute.xlu1 %1682 }
 0x1cb   : > { %1765 = vst.msk [vmem:[#allocation2 + $0x38] sm:$0xf] %vm1750_vm14, %v1683_v3  ;;  %v4075_v3 = vld [vmem:[%s2775_s17 + $0xcc] sm:$0xf] }
 0x1cc   : > { %v1681_v39 = vpop.permute.xlu0 %1680  ;;  %1283 = vrot.lane.b32.xlu1 %v4510_v44, %s2736_s21 }
 0x1cd   : > { %1764 = vst.msk [vmem:[#allocation2 + $0x34] sm:$0xf] %vm1750_vm14, %v1681_v39 }
 0x1ce   : > { %1281 = vrot.lane.b32.xlu0 %v4511_v29, %s2736_s21  ;;  %v1816_v55 = vpop.permute.xlu1 %1815  ;;  %v1365_v29 = vrot.slane %v4017_v61, 5 }
 0x1cf   : > { %1900 = vst.msk [vmem:[#allocation2 + $0x30] sm:$0xf] %vm1887_vm15, %v1816_v55  ;;  %v1640_v55 = vshll.u32 %v4071_v36, 16 }
 0x1d0   : > { %v1685_v34 = vpop.permute.xlu0 %1684  ;;  %1287 = vrot.lane.b32.xlu1 %v4513_v21, %s2736_s21  ;;  %v1367_v15 = vrot.slane %v1365_v29, 4 }
 0x1d1   : > { %1766 = vst.msk [vmem:[#allocation2 + $0x3c] sm:$0xf] %vm1750_vm14, %v1685_v34  ;;  %v1644_v34 = vshrl.u32 %v4071_v36, 16 }
 0x1d2   : > { %1285 = vrot.lane.b32.xlu0 %v4514_v45, %s2736_s21  ;;  %v1820_v2 = vpop.permute.xlu1 %1819  ;;  %v1369_v39 = vsel %vm3243_vm6, %v1367_v15, %v1368_v42 }
 0x1d3   : > { %1902 = vst.msk [vmem:[#allocation2 + $0x38] sm:$0xf] %vm1887_vm15, %v1820_v2  ;;  %v1631_v2 = vshrl.u32 %v4075_v3, 16 }
 0x1d4   : > { %v1818_v54 = vpop.permute.xlu0 %1817  ;;  %1420 = vrot.lane.b32.xlu1 %v3462_v35, %s2737_s22 }
 0x1d5   : > { %1901 = vst.msk [vmem:[#allocation2 + $0x34] sm:$0xf] %vm1887_vm15, %v1818_v54  ;;  %v1634_v54 = vshll.u32 %v4075_v3, 16 }
 0x1d6   : > { %1418 = vrot.lane.b32.xlu0 %v3468_v57, %s2737_s22  ;;  %v1115_v40 = vpop.permute.xlu1 %1114 }
 0x1d7   : > { %1194 = vst.msk [vmem:[#allocation2 + $0x44] sm:$0xf] %vm1176_vm10, %v1115_v40  ;;  %v1642_v40 = vrot.slane %v1640_v55, 5 }
 0x1d8   : > { %v1822_v56 = vpop.permute.xlu0 %1821  ;;  %1424 = vrot.lane.b32.xlu1 %v3479_v16, %s2737_s22 }
 0x1d9   : > { %1903 = vst.msk [vmem:[#allocation2 + $0x3c] sm:$0xf] %vm1887_vm15, %v1822_v56  ;;  %v1646_v56 = vrot.slane %v1644_v34, 4 }
 0x1da   : > { %1422 = vrot.lane.b32.xlu0 %v3484_v19, %s2737_s22  ;;  %v1119_v49 = vpop.permute.xlu1 %1118 }
 0x1db   : > { %1196 = vst.msk [vmem:[#allocation2 + $0x4c] sm:$0xf] %vm1176_vm10, %v1119_v49 }
 0x1dc   : > { %v1117_v9 = vpop.permute.xlu0 %1116  ;;  %v2715_v35 = vld [vmem:[#allocation2 + $0x30] sm:$0xff]   ;;  %1551 = vrot.lane.b32.xlu1 %v4512_v43, %s2738_s23 }
 0x1dd   : > { %1195 = vst.msk [vmem:[#allocation2 + $0x48] sm:$0xf] %vm1176_vm10, %v1117_v9  ;;  %2661 = vmatprep.mubr.msk.bf16.mxu0 %vm2052_vm0, %v2715_v35  ;;  %v1633_v9 = vrot.slane %v1631_v2, 4  ;;  %v1636_v35 = vrot.slane %v1634_v54, 5 }
 0x1de   : > { %1549 = vrot.lane.b32.xlu0 %v4480_v8, %s2738_s23  ;;  %v1268_v57 = vpop.permute.xlu1 %1267 }
 0x1df   : > { %1347 = vst.msk [vmem:[#allocation2 + $0x44] sm:$0xf] %vm1329_vm11, %v1268_v57  ;;  %v236_v57 = vld [vmem:[%s2775_s17 + $0xd4] sm:$0x1] }
 0x1e0   : > { %v1266_v47 = vpop.permute.xlu0 %1265  ;;  %v2716_v59 = vld [vmem:[#allocation2 + $0x38] sm:$0xff]   ;;  %1555 = vrot.lane.b32.xlu1 %v3095_v12, %s2738_s23 }
 0x1e1   : > { %1346 = vst.msk [vmem:[#allocation2 + $0x40] sm:$0xf] %vm1329_vm11, %v1266_v47  ;;  %2662 = vmatmul.mubr.msk.bf16.gmra.mxu0 %vm2052_vm0, %v2716_v59 }
 0x1e2   : > { %1553 = vrot.lane.b32.xlu0 %v3112_v51, %s2738_s23  ;;  %v1272_v14 = vpop.permute.xlu1 %1271 }
 0x1e3   : > { %1349 = vst.msk [vmem:[#allocation2 + $0x4c] sm:$0xf] %vm1329_vm11, %v1272_v14  ;;  %v1647_v14 = vor.u32 %v1646_v56, %v1642_v40 }
 0x1e4   : > { %v1270_v8 = vpop.permute.xlu0 %1269  ;;  %1704 = vrot.lane.b32.xlu1 %v4513_v21, %s2739_s26 }
 0x1e5   : > { %1348 = vst.msk [vmem:[#allocation2 + $0x48] sm:$0xf] %vm1329_vm11, %v1270_v8  ;;  %v1650_v8 = vshll.u32 %v236_v57, 16 }
 0x1e6   : > { %1702 = vrot.lane.b32.xlu0 %v4514_v45, %s2739_s26  ;;  %v1405_v28 = vpop.permute.xlu1 %1404  ;;  %v1366_v45 = vsel %vm3243_vm6, %v2584_v30, %v1365_v29 }
 0x1e7   : > { %1484 = vst.msk [vmem:[#allocation2 + $0x44] sm:$0xf] %vm1466_vm12, %v1405_v28 }
 0x1e8   : > { %v1403_v25 = vpop.permute.xlu0 %1402  ;;  %1708 = vrot.lane.b32.xlu1 %v4515_v37, %s2739_s26 }
 0x1e9   : > { %1483 = vst.msk [vmem:[#allocation2 + $0x40] sm:$0xf] %vm1466_vm12, %v1403_v25  ;;  %v1637_v25 = vor.u32 %v1636_v35, %v1633_v9 }
 0x1ea   : > { %1706 = vrot.lane.b32.xlu0 %v4516_v13, %s2739_s26  ;;  %v1409_v0 = vpop.permute.xlu1 %1408 }
 0x1eb   : > { %1486 = vst.msk [vmem:[#allocation2 + $0x4c] sm:$0xf] %vm1466_vm12, %v1409_v0  ;;  %v1652_v0 = vrot.slane %v1650_v8, 5 }
 0x1ec   : > { %v1407_v41 = vpop.permute.xlu0 %1406  ;;  %1841 = vrot.lane.b32.xlu1 %v3479_v16, %s2740_s4  ;;  %v1221_v16 = vrot.slane %v1219_v60, 5  ;;  %v1786_v60 = vrot.slane %v4071_v36, 5 }
 0x1ed   : > { %1485 = vst.msk [vmem:[#allocation2 + $0x48] sm:$0xf] %vm1466_vm12, %v1407_v41  ;;  %v1638_v41 = vrot.slane %v1637_v25, 4 }
 0x1ee   : > { %1839 = vrot.lane.b32.xlu0 %v3484_v19, %s2740_s4  ;;  %v1536_v20 = vpop.permute.xlu1 %1535  ;;  %v1225_v19 = vrot.slane %v1223_v58, 4  ;;  %v1222_v27 = vsel %vm2824_vm3, %v1217_v4, %v1221_v16 }
 0x1ef   : > { %1615 = vst.msk [vmem:[#allocation2 + $0x44] sm:$0xf] %vm1597_vm13, %v1536_v20  ;;  %v1643_v5 = vsel %vm2824_vm3, %v1638_v41, %v1642_v40 }
 0x1f0   : > { %v1534_v1 = vpop.permute.xlu0 %1533  ;;  %1845 = vrot.lane.b32.xlu1 %v3495_v7, %s2740_s4  ;;  %v1226_v6 = vor.u32 %v1225_v19, %v1221_v16  ;;  %v1789_v16 = vrot.slane %v236_v57, 5  ;;  %v2585_v19 = vrot.slane %v4075_v3, 9 }
 0x1f1   : > { %1614 = vst.msk [vmem:[#allocation2 + $0x40] sm:$0xf] %vm1597_vm13, %v1534_v1  ;;  %v1788_v1 = vrot.slane %v1786_v60, 4 }
 0x1f2   : > { %1843 = vrot.lane.b32.xlu0 %v3499_v48, %s2740_s4  ;;  %v1540_v23 = vpop.permute.xlu1 %1539  ;;  %v1227_v32 = vrot.slane %v1226_v6, 4 }
 0x1f3   : > { %1617 = vst.msk [vmem:[#allocation2 + $0x4c] sm:$0xf] %vm1597_vm13, %v1540_v23  ;;  %v1790_v52 = vsel %vm3243_vm6, %v1788_v1, %v1789_v16 }
 0x1f4   : > { %v1538_v31 = vpop.permute.xlu0 %1537  ;;  %1138 = vrot.lane.b32.xlu1 %v3095_v12, %s2735_s20  ;;  %v1231_v12 = vrot.slane %v1229_v18, 5 }
 0x1f5   : > { %1616 = vst.msk [vmem:[#allocation2 + $0x48] sm:$0xf] %vm1597_vm13, %v1538_v31  ;;  %v1787_v31 = vsel %vm3243_vm6, %v2585_v19, %v1786_v60 }
 0x1f6   : > { %1136 = vrot.lane.b32.xlu0 %v3112_v51, %s2735_s20  ;;  %v1689_v38 = vpop.permute.xlu1 %1688  ;;  %v4059_v44 = vsel %vm2824_vm3, %v1227_v32, %v1231_v12 }
 0x1f7   : > { %1768 = vst.msk [vmem:[#allocation2 + $0x44] sm:$0xf] %vm1750_vm14, %v1689_v38 }
 0x1f8   : > { %v1687_v24 = vpop.permute.xlu0 %1686  ;;  %1142 = vrot.lane.b32.xlu1 %v4017_v61, %s2735_s20 }
 0x1f9   : > { %1767 = vst.msk [vmem:[#allocation2 + $0x40] sm:$0xf] %vm1750_vm14, %v1687_v24 }
 0x1fa   : > { %1140 = vrot.lane.b32.xlu0 %v4021_v53, %s2735_s20  ;;  %v1693_v22 = vpop.permute.xlu1 %1692 }
 0x1fb   : > { %1770 = vst.msk [vmem:[#allocation2 + $0x4c] sm:$0xf] %vm1750_vm14, %v1693_v22 }
 0x1fc   : > { %v1691_v51 = vpop.permute.xlu0 %1690  ;;  %1291 = vrot.lane.b32.xlu1 %v4515_v37, %s2736_s21 }
 0x1fd   : > { %1769 = vst.msk [vmem:[#allocation2 + $0x48] sm:$0xf] %vm1750_vm14, %v1691_v51 }
 0x1fe   : > { %1289 = vrot.lane.b32.xlu0 %v4516_v13, %s2736_s21  ;;  %v1826_v11 = vpop.permute.xlu1 %1825  ;;  %v1648_v13 = vrot.slane %v1647_v14, 4 }
 0x1ff   : > { %1905 = vst.msk [vmem:[#allocation2 + $0x44] sm:$0xf] %vm1887_vm15, %v1826_v11 }
 0x200   : > { %v1824_v62 = vpop.permute.xlu0 %1823  ;;  %1295 = vrot.lane.b32.xlu1 %v4059_v44, %s2736_s21  ;;  %v1653_v58 = vsel %vm2824_vm3, %v1648_v13, %v1652_v0  ;;  %vm2439_vm3 = vcmask 58368  }
 0x201   : > { %1904 = vst.msk [vmem:[#allocation2 + $0x40] sm:$0xf] %vm1887_vm15, %v1824_v62 }
 0x202   : > { %1293 = vrot.lane.b32.xlu0 %v1222_v27, %s2736_s21  ;;  %v1830_v17 = vpop.permute.xlu1 %1829 }
 0x203   : > { %1907 = vst.msk [vmem:[#allocation2 + $0x4c] sm:$0xf] %vm1887_vm15, %v1830_v17 }
 0x204   : > { %v1828_v43 = vpop.permute.xlu0 %1827  ;;  %1428 = vrot.lane.b32.xlu1 %v3495_v7, %s2737_s22 }
 0x205   : > { %1906 = vst.msk [vmem:[#allocation2 + $0x48] sm:$0xf] %vm1887_vm15, %v1828_v43 }
 0x206   : > { %1426 = vrot.lane.b32.xlu0 %v3499_v48, %s2737_s22  ;;  %v1123_v21 = vpop.permute.xlu1 %1122 }
 0x207   : > { %1198 = vst.msk [vmem:[#allocation2 + $0x54] sm:$0xf] %vm1176_vm10, %v1123_v21 }
 0x208   : > { %v1121_v7 = vpop.permute.xlu0 %1120  ;;  %v2717_v48 = vld [vmem:[#allocation2 + $0x40] sm:$0xff]   ;;  %1432 = vrot.lane.b32.xlu1 %v1369_v39, %s2737_s22 }
 0x209   : > { %1197 = vst.msk [vmem:[#allocation2 + $0x50] sm:$0xf] %vm1176_vm10, %v1121_v7  ;;  %2665 = vmatprep.mubr.msk.bf16.mxu1 %vm2052_vm0, %v2717_v48 }
 0x20a   : > { %1430 = vrot.lane.b32.xlu0 %v1366_v45, %s2737_s22  ;;  %v1127_v49 = vpop.permute.xlu1 %1126 }
 0x20b   : > { %1200 = vst.msk [vmem:[#allocation2 + $0x5c] sm:$0xf] %vm1176_vm10, %v1127_v49 }
 0x20c   : > { %v1125_v47 = vpop.permute.xlu0 %1124  ;;  %v2718_v59 = vld [vmem:[#allocation2 + $0x48] sm:$0xff]   ;;  %1559 = vrot.lane.b32.xlu1 %v4017_v61, %s2738_s23 }
 0x20d   : > { %1199 = vst.msk [vmem:[#allocation2 + $0x58] sm:$0xf] %vm1176_vm10, %v1125_v47  ;;  %2666 = vmatmul.mubr.msk.bf16.vlgmr.msra.gmra.mxu1 %vm2052_vm0, %v2718_v59 }
 0x20e   : > { %1557 = vrot.lane.b32.xlu0 %v4021_v53, %s2738_s23  ;;  %v1276_v28 = vpop.permute.xlu1 %1275 }
 0x20f   : > { %1351 = vst.msk [vmem:[#allocation2 + $0x54] sm:$0xf] %vm1329_vm11, %v1276_v28 }
 0x210   : > { %v1274_v37 = vpop.permute.xlu0 %1273  ;;  %1563 = vrot.lane.b32.xlu1 %v4071_v36, %s2738_s23 }
 0x211   : > { %1350 = vst.msk [vmem:[#allocation2 + $0x50] sm:$0xf] %vm1329_vm11, %v1274_v37 }
 0x212   : > { %1561 = vrot.lane.b32.xlu0 %v4075_v3, %s2738_s23  ;;  %v1280_v61 = vpop.permute.xlu1 %1279 }
 0x213   : > { %1353 = vst.msk [vmem:[#allocation2 + $0x5c] sm:$0xf] %vm1329_vm11, %v1280_v61 }
 0x214   : > { %v1278_v53 = vpop.permute.xlu0 %1277  ;;  %1712 = vrot.lane.b32.xlu1 %v4059_v44, %s2739_s26 }
 0x215   : > { %1352 = vst.msk [vmem:[#allocation2 + $0x58] sm:$0xf] %vm1329_vm11, %v1278_v53 }
 0x216   : > { %1710 = vrot.lane.b32.xlu0 %v1222_v27, %s2739_s26  ;;  %v1413_v20 = vpop.permute.xlu1 %1412 }
 0x217   : > { %1488 = vst.msk [vmem:[#allocation2 + $0x54] sm:$0xf] %vm1466_vm12, %v1413_v20 }
 0x218   : > { %v1411_v50 = vpop.permute.xlu0 %1410  ;;  %1716 = vrot.lane.b32.xlu1 %v1653_v58, %s2739_s26 }
 0x219   : > { %1487 = vst.msk [vmem:[#allocation2 + $0x50] sm:$0xf] %vm1466_vm12, %v1411_v50 }
 0x21a   : > { %1714 = vrot.lane.b32.xlu0 %v1643_v5, %s2739_s26  ;;  %v1417_v23 = vpop.permute.xlu1 %1416 }
 0x21b   : > { %1490 = vst.msk [vmem:[#allocation2 + $0x5c] sm:$0xf] %vm1466_vm12, %v1417_v23 }
 0x21c   : > { %v1415_v10 = vpop.permute.xlu0 %1414  ;;  %1849 = vrot.lane.b32.xlu1 %v1369_v39, %s2740_s4 }
 0x21d   : > { %1489 = vst.msk [vmem:[#allocation2 + $0x58] sm:$0xf] %vm1466_vm12, %v1415_v10 }
 0x21e   : > { %1847 = vrot.lane.b32.xlu0 %v1366_v45, %s2740_s4  ;;  %v1544_v46 = vpop.permute.xlu1 %1543 }
 0x21f   : > { %1619 = vst.msk [vmem:[#allocation2 + $0x54] sm:$0xf] %vm1597_vm13, %v1544_v46 }
 0x220   : > { %v1542_v6 = vpop.permute.xlu0 %1541  ;;  %1853 = vrot.lane.b32.xlu1 %v1790_v52, %s2740_s4 }
 0x221   : > { %1618 = vst.msk [vmem:[#allocation2 + $0x50] sm:$0xf] %vm1597_vm13, %v1542_v6 }
 0x222   : > { %1851 = vrot.lane.b32.xlu0 %v1787_v31, %s2740_s4  ;;  %v1548_v18 = vpop.permute.xlu1 %1547 }
 0x223   : > { %1621 = vst.msk [vmem:[#allocation2 + $0x5c] sm:$0xf] %vm1597_vm13, %v1548_v18 }
 0x224   : > { %v1546_v38 = vpop.permute.xlu0 %1545 }
 0x225   : > { %1620 = vst.msk [vmem:[#allocation2 + $0x58] sm:$0xf] %vm1597_vm13, %v1546_v38 }
 0x226   : > { %v1697_v33 = vpop.permute.xlu1 %1696 }
 0x227   : > { %1772 = vst.msk [vmem:[#allocation2 + $0x54] sm:$0xf] %vm1750_vm14, %v1697_v33 }
 0x228   : > { %v1695_v63 = vpop.permute.xlu0 %1694 }
 0x229   : > { %1771 = vst.msk [vmem:[#allocation2 + $0x50] sm:$0xf] %vm1750_vm14, %v1695_v63  ;;  %v2651_v24 = vpop.f32.mrf.mxu0 }
 0x22a   : > { %2443 = vst.msk [vmem:[%s4143_s8 + $0x10] sm:$0xff] %vm2266_vm1, %v2651_v24  ;;  %v1701_v32 = vpop.permute.xlu1 %1700  ;;  %v2338_v11 = vmul.f32 %v2651_v24, %v2651_v24  ;;  %v2270_v17 = vsel %vm2266_vm1, %v2651_v24, 0.0 }
 0x22b   : > { %1774 = vst.msk [vmem:[#allocation2 + $0x5c] sm:$0xf] %vm1750_vm14, %v1701_v32  ;;  %v2139_v22 = vpop.f32.mrf.mxu0 }
 0x22c   : > { %v1699_v12 = vpop.permute.xlu0 %1698  ;;  %2441 = vst.msk [vmem:[%s4143_s8] sm:$0xff] %vm2266_vm1, %v2139_v22  ;;  %v2336_v51 = vmul.f32 %v2139_v22, %v2139_v22  ;;  %v2267_v27 = vsel %vm2266_vm1, %v2139_v22, 0.0  ;;  %v2371_v21 = vsel %vm2266_vm1, %v2338_v11, 0.0 }
 0x22d   : > { %1773 = vst.msk [vmem:[#allocation2 + $0x58] sm:$0xf] %vm1750_vm14, %v1699_v12  ;;  %v2652_v4 = vpop.f32.mrf.mxu0 }
 0x22e   : > { %2444 = vst.msk [vmem:[%s4143_s8 + $0x18] sm:$0xff] %vm2266_vm1, %v2652_v4  ;;  %v1834_v26 = vpop.permute.xlu1 %1833  ;;  %v2368_v30 = vsel %vm2266_vm1, %v2336_v51, 0.0  ;;  %v2339_v36 = vmul.f32 %v2652_v4, %v2652_v4  ;;  %v2272_v45 = vsel %vm2266_vm1, %v2652_v4, 0.0 }
 0x22f   : > { %1909 = vst.msk [vmem:[#allocation2 + $0x54] sm:$0xf] %vm1887_vm15, %v1834_v26  ;;  %v2142_v29 = vpop.f32.mrf.mxu0 }
 0x230   : > { %v1832_v44 = vpop.permute.xlu0 %1831  ;;  %v2268_v62 = vsel %vm2266_vm1, %v2142_v29, 0.0  ;;  %v2337_v15 = vmul.f32 %v2142_v29, %v2142_v29  ;;  %2442 = vst.msk [vmem:[%s4143_s8 + $0x8] sm:$0xff] %vm2266_vm1, %v2142_v29  ;;  %v2373_v7 = vsel %vm2266_vm1, %v2339_v36, 0.0 }
 0x231   : > { %1908 = vst.msk [vmem:[#allocation2 + $0x50] sm:$0xf] %vm1887_vm15, %v1832_v44  ;;  %v2269_v42 = vadd.f32 %v2268_v62, %v2267_v27 }
 0x232   : > { %v2369_v43 = vsel %vm2266_vm1, %v2337_v15, 0.0  ;;  %v1838_v3 = vpop.permute.xlu1 %1837 }
 0x233   : > { %v2271_v39 = vadd.f32 %v2270_v17, %v2269_v42  ;;  %v2370_v55 = vadd.f32 %v2369_v43, %v2368_v30  ;;  %1911 = vst.msk [vmem:[#allocation2 + $0x5c] sm:$0xf] %vm1887_vm15, %v1838_v3 }
 0x234   : > { %v1836_v34 = vpop.permute.xlu0 %1835 }
 0x235   : > { %1910 = vst.msk [vmem:[#allocation2 + $0x58] sm:$0xf] %vm1887_vm15, %v1836_v34  ;;  %v2372_v2 = vadd.f32 %v2371_v21, %v2370_v55  ;;  %v2273_v54 = vadd.f32 %v2272_v45, %v2271_v39 }
 0x236   : > { %v1131_v48 = vpop.permute.xlu1 %1130 }
 0x237   : > { %1202 = vst.msk [vmem:[#allocation2 + $0x64] sm:$0xf] %vm1176_vm10, %v1131_v48  ;;  %v2374_v49 = vadd.f32 %v2373_v7, %v2372_v2 }
 0x238   : > { %v1129_v40 = vpop.permute.xlu0 %1128  ;;  %v2719_v56 = vld [vmem:[#allocation2 + $0x50] sm:$0xff]  }
 0x239   : > { %1201 = vst.msk [vmem:[#allocation2 + $0x60] sm:$0xf] %vm1176_vm10, %v1129_v40  ;;  %2669 = vmatprep.mubr.msk.bf16.mxu1 %vm2052_vm0, %v2719_v56 }
 0x23a   : > { %v1135_v9 = vpop.permute.xlu1 %1134 }
 0x23b   : > { %1204 = vst.msk [vmem:[#allocation2 + $0x6c] sm:$0xf] %vm1176_vm10, %v1135_v9 }
 0x23c   : > { %v1133_v35 = vpop.permute.xlu0 %1132  ;;  %v2720_v57 = vld [vmem:[#allocation2 + $0x58] sm:$0xff]  }
 0x23d   : > { %1203 = vst.msk [vmem:[#allocation2 + $0x68] sm:$0xf] %vm1176_vm10, %v1133_v35  ;;  %2670 = vmatmul.mubr.msk.bf16.gmra.mxu1 %vm2052_vm0, %v2720_v57 }
 0x23e   : > { %v1284_v47 = vpop.permute.xlu1 %1283 }
 0x23f   : > { %1355 = vst.msk [vmem:[#allocation2 + $0x64] sm:$0xf] %vm1329_vm11, %v1284_v47 }
 0x240   : > { %v1282_v59 = vpop.permute.xlu0 %1281 }
 0x241   : > { %1354 = vst.msk [vmem:[#allocation2 + $0x60] sm:$0xf] %vm1329_vm11, %v1282_v59 }
 0x242   : > { %v1288_v14 = vpop.permute.xlu1 %1287 }
 0x243   : > { %1357 = vst.msk [vmem:[#allocation2 + $0x6c] sm:$0xf] %vm1329_vm11, %v1288_v14 }
 0x244   : > { %v1286_v8 = vpop.permute.xlu0 %1285 }
 0x245   : > { %1356 = vst.msk [vmem:[#allocation2 + $0x68] sm:$0xf] %vm1329_vm11, %v1286_v8 }
 0x246   : > { %v1421_v28 = vpop.permute.xlu1 %1420 }
 0x247   : > { %1492 = vst.msk [vmem:[#allocation2 + $0x64] sm:$0xf] %vm1466_vm12, %v1421_v28 }
 0x248   : > { %v1419_v25 = vpop.permute.xlu0 %1418 }
 0x249   : > { %1491 = vst.msk [vmem:[#allocation2 + $0x60] sm:$0xf] %vm1466_vm12, %v1419_v25 }
 0x24a   : > { %v1425_v37 = vpop.permute.xlu1 %1424 }
 0x24b   : > { %1494 = vst.msk [vmem:[#allocation2 + $0x6c] sm:$0xf] %vm1466_vm12, %v1425_v37 }
 0x24c   : > { %v1423_v13 = vpop.permute.xlu0 %1422 }
 0x24d   : > { %1493 = vst.msk [vmem:[#allocation2 + $0x68] sm:$0xf] %vm1466_vm12, %v1423_v13 }
 0x24e   : > { %v1552_v0 = vpop.permute.xlu1 %1551 }
 0x24f   : > { %1623 = vst.msk [vmem:[#allocation2 + $0x64] sm:$0xf] %vm1597_vm13, %v1552_v0 }
 0x250   : > { %v1550_v61 = vpop.permute.xlu0 %1549 }
 0x251   : > { %1622 = vst.msk [vmem:[#allocation2 + $0x60] sm:$0xf] %vm1597_vm13, %v1550_v61  ;;  %v2655_v41 = vpop.f32.mrf.mxu0 }
 0x252   : > { %2447 = vst.msk [vmem:[%s4143_s8 + $0x30] sm:$0xff] %vm2266_vm1, %v2655_v41  ;;  %v1556_v53 = vpop.permute.xlu1 %1555  ;;  %v2342_v46 = vmul.f32 %v2655_v41, %v2655_v41  ;;  %v2278_v38 = vsel %vm2266_vm1, %v2655_v41, 0.0 }
 0x253   : > { %1625 = vst.msk [vmem:[#allocation2 + $0x6c] sm:$0xf] %vm1597_vm13, %v1556_v53  ;;  %v2155_v58 = vpop.f32.mrf.mxu0 }
 0x254   : > { %v1554_v60 = vpop.permute.xlu0 %1553  ;;  %v2274_v20 = vsel %vm2266_vm1, %v2155_v58, 0.0  ;;  %v2340_v5 = vmul.f32 %v2155_v58, %v2155_v58  ;;  %2445 = vst.msk [vmem:[%s4143_s8 + $0x20] sm:$0xff] %vm2266_vm1, %v2155_v58  ;;  %v2379_v4 = vsel %vm2266_vm1, %v2342_v46, 0.0 }
 0x255   : > { %1624 = vst.msk [vmem:[#allocation2 + $0x68] sm:$0xf] %vm1597_vm13, %v1554_v60  ;;  %v2275_v50 = vadd.f32 %v2274_v20, %v2273_v54  ;;  %v2656_v1 = vpop.f32.mrf.mxu0 }
 0x256   : > { %v2375_v16 = vsel %vm2266_vm1, %v2340_v5, 0.0  ;;  %2448 = vst.msk [vmem:[%s4143_s8 + $0x38] sm:$0xff] %vm2266_vm1, %v2656_v1  ;;  %v1705_v19 = vpop.permute.xlu1 %1704  ;;  %v2343_v33 = vmul.f32 %v2656_v1, %v2656_v1  ;;  %v2280_v51 = vsel %vm2266_vm1, %v2656_v1, 0.0 }
 0x257   : > { %v2376_v23 = vadd.f32 %v2375_v16, %v2374_v49  ;;  %1776 = vst.msk [vmem:[#allocation2 + $0x64] sm:$0xf] %vm1750_vm14, %v1705_v19  ;;  %v2158_v52 = vpop.f32.mrf.mxu0 }
 0x258   : > { %v1703_v10 = vpop.permute.xlu0 %1702  ;;  %v2276_v31 = vsel %vm2266_vm1, %v2158_v52, 0.0  ;;  %v2341_v6 = vmul.f32 %v2158_v52, %v2158_v52  ;;  %2446 = vst.msk [vmem:[%s4143_s8 + $0x28] sm:$0xff] %vm2266_vm1, %v2158_v52  ;;  %v2381_v29 = vsel %vm2266_vm1, %v2343_v33, 0.0 }
 0x259   : > { %1775 = vst.msk [vmem:[#allocation2 + $0x60] sm:$0xf] %vm1750_vm14, %v1703_v10  ;;  %v2277_v18 = vadd.f32 %v2276_v31, %v2275_v50 }
 0x25a   : > { %v2377_v63 = vsel %vm2266_vm1, %v2341_v6, 0.0  ;;  %v1709_v24 = vpop.permute.xlu1 %1708 }
 0x25b   : > { %v2279_v32 = vadd.f32 %v2278_v38, %v2277_v18  ;;  %v2378_v12 = vadd.f32 %v2377_v63, %v2376_v23  ;;  %1778 = vst.msk [vmem:[#allocation2 + $0x6c] sm:$0xf] %vm1750_vm14, %v1709_v24 }
 0x25c   : > { %v1707_v22 = vpop.permute.xlu0 %1706 }
 0x25d   : > { %1777 = vst.msk [vmem:[#allocation2 + $0x68] sm:$0xf] %vm1750_vm14, %v1707_v22  ;;  %v2380_v26 = vadd.f32 %v2379_v4, %v2378_v12  ;;  %v2281_v44 = vadd.f32 %v2280_v51, %v2279_v32 }
 0x25e   : > { %v1842_v11 = vpop.permute.xlu1 %1841 }
 0x25f   : > { %1913 = vst.msk [vmem:[#allocation2 + $0x64] sm:$0xf] %vm1887_vm15, %v1842_v11  ;;  %v2382_v62 = vadd.f32 %v2381_v29, %v2380_v26 }
 0x260   : > { %v1840_v27 = vpop.permute.xlu0 %1839 }
 0x261   : > { %1912 = vst.msk [vmem:[#allocation2 + $0x60] sm:$0xf] %vm1887_vm15, %v1840_v27 }
 0x262   : > { %v1846_v15 = vpop.permute.xlu1 %1845 }
 0x263   : > { %1915 = vst.msk [vmem:[#allocation2 + $0x6c] sm:$0xf] %vm1887_vm15, %v1846_v15 }
 0x264   : > { %v1844_v42 = vpop.permute.xlu0 %1843 }
 0x265   : > { %1914 = vst.msk [vmem:[#allocation2 + $0x68] sm:$0xf] %vm1887_vm15, %v1844_v42 }
 0x266   : > { %v1139_v17 = vpop.permute.xlu1 %1138 }
 0x267   : > { %1206 = vst.msk [vmem:[#allocation2 + $0x74] sm:$0xf] %vm1176_vm10, %v1139_v17 }
 0x268   : > { %v1137_v30 = vpop.permute.xlu0 %1136  ;;  %v2721_v36 = vld [vmem:[#allocation2 + $0x60] sm:$0xff]  }
 0x269   : > { %1205 = vst.msk [vmem:[#allocation2 + $0x70] sm:$0xf] %vm1176_vm10, %v1137_v30  ;;  %2673 = vmatprep.mubr.msk.bf16.mxu1 %vm2052_vm0, %v2721_v36 }
 0x26a   : > { %v1143_v43 = vpop.permute.xlu1 %1142 }
 0x26b   : > { %1208 = vst.msk [vmem:[#allocation2 + $0x7c] sm:$0xf] %vm1176_vm10, %v1143_v43 }
 0x26c   : > { %v1141_v3 = vpop.permute.xlu0 %1140  ;;  %v2722_v39 = vld [vmem:[#allocation2 + $0x68] sm:$0xff]  }
 0x26d   : > { %1207 = vst.msk [vmem:[#allocation2 + $0x78] sm:$0xf] %vm1176_vm10, %v1141_v3  ;;  %2674 = vmatmul.mubr.msk.bf16.gmra.mxu1 %vm2052_vm0, %v2722_v39 }
 0x26e   : > { %v1292_v55 = vpop.permute.xlu1 %1291 }
 0x26f   : > { %1359 = vst.msk [vmem:[#allocation2 + $0x74] sm:$0xf] %vm1329_vm11, %v1292_v55 }
 0x270   : > { %v1290_v34 = vpop.permute.xlu0 %1289 }
 0x271   : > { %1358 = vst.msk [vmem:[#allocation2 + $0x70] sm:$0xf] %vm1329_vm11, %v1290_v34 }
 0x272   : > { %v1296_v21 = vpop.permute.xlu1 %1295 }
 0x273   : > { %1361 = vst.msk [vmem:[#allocation2 + $0x7c] sm:$0xf] %vm1329_vm11, %v1296_v21 }
 0x274   : > { %v1294_v45 = vpop.permute.xlu0 %1293 }
 0x275   : > { %1360 = vst.msk [vmem:[#allocation2 + $0x78] sm:$0xf] %vm1329_vm11, %v1294_v45 }
 0x276   : > { %v1429_v2 = vpop.permute.xlu1 %1428 }
 0x277   : > { %1496 = vst.msk [vmem:[#allocation2 + $0x74] sm:$0xf] %vm1466_vm12, %v1429_v2 }
 0x278   : > { %v1427_v54 = vpop.permute.xlu0 %1426 }
 0x279   : > { %1495 = vst.msk [vmem:[#allocation2 + $0x70] sm:$0xf] %vm1466_vm12, %v1427_v54  ;;  %v2659_v7 = vpop.f32.mrf.mxu0 }
 0x27a   : > { %2451 = vst.msk [vmem:[%s4143_s8 + $0x50] sm:$0xff] %vm2266_vm1, %v2659_v7  ;;  %v1433_v48 = vpop.permute.xlu1 %1432  ;;  %v2346_v25 = vmul.f32 %v2659_v7, %v2659_v7  ;;  %v2286_v61 = vsel %vm2266_vm1, %v2659_v7, 0.0 }
 0x27b   : > { %1498 = vst.msk [vmem:[#allocation2 + $0x7c] sm:$0xf] %vm1466_vm12, %v1433_v48  ;;  %v2171_v56 = vpop.f32.mrf.mxu0 }
 0x27c   : > { %v1431_v40 = vpop.permute.xlu0 %1430  ;;  %v2282_v49 = vsel %vm2266_vm1, %v2171_v56, 0.0  ;;  %v2344_v9 = vmul.f32 %v2171_v56, %v2171_v56  ;;  %2449 = vst.msk [vmem:[%s4143_s8 + $0x40] sm:$0xff] %vm2266_vm1, %v2171_v56  ;;  %v2387_v50 = vsel %vm2266_vm1, %v2346_v25, 0.0 }
 0x27d   : > { %1497 = vst.msk [vmem:[#allocation2 + $0x78] sm:$0xf] %vm1466_vm12, %v1431_v40  ;;  %v2283_v35 = vadd.f32 %v2282_v49, %v2281_v44  ;;  %v2660_v57 = vpop.f32.mrf.mxu0 }
 0x27e   : > { %v2383_v47 = vsel %vm2266_vm1, %v2344_v9, 0.0  ;;  %2452 = vst.msk [vmem:[%s4143_s8 + $0x58] sm:$0xff] %vm2266_vm1, %v2660_v57  ;;  %v1560_v59 = vpop.permute.xlu1 %1559  ;;  %v2347_v41 = vmul.f32 %v2660_v57, %v2660_v57  ;;  %v2288_v1 = vsel %vm2266_vm1, %v2660_v57, 0.0 }
 0x27f   : > { %v2384_v14 = vadd.f32 %v2383_v47, %v2382_v62  ;;  %1627 = vst.msk [vmem:[#allocation2 + $0x74] sm:$0xf] %vm1597_vm13, %v1560_v59  ;;  %v2174_v28 = vpop.f32.mrf.mxu0 }
 0x280   : > { %v1558_v8 = vpop.permute.xlu0 %1557  ;;  %v2284_v37 = vsel %vm2266_vm1, %v2174_v28, 0.0  ;;  %v2345_v13 = vmul.f32 %v2174_v28, %v2174_v28  ;;  %2450 = vst.msk [vmem:[%s4143_s8 + $0x48] sm:$0xff] %vm2266_vm1, %v2174_v28  ;;  %v2389_v23 = vsel %vm2266_vm1, %v2347_v41, 0.0 }
 0x281   : > { %1626 = vst.msk [vmem:[#allocation2 + $0x70] sm:$0xf] %vm1597_vm13, %v1558_v8  ;;  %v2285_v0 = vadd.f32 %v2284_v37, %v2283_v35 }
 0x282   : > { %v2385_v53 = vsel %vm2266_vm1, %v2345_v13, 0.0  ;;  %v1564_v60 = vpop.permute.xlu1 %1563 }
 0x283   : > { %v2287_v58 = vadd.f32 %v2286_v61, %v2285_v0  ;;  %v2386_v20 = vadd.f32 %v2385_v53, %v2384_v14  ;;  %1629 = vst.msk [vmem:[#allocation2 + $0x7c] sm:$0xf] %vm1597_vm13, %v1564_v60 }
 0x284   : > { %v1562_v5 = vpop.permute.xlu0 %1561 }
 0x285   : > { %1628 = vst.msk [vmem:[#allocation2 + $0x78] sm:$0xf] %vm1597_vm13, %v1562_v5  ;;  %v2388_v16 = vadd.f32 %v2387_v50, %v2386_v20  ;;  %v2289_v19 = vadd.f32 %v2288_v1, %v2287_v58 }
 0x286   : > { %v1713_v10 = vpop.permute.xlu1 %1712 }
 0x287   : > { %1780 = vst.msk [vmem:[#allocation2 + $0x74] sm:$0xf] %vm1750_vm14, %v1713_v10  ;;  %v2390_v46 = vadd.f32 %v2389_v23, %v2388_v16 }
 0x288   : > { %v1711_v52 = vpop.permute.xlu0 %1710 }
 0x289   : > { %1779 = vst.msk [vmem:[#allocation2 + $0x70] sm:$0xf] %vm1750_vm14, %v1711_v52 }
 0x28a   : > { %v1717_v31 = vpop.permute.xlu1 %1716 }
 0x28b   : > { %1782 = vst.msk [vmem:[#allocation2 + $0x7c] sm:$0xf] %vm1750_vm14, %v1717_v31 }
 0x28c   : > { %v1715_v6 = vpop.permute.xlu0 %1714 }
 0x28d   : > { %1781 = vst.msk [vmem:[#allocation2 + $0x78] sm:$0xf] %vm1750_vm14, %v1715_v6 }
 0x28e   : > { %v1850_v18 = vpop.permute.xlu1 %1849 }
 0x28f   : > { %1917 = vst.msk [vmem:[#allocation2 + $0x74] sm:$0xf] %vm1887_vm15, %v1850_v18 }
 0x290   : > { %v1848_v38 = vpop.permute.xlu0 %1847 }
 0x291   : > { %1916 = vst.msk [vmem:[#allocation2 + $0x70] sm:$0xf] %vm1887_vm15, %v1848_v38 }
 0x292   : > { %v1854_v33 = vpop.permute.xlu1 %1853 }
 0x293   : > { %1919 = vst.msk [vmem:[#allocation2 + $0x7c] sm:$0xf] %vm1887_vm15, %v1854_v33 }
 0x294   : > { %v1852_v63 = vpop.permute.xlu0 %1851 }
 0x295   : > { %1918 = vst.msk [vmem:[#allocation2 + $0x78] sm:$0xf] %vm1887_vm15, %v1852_v63 }
 0x298   : > { %v2723_v24 = vld [vmem:[#allocation2 + $0x70] sm:$0xff]  }
 0x299   : > { %2677 = vmatprep.mubr.msk.bf16.mxu1 %vm2052_vm0, %v2723_v24 }
 0x29c   : > { %v2724_v32 = vld [vmem:[#allocation2 + $0x78] sm:$0xff]  }
 0x29d   : > { %2678 = vmatmul.mubr.msk.bf16.gmra.mxu1 %vm2052_vm0, %v2724_v32 }
 0x2a1   : > { %v2663_v12 = vpop.f32.mrf.mxu0 }
 0x2a2   : > { %2455 = vst.msk [vmem:[%s4143_s8 + $0x70] sm:$0xff] %vm2266_vm1, %v2663_v12  ;;  %v2350_v62 = vmul.f32 %v2663_v12, %v2663_v12  ;;  %v2294_v30 = vsel %vm2266_vm1, %v2663_v12, 0.0 }
 0x2a3   : > { %v2187_v22 = vpop.f32.mrf.mxu0 }
 0x2a4   : > { %v2290_v4 = vsel %vm2266_vm1, %v2187_v22, 0.0  ;;  %v2348_v51 = vmul.f32 %v2187_v22, %v2187_v22  ;;  %2453 = vst.msk [vmem:[%s4143_s8 + $0x60] sm:$0xff] %vm2266_vm1, %v2187_v22  ;;  %v2395_v55 = vsel %vm2266_vm1, %v2350_v62, 0.0 }
 0x2a5   : > { %v2291_v26 = vadd.f32 %v2290_v4, %v2289_v19  ;;  %v2664_v44 = vpop.f32.mrf.mxu0 }
 0x2a6   : > { %v2391_v29 = vsel %vm2266_vm1, %v2348_v51, 0.0  ;;  %2456 = vst.msk [vmem:[%s4143_s8 + $0x78] sm:$0xff] %vm2266_vm1, %v2664_v44  ;;  %v2351_v36 = vmul.f32 %v2664_v44, %v2664_v44  ;;  %v2296_v34 = vsel %vm2266_vm1, %v2664_v44, 0.0 }
 0x2a7   : > { %v2392_v11 = vadd.f32 %v2391_v29, %v2390_v46  ;;  %v2190_v27 = vpop.f32.mrf.mxu0 }
 0x2a8   : > { %v2292_v15 = vsel %vm2266_vm1, %v2190_v27, 0.0  ;;  %v2349_v42 = vmul.f32 %v2190_v27, %v2190_v27  ;;  %2454 = vst.msk [vmem:[%s4143_s8 + $0x68] sm:$0xff] %vm2266_vm1, %v2190_v27  ;;  %v2397_v2 = vsel %vm2266_vm1, %v2351_v36, 0.0 }
 0x2a9   : > { %v2293_v17 = vadd.f32 %v2292_v15, %v2291_v26 }
 0x2aa   : > { %v2393_v43 = vsel %vm2266_vm1, %v2349_v42, 0.0 }
 0x2ab   : > { %v2295_v3 = vadd.f32 %v2294_v30, %v2293_v17  ;;  %v2394_v39 = vadd.f32 %v2393_v43, %v2392_v11 }
 0x2ad   : > { %v2396_v21 = vadd.f32 %v2395_v55, %v2394_v39  ;;  %v2297_v45 = vadd.f32 %v2296_v34, %v2295_v3 }
 0x2af   : > { %v2398_v54 = vadd.f32 %v2397_v2, %v2396_v21 }
 0x2cd   : > { %v2667_v7 = vpop.f32.mrf.mxu1 }
 0x2ce   : > { %2459 = vst.msk [vmem:[%s4143_s8 + $0x90] sm:$0xff] %vm2266_vm1, %v2667_v7  ;;  %v2354_v59 = vmul.f32 %v2667_v7, %v2667_v7  ;;  %v2302_v25 = vsel %vm2266_vm1, %v2667_v7, 0.0 }
 0x2cf   : > { %v2203_v48 = vpop.f32.mrf.mxu1 }
 0x2d0   : > { %v2298_v40 = vsel %vm2266_vm1, %v2203_v48, 0.0  ;;  %v2352_v56 = vmul.f32 %v2203_v48, %v2203_v48  ;;  %2457 = vst.msk [vmem:[%s4143_s8 + $0x80] sm:$0xff] %vm2266_vm1, %v2203_v48  ;;  %v2403_v41 = vsel %vm2266_vm1, %v2354_v59, 0.0 }
 0x2d1   : > { %v2299_v49 = vadd.f32 %v2298_v40, %v2297_v45  ;;  %v2668_v9 = vpop.f32.mrf.mxu1 }
 0x2d2   : > { %v2399_v35 = vsel %vm2266_vm1, %v2352_v56, 0.0  ;;  %2460 = vst.msk [vmem:[%s4143_s8 + $0x98] sm:$0xff] %vm2266_vm1, %v2668_v9  ;;  %v2355_v37 = vmul.f32 %v2668_v9, %v2668_v9  ;;  %v2304_v53 = vsel %vm2266_vm1, %v2668_v9, 0.0 }
 0x2d3   : > { %v2400_v57 = vadd.f32 %v2399_v35, %v2398_v54  ;;  %v2206_v47 = vpop.f32.mrf.mxu1 }
 0x2d4   : > { %v2300_v14 = vsel %vm2266_vm1, %v2206_v47, 0.0  ;;  %v2353_v8 = vmul.f32 %v2206_v47, %v2206_v47  ;;  %2458 = vst.msk [vmem:[%s4143_s8 + $0x88] sm:$0xff] %vm2266_vm1, %v2206_v47  ;;  %v2405_v20 = vsel %vm2266_vm1, %v2355_v37, 0.0 }
 0x2d5   : > { %v2301_v28 = vadd.f32 %v2300_v14, %v2299_v49 }
 0x2d6   : > { %v2401_v13 = vsel %vm2266_vm1, %v2353_v8, 0.0 }
 0x2d7   : > { %v2303_v0 = vadd.f32 %v2302_v25, %v2301_v28  ;;  %v2402_v61 = vadd.f32 %v2401_v13, %v2400_v57 }
 0x2d9   : > { %v2404_v60 = vadd.f32 %v2403_v41, %v2402_v61  ;;  %v2305_v58 = vadd.f32 %v2304_v53, %v2303_v0 }
 0x2db   : > { %v2406_v5 = vadd.f32 %v2405_v20, %v2404_v60 }
 0x2fd   : > { %v2671_v50 = vpop.f32.mrf.mxu1 }
 0x2fe   : > { %2463 = vst.msk [vmem:[%s4143_s8 + $0xb0] sm:$0xff] %vm2266_vm1, %v2671_v50  ;;  %v2358_v6 = vmul.f32 %v2671_v50, %v2671_v50  ;;  %v2310_v63 = vsel %vm2266_vm1, %v2671_v50, 0.0 }
 0x2ff   : > { %v2219_v1 = vpop.f32.mrf.mxu1 }
 0x300   : > { %v2306_v16 = vsel %vm2266_vm1, %v2219_v1, 0.0  ;;  %v2356_v19 = vmul.f32 %v2219_v1, %v2219_v1  ;;  %2461 = vst.msk [vmem:[%s4143_s8 + $0xa0] sm:$0xff] %vm2266_vm1, %v2219_v1  ;;  %v2411_v4 = vsel %vm2266_vm1, %v2358_v6, 0.0 }
 0x301   : > { %v2307_v23 = vadd.f32 %v2306_v16, %v2305_v58  ;;  %v2672_v10 = vpop.f32.mrf.mxu1 }
 0x302   : > { %v2407_v52 = vsel %vm2266_vm1, %v2356_v19, 0.0  ;;  %2464 = vst.msk [vmem:[%s4143_s8 + $0xb8] sm:$0xff] %vm2266_vm1, %v2672_v10  ;;  %v2359_v24 = vmul.f32 %v2672_v10, %v2672_v10  ;;  %v2312_v51 = vsel %vm2266_vm1, %v2672_v10, 0.0 }
 0x303   : > { %v2408_v46 = vadd.f32 %v2407_v52, %v2406_v5  ;;  %v2222_v31 = vpop.f32.mrf.mxu1 }
 0x304   : > { %v2308_v18 = vsel %vm2266_vm1, %v2222_v31, 0.0  ;;  %v2357_v38 = vmul.f32 %v2222_v31, %v2222_v31  ;;  %2462 = vst.msk [vmem:[%s4143_s8 + $0xa8] sm:$0xff] %vm2266_vm1, %v2222_v31  ;;  %v2413_v29 = vsel %vm2266_vm1, %v2359_v24, 0.0 }
 0x305   : > { %v2309_v33 = vadd.f32 %v2308_v18, %v2307_v23 }
 0x306   : > { %v2409_v32 = vsel %vm2266_vm1, %v2357_v38, 0.0 }
 0x307   : > { %v2311_v12 = vadd.f32 %v2310_v63, %v2309_v33  ;;  %v2410_v22 = vadd.f32 %v2409_v32, %v2408_v46 }
 0x309   : > { %v2412_v26 = vadd.f32 %v2411_v4, %v2410_v22  ;;  %v2313_v44 = vadd.f32 %v2312_v51, %v2311_v12 }
 0x30b   : > { %v2414_v11 = vadd.f32 %v2413_v29, %v2412_v26 }
 0x32d   : > { %v2675_v27 = vpop.f32.mrf.mxu1 }
 0x32e   : > { %2467 = vst.msk [vmem:[%s4143_s8 + $0xd0] sm:$0xff] %vm2266_vm1, %v2675_v27  ;;  %v2362_v45 = vmul.f32 %v2675_v27, %v2675_v27  ;;  %v2318_v54 = vsel %vm2266_vm1, %v2675_v27, 0.0 }
 0x32f   : > { %v2235_v62 = vpop.f32.mrf.mxu1 }
 0x330   : > { %2465 = vst.msk [vmem:[%s4143_s8 + $0xc0] sm:$0xff] %vm2266_vm1, %v2235_v62  ;;  %v2360_v17 = vmul.f32 %v2235_v62, %v2235_v62  ;;  %v2314_v30 = vsel %vm2266_vm1, %v2235_v62, 0.0  ;;  %v2419_v40 = vsel %vm2266_vm1, %v2362_v45, 0.0 }
 0x331   : > { %v2676_v15 = vpop.f32.mrf.mxu1  ;;  %v2315_v39 = vadd.f32 %v2314_v30, %v2313_v44 }
 0x332   : > { %2468 = vst.msk [vmem:[%s4143_s8 + $0xd8] sm:$0xff] %vm2266_vm1, %v2676_v15  ;;  %v2415_v43 = vsel %vm2266_vm1, %v2360_v17, 0.0  ;;  %v2363_v56 = vmul.f32 %v2676_v15, %v2676_v15  ;;  %v2320_v35 = vsel %vm2266_vm1, %v2676_v15, 0.0 }
 0x333   : > { %v2238_v42 = vpop.f32.mrf.mxu1  ;;  %v2416_v34 = vadd.f32 %v2415_v43, %v2414_v11 }
 0x334   : > { %2466 = vst.msk [vmem:[%s4143_s8 + $0xc8] sm:$0xff] %vm2266_vm1, %v2238_v42  ;;  %v2361_v36 = vmul.f32 %v2238_v42, %v2238_v42  ;;  %v2316_v3 = vsel %vm2266_vm1, %v2238_v42, 0.0  ;;  %v2421_v8 = vsel %vm2266_vm1, %v2363_v56, 0.0 }
 0x335   : > { %v2317_v21 = vadd.f32 %v2316_v3, %v2315_v39 }
 0x336   : > { %v2417_v55 = vsel %vm2266_vm1, %v2361_v36, 0.0 }
 0x337   : > { %v2418_v2 = vadd.f32 %v2417_v55, %v2416_v34  ;;  %v2319_v7 = vadd.f32 %v2318_v54, %v2317_v21 }
 0x339   : > { %v2420_v49 = vadd.f32 %v2419_v40, %v2418_v2  ;;  %v2321_v59 = vadd.f32 %v2320_v35, %v2319_v7 }
 0x33b   : > { %v2422_v37 = vadd.f32 %v2421_v8, %v2420_v49 }
 0x35d   : > { %v2679_v48 = vpop.f32.mrf.mxu1 }
 0x35e   : > { %2471 = vst.msk [vmem:[%s4143_s8 + $0xf0] sm:$0xff] %vm2266_vm1, %v2679_v48  ;;  %v2366_v0 = vmul.f32 %v2679_v48, %v2679_v48  ;;  %v2326_v58 = vsel %vm2266_vm1, %v2679_v48, 0.0 }
 0x35f   : > { %v2251_v9 = vpop.f32.mrf.mxu1 }
 0x360   : > { %v2322_v57 = vsel %vm2266_vm1, %v2251_v9, 0.0  ;;  %v2364_v47 = vmul.f32 %v2251_v9, %v2251_v9  ;;  %2469 = vst.msk [vmem:[%s4143_s8 + $0xe0] sm:$0xff] %vm2266_vm1, %v2251_v9  ;;  %v2427_v16 = vsel %vm2266_vm1, %v2366_v0, 0.0 }
 0x361   : > { %v2680_v14 = vpop.f32.mrf.mxu1  ;;  %v2323_v25 = vadd.f32 %v2322_v57, %v2321_v59 }
 0x362   : > { %v2423_v28 = vsel %vm2266_vm1, %v2364_v47, 0.0  ;;  %2472 = vst.msk [vmem:[%s4143_s8 + $0xf8] sm:$0xff] %vm2266_vm1, %v2680_v14  ;;  %v2367_v20 = vmul.f32 %v2680_v14, %v2680_v14  ;;  %v2328_v19 = vsel %vm2266_vm1, %v2680_v14, 0.0 }
 0x363   : > { %v2254_v13 = vpop.f32.mrf.mxu1  ;;  %v2424_v53 = vadd.f32 %v2423_v28, %v2422_v37 }
 0x364   : > { %v2324_v61 = vsel %vm2266_vm1, %v2254_v13, 0.0  ;;  %v2365_v41 = vmul.f32 %v2254_v13, %v2254_v13  ;;  %2470 = vst.msk [vmem:[%s4143_s8 + $0xe8] sm:$0xff] %vm2266_vm1, %v2254_v13  ;;  %v2429_v52 = vsel %vm2266_vm1, %v2367_v20, 0.0 }
 0x365   : > { %v2325_v60 = vadd.f32 %v2324_v61, %v2323_v25 }
 0x366   : > { %v2425_v5 = vsel %vm2266_vm1, %v2365_v41, 0.0 }
 0x367   : > { %v2327_v50 = vadd.f32 %v2326_v58, %v2325_v60  ;;  %v2426_v1 = vadd.f32 %v2425_v5, %v2424_v53 }
 0x369   : > { %v2329_v23 = vadd.f32 %v2328_v19, %v2327_v50  ;;  %v2428_v10 = vadd.f32 %v2427_v16, %v2426_v1 }
 0x36b   : > { %v2330_v46 = vrot.slane %v2329_v23, 4  ;;  %v2430_v31 = vadd.f32 %v2429_v52, %v2428_v10 }
 0x36d   : > { %v2331_v6 = vadd.f32 %v2330_v46, %v2329_v23  ;;  %v2431_v18 = vrot.slane %v2430_v31, 4 }
 0x36f   : > { %v2332_v38 = vrot.slane %v2331_v6, 2  ;;  %v2432_v33 = vadd.f32 %v2431_v18, %v2430_v31 }
 0x371   : > { %v2333_v63 = vadd.f32 %v2332_v38, %v2331_v6  ;;  %v2433_v24 = vrot.slane %v2432_v33, 2 }
 0x373   : > { %v2334_v32 = vrot.slane %v2333_v63, 1  ;;  %v2434_v12 = vadd.f32 %v2433_v24, %v2432_v33 }
 0x375   : > { %v2435_v22 = vrot.slane %v2434_v12, 1  ;;  %v2335_v4 = vadd.f32 %v2334_v32, %v2333_v63 }
 0x377   : > { %v2436_v51 = vadd.f32 %v2435_v22, %v2434_v12 }
 0x379   : > { %v2438_v26 = vsel %vm2437_vm2, %v2335_v4, %v2436_v51 }
 0x37a   : > { %2440 = vst.msk [vmem:[%s181_s14] sm:$0x3] %vm2439_vm3, %v2438_v26 }
 0x37b PF: > { %s14_s12 = sadd.s32 1, %s2731_s12  }
 0x37c   : > { %p11_p4 = scmp.ge.s32.totalorder %s14_s12, 4  }
 0x37e   :  { %13 = sbr.rel (!%p11_p4) target bundleno = 1 (0x1), region = 70 }

// kernel: conv_block_forward.6
= control target key start
LH: loop header
LB: loop body
LE: loop exit
PB: predicated region body
PF: predicated region fallthrough
CT: control target
= control target key end

     0   :  { %s2791_s12 = smov 0   ;;  %s4377_s0 = inlined_call_operand.vmem [shape: bf16[2,18,18,8], index: 0, kind: input, shape index: {}]   ;;  %s4378_s1 = inlined_call_operand.vmem [shape: bf16[72,8], index: 1, kind: input, shape index: {}]   ;;  %s4379_s2 = inlined_call_operand.vmem [shape: f32[2,16,16,8], index: 2, kind: output, shape index: {0}]   ;;  %s4380_s3 = inlined_call_operand.vmem [shape: f32[2,2,8], index: 3, kind: output, shape index: {1}]  }
   0x1 LB: > { %s2575_s13 = sadd.s32 4294967295, %s2761_s12   ;;  %p2579_p0 = scmp.ge.s32.totalorder %s2761_s12, 1  ;;  %s2761_s12 = sphi %s2791_s12, %s14_s12  }
   0x2   : > { %p140_p1 = scmp.lt.s32.totalorder %s2761_s12, 3 }
   0x4   : > { %p141_p2 = pnand %p2579_p0, %p140_p1 }
   0x6   : > { %144 = sbr.rel (%p141_p2) target bundleno = 891 (0x37b), region = 28 }
   0xb   : > { %p168_p3 = scmp.lt.s32.totalorder %s2575_s13, 1  ;;  %vm237_vm0 = vcmask 60416   ;;  %vm270_vm1 = vsmask.f32 3328  ;;  %vm271_vm2 = vsmask.f32 7440 }
   0xc   : > { %vm2854_vm3 = vmor %vm270_vm1, %vm271_vm2  ;;  %v4463_v28 = vmov 0  ;;  %s2763_s18 = smov 8   ;;  %vm834_vm4 = vcmask 1042432   ;;  %vm835_vm5 = vcmask 1046532   ;;  %s2764_s19 = smov 16   ;;  %vm753_vm7 = vcmask 126016  }
   0xd   : > { %s4555_s13 = smov (!%p168_p3, %s2575_s13), 1  ;;  %v4464_v28 = vsel %vm2854_vm3, 4294967295, %v4463_v28  ;;  %vm3273_vm6 = vmor %vm834_vm4, %vm835_vm5  ;;  %s2765_s20 = smov 24   ;;  %vm1045_vm8 = vcmask 191616   ;;  %vm2117_vm9 = vcmask 1043456   ;;  %vm1176_vm10 = vcmask 257216  }
   0xe   : > { %s2717_s14 = smul.u32 216, %s4555_s13  ;;  %4465 = vst [vmem:[#allocation3_spill] sm:$0xff] %v4464_v28  ;;  %s2766_s21 = smov 32   ;;  %vm1329_vm11 = vcmask 322816   ;;  %vm1466_vm12 = vcmask 388416   ;;  %vm1597_vm13 = vcmask 454016  }
   0xf   : > { %s2767_s22 = smov 40   ;;  %s2768_s25 = smov 48   ;;  %vm1750_vm14 = vcmask 519616   ;;  %vm1887_vm15 = vcmask 585216   ;;  %vm2282_vm1 = vcmask 64512   ;;  %vm2453_vm2 = vcmask 1040384  }
  0x10   : > { %s2805_s17 = scalar_lea.vmem %s4377_s0, %s2717_s14  ;;  %s2769_s30 = smov 56  }
  0x11   : > { %v2808_v0 = vld [vmem:[%s2805_s17 + $0xc] sm:$0xf]  ;;  %v2811_v1 = vld [vmem:[%s2805_s17 + $0x10] sm:$0xf]  ;;  %v2814_v2 = vld [vmem:[%s2805_s17] sm:$0xf] }
  0x12   : > { %v298_v3 = vshrl.u32 %v2808_v0, 16  ;;  %v301_v4 = vshll.u32 %v2808_v0, 16  ;;  %v307_v5 = vshll.u32 %v2811_v1, 16  ;;  %v2820_v6 = vld [vmem:[%s2805_s17 + $0x4] sm:$0xf]  ;;  %v274_v7 = vshrl.u32 %v2814_v2, 16 }
  0x13   : > { %240 = vst.msk [vmem:[#allocation2 + $0x8] sm:$0xf] %vm237_vm0, %v2808_v0  ;;  %238 = vst.msk [vmem:[#allocation2] sm:$0xf] %vm237_vm0, %v2814_v2  ;;  %v277_v8 = vshll.u32 %v2814_v2, 16  ;;  %v283_v9 = vshll.u32 %v2820_v6, 16 }
  0x14   : > { %241 = vst.msk [vmem:[#allocation2 + $0xc] sm:$0xf] %vm237_vm0, %v2811_v1  ;;  %v2832_v10 = vld [vmem:[%s2805_s17 + $0x14] sm:$0x1]  ;;  %v311_v11 = vshrl.u32 %v2811_v1, 16  ;;  %v287_v12 = vshrl.u32 %v2820_v6, 16 }
  0x15   : > { %239 = vst.msk [vmem:[#allocation2 + $0x4] sm:$0xf] %vm237_vm0, %v2820_v6  ;;  %v300_v13 = vrot.slane %v298_v3, 4  ;;  %v303_v14 = vrot.slane %v301_v4, 5  ;;  %v309_v15 = vrot.slane %v307_v5, 5  ;;  %v276_v16 = vrot.slane %v274_v7, 4 }
  0x16   : > { %v2839_v17 = vld [vmem:[%s2805_s17 + $0x8] sm:$0x1]  ;;  %v279_v18 = vrot.slane %v277_v8, 5  ;;  %v285_v19 = vrot.slane %v283_v9, 5  ;;  %v313_v20 = vrot.slane %v311_v11, 4  ;;  %v317_v21 = vshll.u32 %v2832_v10, 16 }
  0x17   : > { %v2843_v22 = vld [vmem:[%s2805_s17 + $0x1c] sm:$0xf]  ;;  %v304_v23 = vor.u32 %v303_v14, %v300_v13  ;;  %v289_v24 = vrot.slane %v287_v12, 4  ;;  %v293_v25 = vshll.u32 %v2839_v17, 16  ;;  %v2847_v26 = vld [vmem:[%s2805_s17 + $0x20] sm:$0x1] }
  0x18   : > { %v331_v27 = vshll.u32 %v2843_v22, 16  ;;  %243 = vst.msk [vmem:[#allocation2 + $0x14] sm:$0xf] %vm237_vm0, %v2843_v22  ;;  %v280_v29 = vor.u32 %v279_v18, %v276_v16  ;;  %v314_v30 = vor.u32 %v313_v20, %v309_v15  ;;  %v319_v31 = vrot.slane %v317_v21, 5  ;;  %v2860_v33 = vld [vmem:[%s2805_s17 + $0x18] sm:$0xf] }
  0x19   : > { %v335_v32 = vshrl.u32 %v2843_v22, 16  ;;  %v2863_v34 = vld [vmem:[%s2805_s17 + $0x28] sm:$0xf]  ;;  %v305_v35 = vrot.slane %v304_v23, 4  ;;  %v290_v36 = vor.u32 %v289_v24, %v285_v19  ;;  %v295_v37 = vrot.slane %v293_v25, 5  ;;  %s2770_s8 = smov 64  }
  0x1a   : > { %v333_v38 = vrot.slane %v331_v27, 5  ;;  %v2866_v39 = vld [vmem:[%s2805_s17 + $0x2c] sm:$0x1]  ;;  %242 = vst.msk [vmem:[#allocation2 + $0x10] sm:$0xf] %vm237_vm0, %v2860_v33  ;;  %v281_v40 = vrot.slane %v280_v29, 4 }
  0x1b   : > { %245 = vst.msk [vmem:[#allocation2 + $0x1c] sm:$0xf] %vm237_vm0, %v2863_v34  ;;  %v315_v41 = vrot.slane %v314_v30, 4  ;;  %v337_v42 = vrot.slane %v335_v32, 4  ;;  %v341_v43 = vshll.u32 %v2847_v26, 16  ;;  %v2878_v45 = vsel %vm2854_vm3, %v305_v35, %v309_v15  ;;  %s2641_s9 = sshll.u32 %s4555_s13, 8 }
  0x1c   : > { %v2874_v44 = vld [vmem:[%s2805_s17 + $0x24] sm:$0xf]  ;;  %4466 = vst [vmem:[#allocation4_spill] sm:$0xff] %v2878_v45  ;;  %v291_v46 = vrot.slane %v290_v36, 4  ;;  %v322_v47 = vshrl.u32 %v2860_v33, 16  ;;  %v325_v48 = vshll.u32 %v2860_v33, 16  ;;  %661 = vrot.lane.b32.xlu1 %v2878_v45, %s2763_s18  ;;  %v286_v50 = vsel %vm2854_vm3, %v281_v40, %v285_v19  ;;  %s4179_s14 = scalar_lea.vmem %s4379_s2, %s2641_s9 }
  0x1d   : > { %v2883_v49 = vld [vmem:[%s2805_s17 + $0x34] sm:$0xf]  ;;  %244 = vst.msk [vmem:[#allocation2 + $0x18] sm:$0xf] %vm237_vm0, %v2874_v44  ;;  %v2893_v51 = vsel %vm2854_vm3, %v315_v41, %v319_v31  ;;  %v338_v52 = vor.u32 %v337_v42, %v333_v38  ;;  %v343_v53 = vrot.slane %v341_v43, 5  ;;  %657 = vrot.lane.b32.xlu0 %v286_v50, %s2763_s18  ;;  %v355_v58 = vshll.u32 %v2863_v34, 16 }
  0x1e   : > { %4467 = vst [vmem:[#allocation5_spill] sm:$0xff] %v2893_v51  ;;  %v2896_v54 = vld [vmem:[%s2805_s17 + $0x30] sm:$0xf]  ;;  %247 = vst.msk [vmem:[#allocation2 + $0x24] sm:$0xf] %vm237_vm0, %v2883_v49  ;;  %v296_v55 = vsel %vm2854_vm3, %v291_v46, %v295_v37  ;;  %v324_v56 = vrot.slane %v322_v47, 4 }
  0x1f   : > { %v327_v57 = vrot.slane %v325_v48, 5  ;;  %v2905_v59 = vld [vmem:[%s2805_s17 + $0x40] sm:$0xf]  ;;  %246 = vst.msk [vmem:[#allocation2 + $0x20] sm:$0xf] %vm237_vm0, %v2896_v54  ;;  %v339_v60 = vrot.slane %v338_v52, 4 }
  0x20   : > { %v359_v61 = vshrl.u32 %v2863_v34, 16  ;;  %v365_v62 = vshll.u32 %v2866_v39, 16  ;;  %v346_v63 = vshrl.u32 %v2874_v44, 16  ;;  %v2913_v3 = vld [vmem:[%s2805_s17 + $0x38] sm:$0x1]  ;;  %v357_v5 = vrot.slane %v355_v58, 5  ;;  %663 = vrot.lane.b32.xlu1 %v2893_v51, %s2763_s18 }
  0x21   : > { %249 = vst.msk [vmem:[#allocation2 + $0x2c] sm:$0xf] %vm237_vm0, %v2905_v59  ;;  %v328_v4 = vor.u32 %v327_v57, %v324_v56  ;;  %v349_v7 = vshll.u32 %v2874_v44, 16  ;;  %v379_v8 = vshll.u32 %v2883_v49, 16  ;;  %v2920_v9 = vld [vmem:[%s2805_s17 + $0x3c] sm:$0xf]  ;;  %v2926_v11 = vsel %vm2854_vm3, %v339_v60, %v343_v53  ;;  %659 = vrot.lane.b32.xlu0 %v296_v55, %s2763_s18 }
  0x22   : > { %4468 = vst [vmem:[#allocation6_spill] sm:$0xff] %v2926_v11  ;;  %v361_v12 = vrot.slane %v359_v61, 4  ;;  %v367_v13 = vrot.slane %v365_v62, 5  ;;  %v348_v14 = vrot.slane %v346_v63, 4  ;;  %v2929_v15 = vld [vmem:[%s2805_s17 + $0x4c] sm:$0xf] }
  0x23   : > { %248 = vst.msk [vmem:[#allocation2 + $0x28] sm:$0xf] %vm237_vm0, %v2920_v9  ;;  %v329_v16 = vrot.slane %v328_v4, 4  ;;  %v351_v18 = vrot.slane %v349_v7, 5  ;;  %v381_v19 = vrot.slane %v379_v8, 5  ;;  %v383_v20 = vshrl.u32 %v2883_v49, 16 }
  0x24   : > { %251 = vst.msk [vmem:[#allocation2 + $0x34] sm:$0xf] %vm237_vm0, %v2929_v15  ;;  %v362_v21 = vor.u32 %v361_v12, %v357_v5  ;;  %v389_v23 = vshll.u32 %v2913_v3, 16  ;;  %v370_v24 = vshrl.u32 %v2896_v54, 16  ;;  %v373_v25 = vshll.u32 %v2896_v54, 16  ;;  %667 = vrot.lane.b32.xlu1 %v2926_v11, %s2763_s18  ;;  %s2583_s15 = sshll.u32 %s4555_s13, 1 }
  0x25   : > { %v2941_v27 = vld [vmem:[%s2805_s17 + $0x48] sm:$0xf]  ;;  %v2945_v29 = vsel %vm2854_vm3, %v329_v16, %v333_v38  ;;  %v352_v30 = vor.u32 %v351_v18, %v348_v14  ;;  %v385_v31 = vrot.slane %v383_v20, 4  ;;  %v2948_v32 = vld [vmem:[%s2805_s17 + $0x44] sm:$0x1]  ;;  %v403_v35 = vshll.u32 %v2905_v59, 16 }
  0x26   : > { %4469 = vst [vmem:[#allocation7_spill] sm:$0xff] %v2945_v29  ;;  %v2952_v36 = vld [vmem:[%s2805_s17 + $0x58] sm:$0xf]  ;;  %250 = vst.msk [vmem:[#allocation2 + $0x30] sm:$0xf] %vm237_vm0, %v2941_v27  ;;  %v363_v37 = vrot.slane %v362_v21, 4  ;;  %665 = vrot.lane.b32.xlu0 %v2945_v29, %s2763_s18 }
  0x27   : > { %v391_v40 = vrot.slane %v389_v23, 5  ;;  %v372_v38 = vrot.slane %v370_v24, 4  ;;  %v375_v41 = vrot.slane %v373_v25, 5  ;;  %v2959_v42 = vld [vmem:[%s2805_s17 + $0x54] sm:$0xf]  ;;  %v353_v43 = vrot.slane %v352_v30, 4 }
  0x28   : > { %253 = vst.msk [vmem:[#allocation2 + $0x3c] sm:$0xf] %vm237_vm0, %v2952_v36  ;;  %v386_v46 = vor.u32 %v385_v31, %v381_v19  ;;  %v2965_v47 = vrot.slane %v403_v35, 5  ;;  %v407_v48 = vshrl.u32 %v2905_v59, 16  ;;  %v2969_v50 = vld [vmem:[%s2805_s17 + $0x64] sm:$0xf]  ;;  %v2975_v52 = vsel %vm2854_vm3, %v363_v37, %v367_v13 }
  0x29   : > { %252 = vst.msk [vmem:[#allocation2 + $0x38] sm:$0xf] %vm237_vm0, %v2959_v42  ;;  %4470 = vst [vmem:[#allocation8_spill] sm:$0xff] %v2975_v52  ;;  %v376_v53 = vor.u32 %v375_v41, %v372_v38  ;;  %v413_v55 = vshll.u32 %v2948_v32, 16  ;;  %v394_v56 = vshrl.u32 %v2920_v9, 16  ;;  %v2989_v60 = vsel %vm2854_vm3, %v353_v43, %v357_v5  ;;  %671 = vrot.lane.b32.xlu1 %v2975_v52, %s2763_s18 }
  0x2a   : > { %v2980_v57 = vld [vmem:[%s2805_s17 + $0x50] sm:$0x1]  ;;  %v2983_v58 = vld [vmem:[%s2805_s17 + $0x60] sm:$0xf]  ;;  %255 = vst.msk [vmem:[#allocation2 + $0x44] sm:$0xf] %vm237_vm0, %v2969_v50  ;;  %669 = vrot.lane.b32.xlu0 %v2989_v60, %s2763_s18 }
  0x2b   : > { %4471 = vst [vmem:[#allocation9_spill] sm:$0xff] %v2989_v60  ;;  %v387_v61 = vrot.slane %v386_v46, 4  ;;  %v409_v62 = vrot.slane %v407_v48, 4  ;;  %v397_v63 = vshll.u32 %v2920_v9, 16  ;;  %v2993_v4 = vld [vmem:[%s2805_s17 + $0x70] sm:$0xf] }
  0x2c   : > { %254 = vst.msk [vmem:[#allocation2 + $0x40] sm:$0xf] %vm237_vm0, %v2983_v58  ;;  %v377_v7 = vrot.slane %v376_v53, 4  ;;  %v415_v8 = vrot.slane %v413_v55, 5  ;;  %v396_v12 = vrot.slane %v394_v56, 4  ;;  %v427_v5 = vshll.u32 %v2929_v15, 16 }
  0x2d   : > { %257 = vst.msk [vmem:[#allocation2 + $0x4c] sm:$0xf] %vm237_vm0, %v2993_v4  ;;  %v3006_v13 = vsel %vm2854_vm3, %v387_v61, %v391_v40  ;;  %v410_v14 = vor.u32 %v409_v62, %v2965_v47  ;;  %v399_v16 = vrot.slane %v397_v63, 5  ;;  %v431_v18 = vshrl.u32 %v2929_v15, 16  ;;  %v3011_v20 = vld [vmem:[%s2805_s17 + $0x6c] sm:$0xf] }
  0x2e   : > { %4472 = vst [vmem:[#allocation10_spill] sm:$0xff] %v3006_v13  ;;  %4473 = vst [vmem:[#allocation11_spill] sm:$0xff] %v3011_v20  ;;  %v3014_v21 = vld [vmem:[%s2805_s17 + $0x7c] sm:$0xf]  ;;  %v3018_v23 = vsel %vm2854_vm3, %v377_v7, %v381_v19  ;;  %v429_v24 = vrot.slane %v427_v5, 5  ;;  %v437_v25 = vshll.u32 %v2980_v57, 16  ;;  %675 = vrot.lane.b32.xlu1 %v3006_v13, %s2763_s18 }
  0x2f   : > { %4474 = vst [vmem:[#allocation12_spill] sm:$0xff] %v3018_v23  ;;  %v418_v30 = vshrl.u32 %v2941_v27, 16  ;;  %v3023_v31 = vld [vmem:[%s2805_s17 + $0x5c] sm:$0x1]  ;;  %256 = vst.msk [vmem:[#allocation2 + $0x48] sm:$0xf] %vm237_vm0, %v3011_v20  ;;  %v400_v37 = vor.u32 %v399_v16, %v396_v12  ;;  %673 = vrot.lane.b32.xlu0 %v3018_v23, %s2763_s18 }
  0x30   : > { %259 = vst.msk [vmem:[#allocation2 + $0x54] sm:$0xf] %vm237_vm0, %v3014_v21  ;;  %v411_v35 = vrot.slane %v410_v14, 4  ;;  %v433_v40 = vrot.slane %v431_v18, 4  ;;  %v421_v19 = vshll.u32 %v2941_v27, 16  ;;  %v439_v41 = vrot.slane %v437_v25, 5 }
  0x31   : > { %v3031_v38 = vld [vmem:[%s2805_s17 + $0x78] sm:$0xf]  ;;  %v420_v43 = vrot.slane %v418_v30, 4  ;;  %v451_v46 = vshll.u32 %v2952_v36, 16  ;;  %v455_v48 = vshrl.u32 %v2952_v36, 16  ;;  %v401_v56 = vrot.slane %v400_v37, 4 }
  0x32   : > { %4475 = vst [vmem:[#allocation13_spill] sm:$0xff] %v3031_v38  ;;  %v3038_v53 = vld [vmem:[%s2805_s17 + $0x88] sm:$0xf]  ;;  %258 = vst.msk [vmem:[#allocation2 + $0x50] sm:$0xf] %vm237_vm0, %v3031_v38  ;;  %v3046_v55 = vsel %vm2854_vm3, %v411_v35, %v415_v8  ;;  %v434_v61 = vor.u32 %v433_v40, %v429_v24  ;;  %v423_v62 = vrot.slane %v421_v19, 5 }
  0x33   : > { %4476 = vst [vmem:[#allocation14_spill] sm:$0xff] %v3046_v55  ;;  %v3049_v63 = vld [vmem:[%s2805_s17 + $0x84] sm:$0xf]  ;;  %261 = vst.msk [vmem:[#allocation2 + $0x5c] sm:$0xf] %vm237_vm0, %v3038_v53  ;;  %v453_v7 = vrot.slane %v451_v46, 5  ;;  %v3063_v8 = vsel %vm2854_vm3, %v401_v56, %v2965_v47  ;;  %679 = vrot.lane.b32.xlu1 %v3046_v55, %s2763_s18 }
  0x34   : > { %4477 = vst [vmem:[#allocation15_spill] sm:$0xff] %v3049_v63  ;;  %v457_v12 = vrot.slane %v455_v48, 4  ;;  %v461_v5 = vshll.u32 %v3023_v31, 16  ;;  %v442_v14 = vshrl.u32 %v2959_v42, 16  ;;  %v3056_v16 = vld [vmem:[%s2805_s17 + $0x94] sm:$0xf]  ;;  %v424_v25 = vor.u32 %v423_v62, %v420_v43  ;;  %677 = vrot.lane.b32.xlu0 %v3063_v8, %s2763_s18 }
  0x35   : > { %4478 = vst [vmem:[#allocation16_spill] sm:$0xff] %v3056_v16  ;;  %260 = vst.msk [vmem:[#allocation2 + $0x58] sm:$0xf] %vm237_vm0, %v3049_v63  ;;  %v435_v18 = vrot.slane %v434_v61, 4  ;;  %v445_v30 = vshll.u32 %v2959_v42, 16  ;;  %v475_v47 = vshll.u32 %v2969_v50, 16 }
  0x36   : > { %4479 = vst [vmem:[#allocation17_spill] sm:$0xff] %v3063_v8  ;;  %v3067_v35 = vld [vmem:[%s2805_s17 + $0x68] sm:$0x1]  ;;  %v3070_v37 = vld [vmem:[%s2805_s17 + $0x90] sm:$0xf]  ;;  %v458_v40 = vor.u32 %v457_v12, %v453_v7  ;;  %v463_v19 = vrot.slane %v461_v5, 5 }
  0x37   : > { %4480 = vst [vmem:[#allocation18_spill] sm:$0xff] %v3070_v37  ;;  %263 = vst.msk [vmem:[#allocation2 + $0x64] sm:$0xf] %vm237_vm0, %v3056_v16  ;;  %v444_v46 = vrot.slane %v442_v14, 4  ;;  %v3078_v48 = vld [vmem:[%s2805_s17 + $0xa0] sm:$0xf]  ;;  %v3086_v43 = vsel %vm2854_vm3, %v435_v18, %v439_v41 }
  0x38   : > { %4481 = vst [vmem:[#allocation19_spill] sm:$0xff] %v3078_v48  ;;  %262 = vst.msk [vmem:[#allocation2 + $0x60] sm:$0xf] %vm237_vm0, %v3070_v37  ;;  %v425_v56 = vrot.slane %v424_v25, 4  ;;  %v447_v61 = vrot.slane %v445_v30, 5  ;;  %v479_v62 = vshrl.u32 %v2969_v50, 16  ;;  %683 = vrot.lane.b32.xlu1 %v3086_v43, %s2763_s18 }
  0x39   : > { %4482 = vst [vmem:[#allocation20_spill] sm:$0xff] %v3086_v43  ;;  %265 = vst.msk [vmem:[#allocation2 + $0x6c] sm:$0xf] %vm237_vm0, %v3078_v48  ;;  %v459_v12 = vrot.slane %v458_v40, 4  ;;  %v477_v5 = vrot.slane %v475_v47, 5  ;;  %v485_v14 = vshll.u32 %v3067_v35, 16 }
  0x3a   : > { %v466_v55 = vshrl.u32 %v2983_v58, 16  ;;  %v3094_v8 = vld [vmem:[%s2805_s17 + $0x9c] sm:$0xf]  ;;  %v3098_v41 = vsel %vm2854_vm3, %v425_v56, %v429_v24  ;;  %v448_v18 = vor.u32 %v447_v61, %v444_v46  ;;  %v481_v25 = vrot.slane %v479_v62, 4  ;;  %v3102_v13 = vld [vmem:[%s2805_s17 + $0x74] sm:$0x1] }
  0x3b   : > { %4483 = vst [vmem:[#allocation21_spill] sm:$0xff] %v3094_v8  ;;  %4484 = vst [vmem:[#allocation22_spill] sm:$0xff] %v3098_v41  ;;  %v469_v30 = vshll.u32 %v2983_v58, 16  ;;  %v3105_v40 = vld [vmem:[%s2805_s17 + $0xac] sm:$0xf]  ;;  %v3113_v47 = vsel %vm2854_vm3, %v459_v12, %v463_v19  ;;  %v487_v24 = vrot.slane %v485_v14, 5  ;;  %681 = vrot.lane.b32.xlu0 %v3098_v41, %s2763_s18 }
  0x3c   : > { %4485 = vst [vmem:[#allocation23_spill] sm:$0xff] %v3102_v13  ;;  %4486 = vst [vmem:[#allocation24_spill] sm:$0xff] %v3105_v40  ;;  %v468_v46 = vrot.slane %v466_v55, 4  ;;  %v499_v56 = vshll.u32 %v2993_v4, 16  ;;  %v3117_v61 = vld [vmem:[%s2805_s17 + $0xa8] sm:$0xf]  ;;  %v482_v43 = vor.u32 %v481_v25, %v477_v5  ;;  %687 = vrot.lane.b32.xlu1 %v3113_v47, %s2763_s18 }
  0x3d   : > { %264 = vst.msk [vmem:[#allocation2 + $0x68] sm:$0xf] %vm237_vm0, %v3094_v8  ;;  %4487 = vst [vmem:[#allocation25_spill] sm:$0xff] %v3113_v47  ;;  %v449_v62 = vrot.slane %v448_v18, 4  ;;  %v471_v23 = vrot.slane %v469_v30, 5  ;;  %v503_v19 = vshrl.u32 %v2993_v4, 16 }
  0x3e   : > { %4488 = vst [vmem:[#allocation26_spill] sm:$0xff] %v3117_v61  ;;  %267 = vst.msk [vmem:[#allocation2 + $0x74] sm:$0xf] %vm237_vm0, %v3105_v40  ;;  %v3125_v12 = vld [vmem:[%s2805_s17 + $0xb8] sm:$0xf]  ;;  %v501_v55 = vrot.slane %v499_v56, 5 }
  0x3f   : > { %266 = vst.msk [vmem:[#allocation2 + $0x70] sm:$0xf] %vm237_vm0, %v3117_v61  ;;  %v509_v14 = vshll.u32 %v3102_v13, 16  ;;  %v490_v52 = vshrl.u32 %v3011_v20, 16  ;;  %v493_v60 = vshll.u32 %v3011_v20, 16  ;;  %v3136_v18 = vsel %vm2854_vm3, %v449_v62, %v453_v7 }
  0x40   : > { %269 = vst.msk [vmem:[#allocation2 + $0x7c] sm:$0xf] %vm237_vm0, %v3125_v12  ;;  %4489 = vst [vmem:[#allocation27_spill] sm:$0xff] %v3136_v18  ;;  %v483_v25 = vrot.slane %v482_v43, 4  ;;  %v472_v30 = vor.u32 %v471_v23, %v468_v46  ;;  %v505_v41 = vrot.slane %v503_v19, 4  ;;  %v523_v20 = vshll.u32 %v3014_v21, 16  ;;  %685 = vrot.lane.b32.xlu0 %v3136_v18, %s2763_s18 }
  0x41   : > { %v3139_v11 = vld [vmem:[%s2805_s17 + $0x80] sm:$0x1]  ;;  %v3142_v51 = vld [vmem:[%s2805_s17 + $0xb4] sm:$0xf]  ;;  %v511_v56 = vrot.slane %v509_v14, 5  ;;  %v492_v29 = vrot.slane %v490_v52, 4 }
  0x42   : > { %v495_v45 = vrot.slane %v493_v60, 5  ;;  %268 = vst.msk [vmem:[#allocation2 + $0x78] sm:$0xf] %vm237_vm0, %v3142_v51  ;;  %v3153_v23 = vsel %vm2854_vm3, %v483_v25, %v487_v24  ;;  %v473_v7 = vrot.slane %v472_v30, 4  ;;  %v506_v43 = vor.u32 %v505_v41, %v501_v55  ;;  %v3164_v24 = vld [vmem:[%s2805_s17 + $0x8c] sm:$0x1] }
  0x43   : > { %4490 = vst [vmem:[#allocation28_spill] sm:$0xff] %v3153_v23  ;;  %v527_v46 = vshrl.u32 %v3014_v21, 16  ;;  %v525_v52 = vrot.slane %v523_v20, 5  ;;  %v533_v60 = vshll.u32 %v3139_v11, 16  ;;  %v514_v19 = vshrl.u32 %v3031_v38, 16  ;;  %4492 = vst [vmem:[#allocation30_spill] sm:$0xff] %v3164_v24  ;;  %691 = vrot.lane.b32.xlu1 %v3153_v23, %s2763_s18 }
  0x44   : > { %v496_v62 = vor.u32 %v495_v45, %v492_v29  ;;  %v3160_v14 = vsel %vm2854_vm3, %v473_v7, %v477_v5  ;;  %v507_v47 = vrot.slane %v506_v43, 4  ;;  %v517_v13 = vshll.u32 %v3031_v38, 16 }
  0x45   : > { %4491 = vst [vmem:[#allocation29_spill] sm:$0xff] %v3160_v14  ;;  %v529_v18 = vrot.slane %v527_v46, 4  ;;  %v535_v45 = vrot.slane %v533_v60, 5  ;;  %v516_v29 = vrot.slane %v514_v19, 4  ;;  %v547_v20 = vshll.u32 %v3038_v53, 16  ;;  %689 = vrot.lane.b32.xlu0 %v3160_v14, %s2763_s18 }
  0x46   : > { %v497_v41 = vrot.slane %v496_v62, 4  ;;  %v3173_v5 = vsel %vm2854_vm3, %v507_v47, %v511_v56  ;;  %v519_v30 = vrot.slane %v517_v13, 5  ;;  %v551_v7 = vshrl.u32 %v3038_v53, 16  ;;  %v3184_v47 = vld [vmem:[%s2805_s17 + $0x98] sm:$0x1] }
  0x47   : > { %4493 = vst [vmem:[#allocation31_spill] sm:$0xff] %v3173_v5  ;;  %v530_v25 = vor.u32 %v529_v18, %v525_v52  ;;  %v549_v46 = vrot.slane %v547_v20, 5  ;;  %v557_v62 = vshll.u32 %v3164_v24, 16  ;;  %v538_v60 = vshrl.u32 %v3049_v63, 16  ;;  %695 = vrot.lane.b32.xlu1 %v3173_v5, %s2763_s18  ;;  %v3204_v24 = vld [vmem:[%s2805_s17 + $0xa4] sm:$0x1] }
  0x48   : > { %v3178_v43 = vsel %vm2854_vm3, %v497_v41, %v501_v55  ;;  %v520_v23 = vor.u32 %v519_v30, %v516_v29  ;;  %v553_v14 = vrot.slane %v551_v7, 4  ;;  %v541_v38 = vshll.u32 %v3049_v63, 16 }
  0x49   : > { %4494 = vst [vmem:[#allocation32_spill] sm:$0xff] %v3178_v43  ;;  %v531_v19 = vrot.slane %v530_v25, 4  ;;  %v559_v13 = vrot.slane %v557_v62, 5  ;;  %v540_v18 = vrot.slane %v538_v60, 4  ;;  %v571_v55 = vshll.u32 %v3056_v16, 16  ;;  %693 = vrot.lane.b32.xlu0 %v3178_v43, %s2763_s18 }
  0x4a   : > { %v575_v56 = vshrl.u32 %v3056_v16, 16  ;;  %v521_v29 = vrot.slane %v520_v23, 4  ;;  %v554_v20 = vor.u32 %v553_v14, %v549_v46  ;;  %v543_v25 = vrot.slane %v541_v38, 5 }
  0x4b   : > { %v3194_v41 = vsel %vm2854_vm3, %v531_v19, %v535_v45  ;;  %v573_v30 = vrot.slane %v571_v55, 5  ;;  %v581_v62 = vshll.u32 %v3184_v47, 16  ;;  %v562_v60 = vshrl.u32 %v3070_v37, 16 }
  0x4c   : > { %4495 = vst [vmem:[#allocation33_spill] sm:$0xff] %v3194_v41  ;;  %v577_v7 = vrot.slane %v575_v56, 4  ;;  %v3200_v5 = vsel %vm2854_vm3, %v521_v29, %v525_v52  ;;  %v555_v63 = vrot.slane %v554_v20, 4  ;;  %v544_v16 = vor.u32 %v543_v25, %v540_v18  ;;  %699 = vrot.lane.b32.xlu1 %v3194_v41, %s2763_s18 }
  0x4d   : > { %4496 = vst [vmem:[#allocation34_spill] sm:$0xff] %v3200_v5  ;;  %v565_v43 = vshll.u32 %v3070_v37, 16  ;;  %v583_v23 = vrot.slane %v581_v62, 5  ;;  %v564_v14 = vrot.slane %v562_v60, 4  ;;  %v595_v45 = vshll.u32 %v3078_v48, 16  ;;  %697 = vrot.lane.b32.xlu0 %v3200_v5, %s2763_s18 }
  0x4e   : > { %v578_v38 = vor.u32 %v577_v7, %v573_v30  ;;  %v3213_v52 = vsel %vm2854_vm3, %v555_v63, %v559_v13  ;;  %v545_v19 = vrot.slane %v544_v16, 4  ;;  %v599_v55 = vshrl.u32 %v3078_v48, 16  ;;  %v3224_v16 = vld [vmem:[%s2805_s17 + $0xb0] sm:$0x1] }
  0x4f   : > { %4497 = vst [vmem:[#allocation35_spill] sm:$0xff] %v3213_v52  ;;  %v567_v18 = vrot.slane %v565_v43, 5  ;;  %v597_v29 = vrot.slane %v595_v45, 5  ;;  %v605_v20 = vshll.u32 %v3204_v24, 16  ;;  %v586_v25 = vshrl.u32 %v3094_v8, 16 }
  0x50   : > { %v579_v56 = vrot.slane %v578_v38, 4  ;;  %v3220_v7 = vsel %vm2854_vm3, %v545_v19, %v549_v46  ;;  %v601_v60 = vrot.slane %v599_v55, 4  ;;  %v589_v63 = vshll.u32 %v3094_v8, 16  ;;  %703 = vrot.lane.b32.xlu1 %v3213_v52, %s2763_s18 }
  0x51   : > { %4498 = vst [vmem:[#allocation36_spill] sm:$0xff] %v3220_v7  ;;  %v568_v62 = vor.u32 %v567_v18, %v564_v14  ;;  %v607_v13 = vrot.slane %v605_v20, 5  ;;  %v588_v38 = vrot.slane %v586_v25, 4  ;;  %v619_v45 = vshll.u32 %v3105_v40, 16  ;;  %701 = vrot.lane.b32.xlu0 %v3220_v7, %s2763_s18  ;;  %v3244_v7 = vld [vmem:[%s2805_s17 + $0xbc] sm:$0x1] }
  0x52   : > { %v3230_v43 = vsel %vm2854_vm3, %v579_v56, %v583_v23  ;;  %v602_v14 = vor.u32 %v601_v60, %v597_v29  ;;  %v591_v19 = vrot.slane %v589_v63, 5  ;;  %v623_v18 = vshrl.u32 %v3105_v40, 16 }
  0x53   : > { %4499 = vst [vmem:[#allocation37_spill] sm:$0xff] %v3230_v43  ;;  %v569_v46 = vrot.slane %v568_v62, 4  ;;  %v621_v55 = vrot.slane %v619_v45, 5  ;;  %v629_v52 = vshll.u32 %v3224_v16, 16  ;;  %v610_v5 = vshrl.u32 %v3117_v61, 16 }
  0x54   : > { %v613_v23 = vshll.u32 %v3117_v61, 16  ;;  %v603_v20 = vrot.slane %v602_v14, 4  ;;  %v592_v25 = vor.u32 %v591_v19, %v588_v38  ;;  %v625_v41 = vrot.slane %v623_v18, 4  ;;  %707 = vrot.lane.b32.xlu1 %v3230_v43, %s2763_s18 }
  0x55   : > { %v3241_v56 = vsel %vm2854_vm3, %v569_v46, %v573_v30  ;;  %v631_v62 = vrot.slane %v629_v52, 5  ;;  %v612_v60 = vrot.slane %v610_v5, 4  ;;  %v643_v45 = vshll.u32 %v3125_v12, 16 }
  0x56   : > { %4500 = vst [vmem:[#allocation38_spill] sm:$0xff] %v3241_v56  ;;  %v615_v63 = vrot.slane %v613_v23, 5  ;;  %705 = vrot.lane.b32.xlu0 %v3241_v56, %s2763_s18  ;;  %v3253_v30 = vsel %vm2854_vm3, %v603_v20, %v607_v13  ;;  %v593_v46 = vrot.slane %v592_v25, 4  ;;  %v626_v38 = vor.u32 %v625_v41, %v621_v55 }
  0x57   : > { %4501 = vst [vmem:[#allocation39_spill] sm:$0xff] %v3253_v30  ;;  %v647_v14 = vshrl.u32 %v3125_v12, 16  ;;  %v645_v18 = vrot.slane %v643_v45, 5  ;;  %v653_v43 = vshll.u32 %v3244_v7, 16  ;;  %v634_v5 = vshrl.u32 %v3142_v51, 16 }
  0x58   : > { %v616_v19 = vor.u32 %v615_v63, %v612_v60  ;;  %v3260_v52 = vsel %vm2854_vm3, %v593_v46, %v597_v29  ;;  %v627_v23 = vrot.slane %v626_v38, 4  ;;  %v637_v61 = vshll.u32 %v3142_v51, 16  ;;  %711 = vrot.lane.b32.xlu1 %v3253_v30, %s2763_s18 }
  0x59   : > { %4502 = vst [vmem:[#allocation40_spill] sm:$0xff] %v3260_v52  ;;  %v649_v56 = vrot.slane %v647_v14, 4  ;;  %v655_v13 = vrot.slane %v653_v43, 5  ;;  %v636_v20 = vrot.slane %v634_v5, 4  ;;  %v839_v45 = vrot.slane %v2820_v6, 5 }
  0x5a   : > { %v617_v41 = vrot.slane %v616_v19, 4  ;;  %709 = vrot.lane.b32.xlu0 %v3260_v52, %s2763_s18  ;;  %v3269_v25 = vsel %vm2854_vm3, %v627_v23, %v631_v62  ;;  %v639_v29 = vrot.slane %v637_v61, 5  ;;  %v2584_v46 = vrot.slane %v2814_v2, 9 }
  0x5b   : > { %4503 = vst [vmem:[#allocation41_spill] sm:$0xff] %v3269_v25  ;;  %v650_v60 = vor.u32 %v649_v56, %v645_v18  ;;  %v842_v61 = vrot.slane %v2839_v17, 5  ;;  %v841_v62 = vrot.slane %v839_v45, 4  ;;  %v846_v2 = vrot.slane %v2811_v1, 5 }
  0x5c   : > { %v3280_v43 = vsel %vm2854_vm3, %v617_v41, %v621_v55  ;;  %v640_v14 = vor.u32 %v639_v29, %v636_v20  ;;  %715 = vrot.lane.b32.xlu1 %v3269_v25, %s2763_s18  ;;  %v840_v56 = vsel %vm3273_vm6, %v2584_v46, %v839_v45  ;;  %v849_v23 = vrot.slane %v2832_v10, 5  ;;  %v4513_v25 = vld [vmem:[#allocation16_spill] sm:$0xff] }
  0x5d   : > { %4506 = vst [vmem:[#allocation42_spill] sm:$0xff] %v3280_v43  ;;  %v651_v38 = vrot.slane %v650_v60, 4  ;;  %v843_v17 = vsel %vm3273_vm6, %v841_v62, %v842_v61  ;;  %v848_v5 = vrot.slane %v846_v2, 4  ;;  %v853_v41 = vrot.slane %v2843_v22, 5 }
  0x5e   : > { %713 = vrot.lane.b32.xlu0 %v3280_v43, %s2763_s18  ;;  %v641_v55 = vrot.slane %v640_v14, 4  ;;  %v856_v60 = vrot.slane %v2847_v26, 5  ;;  %v860_v29 = vrot.slane %v2863_v34, 5  ;;  %v2586_v45 = vrot.slane %v2860_v33, 9 }
  0x5f   : > { %v3292_v6 = vsel %vm2854_vm3, %v651_v38, %v655_v13  ;;  %v2585_v13 = vrot.slane %v2808_v0, 9  ;;  %v855_v20 = vrot.slane %v853_v41, 4  ;;  %v863_v26 = vrot.slane %v2866_v39, 5 }
  0x60   : > { %4507 = vst [vmem:[#allocation43_spill] sm:$0xff] %v3292_v6  ;;  %v3297_v19 = vsel %vm2854_vm3, %v641_v55, %v645_v18  ;;  %719 = vrot.lane.b32.xlu1 %v3292_v6, %s2763_s18  ;;  %v3312_v18 = vsel %vm3273_vm6, %v848_v5, %v849_v23  ;;  %v862_v38 = vrot.slane %v860_v29, 4  ;;  %v867_v14 = vrot.slane %v2883_v49, 5 }
  0x61   : > { %4508 = vst [vmem:[#allocation44_spill] sm:$0xff] %v3297_v19  ;;  %v3318_v10 = vsel %vm3273_vm6, %v2585_v13, %v846_v2  ;;  %v3327_v46 = vsel %vm3273_vm6, %v855_v20, %v856_v60  ;;  %v3333_v61 = vsel %vm3273_vm6, %v2586_v45, %v853_v41  ;;  %v870_v39 = vrot.slane %v2913_v3, 5 }
  0x62   : > { %717 = vrot.lane.b32.xlu0 %v3297_v19, %s2763_s18  ;;  %v3342_v55 = vsel %vm3273_vm6, %v862_v38, %v863_v26  ;;  %v869_v62 = vrot.slane %v867_v14, 4  ;;  %v874_v2 = vrot.slane %v2905_v59, 5  ;;  %v2588_v5 = vrot.slane %v2896_v54, 9  ;;  %s181_s18 = scalar_lea.vmem %s4380_s3, %s2583_s15 }
  0x63   : > { %v877_v3 = vrot.slane %v2948_v32, 5  ;;  %v881_v13 = vrot.slane %v2929_v15, 5  ;;  %v2589_v60 = vrot.slane %v2920_v9, 9  ;;  %v884_v32 = vrot.slane %v2980_v57, 5 }
  0x64   : > { %951 = vrot.lane.b32.xlu1 %v843_v17, %s2764_s19  ;;  %v3357_v23 = vsel %vm3273_vm6, %v869_v62, %v870_v39  ;;  %v876_v41 = vrot.slane %v874_v2, 4  ;;  %v3363_v20 = vsel %vm3273_vm6, %v2588_v5, %v867_v14  ;;  %v888_v38 = vrot.slane %v2952_v36, 5 }
  0x65   : > { %v883_v45 = vrot.slane %v881_v13, 4  ;;  %v3378_v26 = vsel %vm3273_vm6, %v2589_v60, %v874_v2  ;;  %v2590_v14 = vrot.slane %v2941_v27, 9  ;;  %v891_v57 = vrot.slane %v3023_v31, 5 }
  0x66   : > { %949 = vrot.lane.b32.xlu0 %v840_v56, %s2764_s19  ;;  %v2587_v56 = vrot.slane %v2874_v44, 9  ;;  %v890_v62 = vrot.slane %v888_v38, 4  ;;  %v895_v39 = vrot.slane %v2969_v50, 5  ;;  %v2591_v5 = vrot.slane %v2959_v42, 9 }
  0x67   : > { %v3393_v2 = vsel %vm3273_vm6, %v2590_v14, %v881_v13  ;;  %v898_v31 = vrot.slane %v3067_v35, 5  ;;  %v902_v60 = vrot.slane %v2993_v4, 5  ;;  %v4509_v35 = vld [vmem:[#allocation23_spill] sm:$0xff]  ;;  %v916_v19 = vrot.slane %v3038_v53, 5 }
  0x68   : > { %955 = vrot.lane.b32.xlu1 %v3312_v18, %s2764_s19  ;;  %v3348_v17 = vsel %vm3273_vm6, %v2587_v56, %v860_v29  ;;  %v3372_v29 = vsel %vm3273_vm6, %v876_v41, %v877_v3  ;;  %v3387_v56 = vsel %vm3273_vm6, %v883_v45, %v884_v32  ;;  %v3402_v41 = vsel %vm3273_vm6, %v890_v62, %v891_v57 }
  0x69   : > { %v897_v3 = vrot.slane %v895_v39, 4  ;;  %v3408_v13 = vsel %vm3273_vm6, %v2591_v5, %v888_v38  ;;  %v2592_v45 = vrot.slane %v2983_v58, 9  ;;  %v904_v14 = vrot.slane %v902_v60, 4  ;;  %v4510_v5 = vld [vmem:[#allocation11_spill] sm:$0xff] }
  0x6a   : > { %953 = vrot.lane.b32.xlu0 %v3318_v10, %s2764_s19  ;;  %v905_v62 = vrot.slane %v4509_v35, 5  ;;  %v909_v57 = vrot.slane %v3014_v21, 5  ;;  %v2593_v28 = vrot.slane %v4510_v5, 9  ;;  %v912_v35 = vrot.slane %v3139_v11, 5  ;;  %v4512_v11 = vld [vmem:[#allocation30_spill] sm:$0xff] }
  0x6b   : > { %v3417_v32 = vsel %vm3273_vm6, %v897_v3, %v898_v31  ;;  %v3423_v38 = vsel %vm3273_vm6, %v2592_v45, %v895_v39  ;;  %v4511_v45 = vld [vmem:[#allocation13_spill] sm:$0xff]  ;;  %v919_v43 = vrot.slane %v4512_v11, 5  ;;  %v923_v52 = vrot.slane %v4513_v25, 5 }
  0x6c   : > { %959 = vrot.lane.b32.xlu1 %v3327_v46, %s2764_s19  ;;  %v3432_v3 = vsel %vm3273_vm6, %v904_v14, %v905_v62  ;;  %v911_v31 = vrot.slane %v909_v57, 4  ;;  %v3438_v39 = vsel %vm3273_vm6, %v2593_v28, %v902_v60  ;;  %v2594_v6 = vrot.slane %v4511_v45, 9  ;;  %v4514_v60 = vld [vmem:[#allocation15_spill] sm:$0xff] }
  0x6d   : > { %v918_v62 = vrot.slane %v916_v19, 4  ;;  %v2595_v30 = vrot.slane %v4514_v60, 9  ;;  %v926_v11 = vrot.slane %v3184_v47, 5  ;;  %v930_v25 = vrot.slane %v3078_v48, 5 }
  0x6e   : > { %957 = vrot.lane.b32.xlu0 %v3333_v61, %s2764_s19  ;;  %v3447_v14 = vsel %vm3273_vm6, %v911_v31, %v912_v35  ;;  %v3453_v28 = vsel %vm3273_vm6, %v2594_v6, %v909_v57  ;;  %v925_v35 = vrot.slane %v923_v52, 4  ;;  %v2596_v57 = vrot.slane %v3070_v37, 9 }
  0x6f   : > { %v3462_v31 = vsel %vm3273_vm6, %v918_v62, %v919_v43  ;;  %v3468_v6 = vsel %vm3273_vm6, %v2595_v30, %v916_v19  ;;  %v932_v62 = vrot.slane %v930_v25, 4  ;;  %v933_v47 = vrot.slane %v3204_v24, 5 }
  0x70   : > { %963 = vrot.lane.b32.xlu1 %v3342_v55, %s2764_s19  ;;  %v3477_v43 = vsel %vm3273_vm6, %v925_v35, %v926_v11  ;;  %v937_v48 = vrot.slane %v3105_v40, 5  ;;  %v3483_v30 = vsel %vm3273_vm6, %v2596_v57, %v923_v52  ;;  %v2597_v19 = vrot.slane %v3094_v8, 9  ;;  %v4516_v8 = vld [vmem:[#allocation26_spill] sm:$0xff] }
  0x71   : > { %4515 = vst [vmem:[#allocation23_spill] sm:$0xff] %v3477_v43  ;;  %v3492_v35 = vsel %vm3273_vm6, %v932_v62, %v933_v47  ;;  %v940_v11 = vrot.slane %v3224_v16, 5  ;;  %v944_v40 = vrot.slane %v3125_v12, 5  ;;  %vm2068_vm0 = vcmask 588800  }
  0x72   : > { %961 = vrot.lane.b32.xlu0 %v3348_v17, %s2764_s19  ;;  %v939_v24 = vrot.slane %v937_v48, 4  ;;  %v3498_v57 = vsel %vm3273_vm6, %v2597_v19, %v930_v25  ;;  %v947_v25 = vrot.slane %v3244_v7, 5 }
  0x73   : > { %v946_v62 = vrot.slane %v944_v40, 4 }
  0x74   : > { %967 = vrot.lane.b32.xlu1 %v3357_v23, %s2764_s19  ;;  %v3509_v16 = vsel %vm3273_vm6, %v939_v24, %v940_v11 }
  0x75   : > { %v3525_v7 = vsel %vm3273_vm6, %v946_v62, %v947_v25 }
  0x76   : > { %965 = vrot.lane.b32.xlu0 %v3363_v20, %s2764_s19 }
  0x78   : > { %971 = vrot.lane.b32.xlu1 %v3372_v29, %s2764_s19 }
  0x7a   : > { %969 = vrot.lane.b32.xlu0 %v3378_v26, %s2764_s19 }
  0x7c   : > { %975 = vrot.lane.b32.xlu1 %v3387_v56, %s2764_s19 }
  0x7e   : > { %973 = vrot.lane.b32.xlu0 %v3393_v2, %s2764_s19 }
  0x80   : > { %979 = vrot.lane.b32.xlu1 %v3402_v41, %s2764_s19 }
  0x82   : > { %977 = vrot.lane.b32.xlu0 %v3408_v13, %s2764_s19 }
  0x84   : > { %983 = vrot.lane.b32.xlu1 %v3417_v32, %s2764_s19 }
  0x86   : > { %981 = vrot.lane.b32.xlu0 %v3423_v38, %s2764_s19 }
  0x88   : > { %987 = vrot.lane.b32.xlu1 %v3432_v3, %s2764_s19 }
  0x8a   : > { %985 = vrot.lane.b32.xlu0 %v3438_v39, %s2764_s19 }
  0x8c   : > { %991 = vrot.lane.b32.xlu1 %v3447_v14, %s2764_s19 }
  0x8e   : > { %989 = vrot.lane.b32.xlu0 %v3453_v28, %s2764_s19  ;;  %v662_v52 = vpop.permute.xlu1 %661 }
  0x8f   : > { %756 = vst.msk [vmem:[#allocation2 + $0x8] sm:$0xf] %vm753_vm7, %v662_v52  ;;  %v658_v37 = vpop.permute.xlu0 %657 }
  0x90   : > { %995 = vrot.lane.b32.xlu1 %v3462_v31, %s2764_s19  ;;  %754 = vst.msk [vmem:[#allocation2] sm:$0xf] %vm753_vm7, %v658_v37  ;;  %v2599_v37 = vrot.slane %v3142_v51, 9 }
  0x92   : > { %993 = vrot.lane.b32.xlu0 %v3468_v6, %s2764_s19  ;;  %v664_v47 = vpop.permute.xlu1 %663 }
  0x93   : > { %757 = vst.msk [vmem:[#allocation2 + $0xc] sm:$0xf] %vm753_vm7, %v664_v47  ;;  %v660_v52 = vpop.permute.xlu0 %659 }
  0x94   : > { %999 = vrot.lane.b32.xlu1 %v3477_v43, %s2764_s19  ;;  %v2598_v43 = vrot.slane %v4516_v8, 9  ;;  %755 = vst.msk [vmem:[#allocation2 + $0x4] sm:$0xf] %vm753_vm7, %v660_v52 }
  0x96   : > { %997 = vrot.lane.b32.xlu0 %v3483_v30, %s2764_s19  ;;  %v3514_v19 = vsel %vm3273_vm6, %v2598_v43, %v937_v48  ;;  %v668_v24 = vpop.permute.xlu1 %667  ;;  %v3529_v48 = vsel %vm3273_vm6, %v2599_v37, %v944_v40 }
  0x97   : > { %759 = vst.msk [vmem:[#allocation2 + $0x14] sm:$0xf] %vm753_vm7, %v668_v24 }
  0x98   : > { %1003 = vrot.lane.b32.xlu1 %v3492_v35, %s2764_s19  ;;  %v666_v43 = vpop.permute.xlu0 %665 }
  0x99   : > { %758 = vst.msk [vmem:[#allocation2 + $0x10] sm:$0xf] %vm753_vm7, %v666_v43 }
  0x9a   : > { %1001 = vrot.lane.b32.xlu0 %v3498_v57, %s2764_s19 }
  0x9b   : > { %v672_v11 = vpop.permute.xlu1 %671 }
  0x9c   : > { %1007 = vrot.lane.b32.xlu1 %v3509_v16, %s2764_s19  ;;  %761 = vst.msk [vmem:[#allocation2 + $0x1c] sm:$0xf] %vm753_vm7, %v672_v11  ;;  %v670_v62 = vpop.permute.xlu0 %669 }
  0x9d   : > { %760 = vst.msk [vmem:[#allocation2 + $0x18] sm:$0xf] %vm753_vm7, %v670_v62 }
  0x9e   : > { %1005 = vrot.lane.b32.xlu0 %v3514_v19, %s2764_s19 }
  0xa0   : > { %1011 = vrot.lane.b32.xlu1 %v3525_v7, %s2764_s19  ;;  %v676_v40 = vpop.permute.xlu1 %675 }
  0xa1   : > { %763 = vst.msk [vmem:[#allocation2 + $0x24] sm:$0xf] %vm753_vm7, %v676_v40  ;;  %v674_v25 = vpop.permute.xlu0 %673 }
  0xa2   : > { %1009 = vrot.lane.b32.xlu0 %v3529_v48, %s2764_s19  ;;  %762 = vst.msk [vmem:[#allocation2 + $0x20] sm:$0xf] %vm753_vm7, %v674_v25 }
  0xa4   : > { %1082 = vrot.lane.b32.xlu1 %v2811_v1, %s2765_s20 }
  0xa5   : > { %v680_v47 = vpop.permute.xlu1 %679 }
  0xa6   : > { %1080 = vrot.lane.b32.xlu0 %v2808_v0, %s2765_s20  ;;  %765 = vst.msk [vmem:[#allocation2 + $0x2c] sm:$0xf] %vm753_vm7, %v680_v47  ;;  %v678_v37 = vpop.permute.xlu0 %677 }
  0xa7   : > { %764 = vst.msk [vmem:[#allocation2 + $0x28] sm:$0xf] %vm753_vm7, %v678_v37 }
  0xa8   : > { %1086 = vrot.lane.b32.xlu1 %v2843_v22, %s2765_s20 }
  0xaa   : > { %1084 = vrot.lane.b32.xlu0 %v2860_v33, %s2765_s20  ;;  %v684_v0 = vpop.permute.xlu1 %683 }
  0xab   : > { %767 = vst.msk [vmem:[#allocation2 + $0x34] sm:$0xf] %vm753_vm7, %v684_v0 }
  0xac   : > { %1090 = vrot.lane.b32.xlu1 %v2863_v34, %s2765_s20 }
  0xad   : > { %v682_v1 = vpop.permute.xlu0 %681 }
  0xae   : > { %1088 = vrot.lane.b32.xlu0 %v2874_v44, %s2765_s20  ;;  %766 = vst.msk [vmem:[#allocation2 + $0x30] sm:$0xf] %vm753_vm7, %v682_v1  ;;  %v688_v52 = vpop.permute.xlu1 %687  ;;  %v4517_v1 = vld [vmem:[#allocation4_spill] sm:$0xff] }
  0xaf   : > { %769 = vst.msk [vmem:[#allocation2 + $0x3c] sm:$0xf] %vm753_vm7, %v688_v52 }
  0xb0   : > { %1094 = vrot.lane.b32.xlu1 %v2883_v49, %s2765_s20 }
  0xb2   : > { %1092 = vrot.lane.b32.xlu0 %v2896_v54, %s2765_s20  ;;  %v686_v24 = vpop.permute.xlu0 %685 }
  0xb3   : > { %768 = vst.msk [vmem:[#allocation2 + $0x38] sm:$0xf] %vm753_vm7, %v686_v24 }
  0xb4   : > { %1098 = vrot.lane.b32.xlu1 %v2905_v59, %s2765_s20 }
  0xb5   : > { %v692_v43 = vpop.permute.xlu1 %691 }
  0xb6   : > { %1096 = vrot.lane.b32.xlu0 %v2920_v9, %s2765_s20  ;;  %771 = vst.msk [vmem:[#allocation2 + $0x44] sm:$0xf] %vm753_vm7, %v692_v43  ;;  %v4518_v43 = vld [vmem:[#allocation7_spill] sm:$0xff] }
  0xb7   : > { %v690_v11 = vpop.permute.xlu0 %689 }
  0xb8   : > { %770 = vst.msk [vmem:[#allocation2 + $0x40] sm:$0xf] %vm753_vm7, %v690_v11  ;;  %1102 = vrot.lane.b32.xlu1 %v2929_v15, %s2765_s20  ;;  %v4519_v11 = vld [vmem:[#allocation5_spill] sm:$0xff] }
  0xb9   : > { %v696_v62 = vpop.permute.xlu1 %695 }
  0xba   : > { %1100 = vrot.lane.b32.xlu0 %v2941_v27, %s2765_s20  ;;  %773 = vst.msk [vmem:[#allocation2 + $0x4c] sm:$0xf] %vm753_vm7, %v696_v62 }
  0xbb   : > { %v694_v40 = vpop.permute.xlu0 %693 }
  0xbc   : > { %772 = vst.msk [vmem:[#allocation2 + $0x48] sm:$0xf] %vm753_vm7, %v694_v40  ;;  %1106 = vrot.lane.b32.xlu1 %v2952_v36, %s2765_s20 }
  0xbe   : > { %1104 = vrot.lane.b32.xlu0 %v2959_v42, %s2765_s20  ;;  %v700_v25 = vpop.permute.xlu1 %699 }
  0xbf   : > { %775 = vst.msk [vmem:[#allocation2 + $0x54] sm:$0xf] %vm753_vm7, %v700_v25  ;;  %v698_v47 = vpop.permute.xlu0 %697  ;;  %v4520_v25 = vld [vmem:[#allocation6_spill] sm:$0xff] }
  0xc0   : > { %774 = vst.msk [vmem:[#allocation2 + $0x50] sm:$0xf] %vm753_vm7, %v698_v47  ;;  %1110 = vrot.lane.b32.xlu1 %v2969_v50, %s2765_s20 }
  0xc2   : > { %1108 = vrot.lane.b32.xlu0 %v2983_v58, %s2765_s20  ;;  %v704_v37 = vpop.permute.xlu1 %703 }
  0xc3   : > { %777 = vst.msk [vmem:[#allocation2 + $0x5c] sm:$0xf] %vm753_vm7, %v704_v37  ;;  %v702_v0 = vpop.permute.xlu0 %701 }
  0xc4   : > { %776 = vst.msk [vmem:[#allocation2 + $0x58] sm:$0xf] %vm753_vm7, %v702_v0  ;;  %1233 = vrot.lane.b32.xlu1 %v4517_v1, %s2766_s21 }
  0xc6   : > { %1112 = vrot.lane.b32.xlu0 %v4510_v5, %s2765_s20  ;;  %v708_v52 = vpop.permute.xlu1 %707 }
  0xc7   : > { %779 = vst.msk [vmem:[#allocation2 + $0x64] sm:$0xf] %vm753_vm7, %v708_v52 }
  0xc8   : > { %v706_v24 = vpop.permute.xlu0 %705  ;;  %1237 = vrot.lane.b32.xlu1 %v4518_v43, %s2766_s21 }
  0xc9   : > { %778 = vst.msk [vmem:[#allocation2 + $0x60] sm:$0xf] %vm753_vm7, %v706_v24 }
  0xca   : > { %1235 = vrot.lane.b32.xlu0 %v4519_v11, %s2766_s21  ;;  %v712_v62 = vpop.permute.xlu1 %711  ;;  %v2735_v11 = vld [vmem:[%s4378_s1 + $0x18] sm:$0xff]  }
  0xcb   : > { %781 = vst.msk [vmem:[#allocation2 + $0x6c] sm:$0xf] %vm753_vm7, %v712_v62 }
  0xcc   : > { %v710_v40 = vpop.permute.xlu0 %709  ;;  %1370 = vrot.lane.b32.xlu1 %v3318_v10, %s2767_s22  ;;  %v2734_v10 = vld [vmem:[%s4378_s1 + $0x20] ss:$0 sps:$4 sm:$0xff]  }
  0xcd   : > { %780 = vst.msk [vmem:[#allocation2 + $0x68] sm:$0xf] %vm753_vm7, %v710_v40  ;;  %2715 = vmatprep.subr.msk.bf16.mxu0 %vm2117_vm9, %v2734_v10  ;;  %2716 = vmatprep.subr.msk.bf16.mxu1 %vm2117_vm9, %v2734_v10  ;;  %v2736_v40 = vld [vmem:[%s4378_s1 + $0x10] sm:$0xff]  }
  0xce   : > { %1239 = vrot.lane.b32.xlu0 %v4520_v25, %s2766_s21  ;;  %v716_v47 = vpop.permute.xlu1 %715 }
  0xcf   : > { %783 = vst.msk [vmem:[#allocation2 + $0x74] sm:$0xf] %vm753_vm7, %v716_v47  ;;  %v2737_v47 = vld [vmem:[%s4378_s1 + $0x8] sm:$0xff]  }
  0xd0   : > { %v714_v37 = vpop.permute.xlu0 %713  ;;  %1374 = vrot.lane.b32.xlu1 %v3333_v61, %s2767_s22 }
  0xd1   : > { %782 = vst.msk [vmem:[#allocation2 + $0x70] sm:$0xf] %vm753_vm7, %v714_v37  ;;  %v4521_v37 = vld [vmem:[#allocation9_spill] sm:$0xff] }
  0xd2   : > { %1372 = vrot.lane.b32.xlu0 %v3312_v18, %s2767_s22  ;;  %v720_v0 = vpop.permute.xlu1 %719  ;;  %v2119_v18 = vsel %vm2117_vm9, %v2734_v10, 0 }
  0xd3   : > { %785 = vst.msk [vmem:[#allocation2 + $0x7c] sm:$0xf] %vm753_vm7, %v720_v0  ;;  %2664 = vmatpush3.bf16.msra.mxu0 %v2119_v18  ;;  %2710 = vmatpush3.bf16.msra.mxu1 %v2119_v18  ;;  %v2738_v0 = vld [vmem:[%s4378_s1] sm:$0xff]  }
  0xd4   : > { %v718_v1 = vpop.permute.xlu0 %717  ;;  %1501 = vrot.lane.b32.xlu1 %v2860_v33, %s2768_s25  ;;  %2665 = vmatprep.subr.bf16.mxu0 %v2735_v11 }
  0xd5   : > { %784 = vst.msk [vmem:[#allocation2 + $0x78] sm:$0xf] %vm753_vm7, %v718_v1  ;;  %2706 = vmatprep.subr.bf16.mxu1 %v2735_v11 }
  0xd6   : > { %1376 = vrot.lane.b32.xlu0 %v3327_v46, %s2767_s22  ;;  %v952_v52 = vpop.permute.xlu1 %951 }
  0xd7   : > { %1047 = vst.msk [vmem:[#allocation2 + $0x4] sm:$0xf] %vm1045_vm8, %v952_v52  ;;  %2666 = vmatpush3.bf16.msra.mxu0 %v2735_v11  ;;  %2711 = vmatpush3.bf16.msra.mxu1 %v2735_v11 }
  0xd8   : > { %v950_v24 = vpop.permute.xlu0 %949  ;;  %1505 = vrot.lane.b32.xlu1 %v2874_v44, %s2768_s25  ;;  %2667 = vmatprep.subr.bf16.mxu0 %v2736_v40 }
  0xd9   : > { %1046 = vst.msk [vmem:[#allocation2] sm:$0xf] %vm1045_vm8, %v950_v24  ;;  %2707 = vmatprep.subr.bf16.mxu1 %v2736_v40 }
  0xda   : > { %1503 = vrot.lane.b32.xlu0 %v2843_v22, %s2768_s25  ;;  %v956_v33 = vpop.permute.xlu1 %955 }
  0xdb   : > { %1049 = vst.msk [vmem:[#allocation2 + $0xc] sm:$0xf] %vm1045_vm8, %v956_v33  ;;  %2668 = vmatpush3.bf16.msra.mxu0 %v2736_v40  ;;  %2712 = vmatpush3.bf16.msra.mxu1 %v2736_v40 }
  0xdc   : > { %v954_v62 = vpop.permute.xlu0 %953  ;;  %1654 = vrot.lane.b32.xlu1 %v4518_v43, %s2769_s30  ;;  %2669 = vmatprep.subr.bf16.mxu0 %v2737_v47 }
  0xdd   : > { %1048 = vst.msk [vmem:[#allocation2 + $0x8] sm:$0xf] %vm1045_vm8, %v954_v62  ;;  %2708 = vmatprep.subr.bf16.mxu1 %v2737_v47  ;;  %v4524_v62 = vld [vmem:[#allocation10_spill] sm:$0xff] }
  0xde   : > { %1507 = vrot.lane.b32.xlu0 %v2863_v34, %s2768_s25  ;;  %v960_v22 = vpop.permute.xlu1 %959 }
  0xdf   : > { %1051 = vst.msk [vmem:[#allocation2 + $0x14] sm:$0xf] %vm1045_vm8, %v960_v22  ;;  %2670 = vmatpush3.bf16.msra.mxu0 %v2737_v47  ;;  %2713 = vmatpush3.bf16.msra.mxu1 %v2737_v47 }
  0xe0   : > { %v958_v44 = vpop.permute.xlu0 %957  ;;  %1658 = vrot.lane.b32.xlu1 %v4521_v37, %s2769_s30  ;;  %2671 = vmatprep.subr.bf16.mxu0 %v2738_v0 }
  0xe1   : > { %1050 = vst.msk [vmem:[#allocation2 + $0x10] sm:$0xf] %vm1045_vm8, %v958_v44  ;;  %2709 = vmatprep.subr.bf16.mxu1 %v2738_v0 }
  0xe2   : > { %1656 = vrot.lane.b32.xlu0 %v4520_v25, %s2769_s30  ;;  %v964_v34 = vpop.permute.xlu1 %963  ;;  %v4522_v25 = vld [vmem:[#allocation8_spill] sm:$0xff] }
  0xe3   : > { %1053 = vst.msk [vmem:[#allocation2 + $0x1c] sm:$0xf] %vm1045_vm8, %v964_v34  ;;  %2672 = vmatpush3.bf16.msra.mxu0 %v2738_v0  ;;  %2714 = vmatpush3.bf16.msra.mxu1 %v2738_v0 }
  0xe4   : > { %v962_v43 = vpop.permute.xlu0 %961  ;;  %1791 = vrot.lane.b32.xlu1 %v3333_v61, %s2770_s8 }
  0xe5   : > { %1052 = vst.msk [vmem:[#allocation2 + $0x18] sm:$0xf] %vm1045_vm8, %v962_v43 }
  0xe6   : > { %1660 = vrot.lane.b32.xlu0 %v4522_v25, %s2769_s30  ;;  %v968_v1 = vpop.permute.xlu1 %967 }
  0xe7   : > { %1055 = vst.msk [vmem:[#allocation2 + $0x24] sm:$0xf] %vm1045_vm8, %v968_v1 }
  0xe8   : > { %v966_v10 = vpop.permute.xlu0 %965  ;;  %1795 = vrot.lane.b32.xlu1 %v3348_v17, %s2770_s8 }
  0xe9   : > { %1054 = vst.msk [vmem:[#allocation2 + $0x20] sm:$0xf] %vm1045_vm8, %v966_v10 }
  0xea   : > { %1793 = vrot.lane.b32.xlu0 %v3327_v46, %s2770_s8  ;;  %v972_v61 = vpop.permute.xlu1 %971  ;;  %v4523_v46 = vld [vmem:[#allocation12_spill] sm:$0xff] }
  0xeb   : > { %1057 = vst.msk [vmem:[#allocation2 + $0x2c] sm:$0xf] %vm1045_vm8, %v972_v61 }
  0xec   : > { %v970_v18 = vpop.permute.xlu0 %969  ;;  %1241 = vrot.lane.b32.xlu1 %v4521_v37, %s2766_s21 }
  0xed   : > { %1056 = vst.msk [vmem:[#allocation2 + $0x28] sm:$0xf] %vm1045_vm8, %v970_v18 }
  0xee   : > { %1797 = vrot.lane.b32.xlu0 %v3342_v55, %s2770_s8  ;;  %v976_v52 = vpop.permute.xlu1 %975 }
  0xef   : > { %1059 = vst.msk [vmem:[#allocation2 + $0x34] sm:$0xf] %vm1045_vm8, %v976_v52 }
  0xf0   : > { %v974_v24 = vpop.permute.xlu0 %973  ;;  %1245 = vrot.lane.b32.xlu1 %v4523_v46, %s2766_s21 }
  0xf1   : > { %1058 = vst.msk [vmem:[#allocation2 + $0x30] sm:$0xf] %vm1045_vm8, %v974_v24 }
  0xf2   : > { %1243 = vrot.lane.b32.xlu0 %v4522_v25, %s2766_s21  ;;  %v980_v11 = vpop.permute.xlu1 %979 }
  0xf3   : > { %1061 = vst.msk [vmem:[#allocation2 + $0x3c] sm:$0xf] %vm1045_vm8, %v980_v11 }
  0xf4   : > { %v978_v33 = vpop.permute.xlu0 %977  ;;  %1378 = vrot.lane.b32.xlu1 %v3348_v17, %s2767_s22 }
  0xf5   : > { %1060 = vst.msk [vmem:[#allocation2 + $0x38] sm:$0xf] %vm1045_vm8, %v978_v33 }
  0xf6   : > { %1247 = vrot.lane.b32.xlu0 %v4524_v62, %s2766_s21  ;;  %v984_v40 = vpop.permute.xlu1 %983 }
  0xf7   : > { %1063 = vst.msk [vmem:[#allocation2 + $0x44] sm:$0xf] %vm1045_vm8, %v984_v40 }
  0xf8   : > { %v982_v22 = vpop.permute.xlu0 %981  ;;  %1382 = vrot.lane.b32.xlu1 %v3363_v20, %s2767_s22 }
  0xf9   : > { %1062 = vst.msk [vmem:[#allocation2 + $0x40] sm:$0xf] %vm1045_vm8, %v982_v22 }
  0xfa   : > { %1380 = vrot.lane.b32.xlu0 %v3342_v55, %s2767_s22  ;;  %v988_v44 = vpop.permute.xlu1 %987 }
  0xfb   : > { %1065 = vst.msk [vmem:[#allocation2 + $0x4c] sm:$0xf] %vm1045_vm8, %v988_v44 }
  0xfc   : > { %v986_v47 = vpop.permute.xlu0 %985  ;;  %1509 = vrot.lane.b32.xlu1 %v2896_v54, %s2768_s25 }
  0xfd   : > { %1064 = vst.msk [vmem:[#allocation2 + $0x48] sm:$0xf] %vm1045_vm8, %v986_v47 }
  0xfe   : > { %1384 = vrot.lane.b32.xlu0 %v3357_v23, %s2767_s22  ;;  %v992_v17 = vpop.permute.xlu1 %991 }
  0xff   : > { %1067 = vst.msk [vmem:[#allocation2 + $0x54] sm:$0xf] %vm1045_vm8, %v992_v17 }
 0x100   : > { %v990_v37 = vpop.permute.xlu0 %989  ;;  %1513 = vrot.lane.b32.xlu1 %v2920_v9, %s2768_s25 }
 0x101   : > { %1066 = vst.msk [vmem:[#allocation2 + $0x50] sm:$0xf] %vm1045_vm8, %v990_v37 }
 0x102   : > { %1511 = vrot.lane.b32.xlu0 %v2883_v49, %s2768_s25  ;;  %v996_v55 = vpop.permute.xlu1 %995  ;;  %v4525_v49 = vld [vmem:[#allocation17_spill] sm:$0xff] }
 0x103   : > { %1069 = vst.msk [vmem:[#allocation2 + $0x5c] sm:$0xf] %vm1045_vm8, %v996_v55 }
 0x104   : > { %v994_v34 = vpop.permute.xlu0 %993  ;;  %1662 = vrot.lane.b32.xlu1 %v4523_v46, %s2769_s30  ;;  %v4528_v46 = vld [vmem:[#allocation20_spill] sm:$0xff] }
 0x105   : > { %1068 = vst.msk [vmem:[#allocation2 + $0x58] sm:$0xf] %vm1045_vm8, %v994_v34 }
 0x106   : > { %1515 = vrot.lane.b32.xlu0 %v2905_v59, %s2768_s25  ;;  %v1000_v54 = vpop.permute.xlu1 %999  ;;  %v4526_v59 = vld [vmem:[#allocation14_spill] sm:$0xff] }
 0x107   : > { %1071 = vst.msk [vmem:[#allocation2 + $0x64] sm:$0xf] %vm1045_vm8, %v1000_v54 }
 0x108   : > { %v998_v43 = vpop.permute.xlu0 %997  ;;  %1666 = vrot.lane.b32.xlu1 %v4525_v49, %s2769_s30 }
 0x109   : > { %1070 = vst.msk [vmem:[#allocation2 + $0x60] sm:$0xf] %vm1045_vm8, %v998_v43 }
 0x10a   : > { %1664 = vrot.lane.b32.xlu0 %v4524_v62, %s2769_s30  ;;  %v1004_v9 = vpop.permute.xlu1 %1003 }
 0x10b   : > { %1073 = vst.msk [vmem:[#allocation2 + $0x6c] sm:$0xf] %vm1045_vm8, %v1004_v9 }
 0x10c   : > { %v1002_v0 = vpop.permute.xlu0 %1001  ;;  %1799 = vrot.lane.b32.xlu1 %v3363_v20, %s2770_s8 }
 0x10d   : > { %1072 = vst.msk [vmem:[#allocation2 + $0x68] sm:$0xf] %vm1045_vm8, %v1002_v0  ;;  %v4532_v0 = vld [vmem:[#allocation28_spill] sm:$0xff] }
 0x10e   : > { %1668 = vrot.lane.b32.xlu0 %v4526_v59, %s2769_s30  ;;  %v1008_v25 = vpop.permute.xlu1 %1007 }
 0x10f   : > { %1075 = vst.msk [vmem:[#allocation2 + $0x74] sm:$0xf] %vm1045_vm8, %v1008_v25 }
 0x110   : > { %v1006_v1 = vpop.permute.xlu0 %1005  ;;  %1803 = vrot.lane.b32.xlu1 %v3378_v26, %s2770_s8 }
 0x111   : > { %1074 = vst.msk [vmem:[#allocation2 + $0x70] sm:$0xf] %vm1045_vm8, %v1006_v1 }
 0x112   : > { %1801 = vrot.lane.b32.xlu0 %v3357_v23, %s2770_s8  ;;  %v1012_v10 = vpop.permute.xlu1 %1011  ;;  %v4527_v23 = vld [vmem:[#allocation22_spill] sm:$0xff] }
 0x113   : > { %1077 = vst.msk [vmem:[#allocation2 + $0x7c] sm:$0xf] %vm1045_vm8, %v1012_v10 }
 0x114   : > { %v1010_v61 = vpop.permute.xlu0 %1009  ;;  %1249 = vrot.lane.b32.xlu1 %v4525_v49, %s2766_s21 }
 0x115   : > { %1076 = vst.msk [vmem:[#allocation2 + $0x78] sm:$0xf] %vm1045_vm8, %v1010_v61 }
 0x116   : > { %1805 = vrot.lane.b32.xlu0 %v3372_v29, %s2770_s8  ;;  %v1083_v20 = vpop.permute.xlu1 %1082 }
 0x117   : > { %1178 = vst.msk [vmem:[#allocation2 + $0x4] sm:$0xf] %vm1176_vm10, %v1083_v20 }
 0x118   : > { %v1081_v18 = vpop.permute.xlu0 %1080  ;;  %1253 = vrot.lane.b32.xlu1 %v4527_v23, %s2766_s21 }
 0x119   : > { %1177 = vst.msk [vmem:[#allocation2] sm:$0xf] %vm1176_vm10, %v1081_v18 }
 0x11a   : > { %1251 = vrot.lane.b32.xlu0 %v4526_v59, %s2766_s21  ;;  %v1087_v52 = vpop.permute.xlu1 %1086 }
 0x11b   : > { %1180 = vst.msk [vmem:[#allocation2 + $0xc] sm:$0xf] %vm1176_vm10, %v1087_v52  ;;  %v4534_v52 = vld [vmem:[#allocation31_spill] sm:$0xff] }
 0x11c   : > { %v1085_v24 = vpop.permute.xlu0 %1084  ;;  %1386 = vrot.lane.b32.xlu1 %v3378_v26, %s2767_s22 }
 0x11d   : > { %1179 = vst.msk [vmem:[#allocation2 + $0x8] sm:$0xf] %vm1176_vm10, %v1085_v24 }
 0x11e   : > { %1255 = vrot.lane.b32.xlu0 %v4528_v46, %s2766_s21  ;;  %v1091_v11 = vpop.permute.xlu1 %1090 }
 0x11f   : > { %1182 = vst.msk [vmem:[#allocation2 + $0x14] sm:$0xf] %vm1176_vm10, %v1091_v11 }
 0x120   : > { %v1089_v33 = vpop.permute.xlu0 %1088  ;;  %1390 = vrot.lane.b32.xlu1 %v3393_v2, %s2767_s22 }
 0x121   : > { %1181 = vst.msk [vmem:[#allocation2 + $0x10] sm:$0xf] %vm1176_vm10, %v1089_v33 }
 0x122   : > { %1388 = vrot.lane.b32.xlu0 %v3372_v29, %s2767_s22  ;;  %v1095_v62 = vpop.permute.xlu1 %1094 }
 0x123   : > { %1184 = vst.msk [vmem:[#allocation2 + $0x1c] sm:$0xf] %vm1176_vm10, %v1095_v62 }
 0x124   : > { %v1093_v40 = vpop.permute.xlu0 %1092  ;;  %1517 = vrot.lane.b32.xlu1 %v2941_v27, %s2768_s25 }
 0x125   : > { %1183 = vst.msk [vmem:[#allocation2 + $0x18] sm:$0xf] %vm1176_vm10, %v1093_v40 }
 0x126   : > { %1392 = vrot.lane.b32.xlu0 %v3387_v56, %s2767_s22  ;;  %v1099_v26 = vpop.permute.xlu1 %1098 }
 0x127   : > { %1186 = vst.msk [vmem:[#allocation2 + $0x24] sm:$0xf] %vm1176_vm10, %v1099_v26 }
 0x128   : > { %v1097_v22 = vpop.permute.xlu0 %1096  ;;  %1521 = vrot.lane.b32.xlu1 %v2959_v42, %s2768_s25 }
 0x129   : > { %1185 = vst.msk [vmem:[#allocation2 + $0x20] sm:$0xf] %vm1176_vm10, %v1097_v22 }
 0x12a   : > { %1519 = vrot.lane.b32.xlu0 %v2929_v15, %s2768_s25  ;;  %v1103_v29 = vpop.permute.xlu1 %1102  ;;  %v4529_v15 = vld [vmem:[#allocation27_spill] sm:$0xff] }
 0x12b   : > { %1188 = vst.msk [vmem:[#allocation2 + $0x2c] sm:$0xf] %vm1176_vm10, %v1103_v29 }
 0x12c   : > { %v1101_v44 = vpop.permute.xlu0 %1100  ;;  %1670 = vrot.lane.b32.xlu1 %v4527_v23, %s2769_s30 }
 0x12d   : > { %1187 = vst.msk [vmem:[#allocation2 + $0x28] sm:$0xf] %vm1176_vm10, %v1101_v44  ;;  %v4535_v44 = vld [vmem:[#allocation33_spill] sm:$0xff] }
 0x12e   : > { %1523 = vrot.lane.b32.xlu0 %v2952_v36, %s2768_s25  ;;  %v1107_v27 = vpop.permute.xlu1 %1106  ;;  %v4530_v36 = vld [vmem:[#allocation25_spill] sm:$0xff] }
 0x12f   : > { %1190 = vst.msk [vmem:[#allocation2 + $0x34] sm:$0xf] %vm1176_vm10, %v1107_v27  ;;  %v4536_v27 = vld [vmem:[#allocation34_spill] sm:$0xff] }
 0x130   : > { %v1105_v47 = vpop.permute.xlu0 %1104  ;;  %1674 = vrot.lane.b32.xlu1 %v4529_v15, %s2769_s30 }
 0x131   : > { %1189 = vst.msk [vmem:[#allocation2 + $0x30] sm:$0xf] %vm1176_vm10, %v1105_v47 }
 0x132   : > { %1672 = vrot.lane.b32.xlu0 %v4528_v46, %s2769_s30  ;;  %v1111_v42 = vpop.permute.xlu1 %1110 }
 0x133   : > { %1192 = vst.msk [vmem:[#allocation2 + $0x3c] sm:$0xf] %vm1176_vm10, %v1111_v42 }
 0x134   : > { %v1109_v17 = vpop.permute.xlu0 %1108  ;;  %1807 = vrot.lane.b32.xlu1 %v3393_v2, %s2770_s8 }
 0x135   : > { %1191 = vst.msk [vmem:[#allocation2 + $0x38] sm:$0xf] %vm1176_vm10, %v1109_v17 }
 0x136   : > { %1676 = vrot.lane.b32.xlu0 %v4530_v36, %s2769_s30  ;;  %v1234_v37 = vpop.permute.xlu1 %1233 }
 0x137   : > { %1330 = vst.msk [vmem:[#allocation2] sm:$0xf] %vm1329_vm11, %v1234_v37 }
 0x138   : > { %v1113_v55 = vpop.permute.xlu0 %1112  ;;  %1811 = vrot.lane.b32.xlu1 %v3408_v13, %s2770_s8 }
 0x139   : > { %1193 = vst.msk [vmem:[#allocation2 + $0x40] sm:$0xf] %vm1176_vm10, %v1113_v55 }
 0x13a   : > { %1809 = vrot.lane.b32.xlu0 %v3387_v56, %s2770_s8  ;;  %v1238_v34 = vpop.permute.xlu1 %1237  ;;  %v4531_v56 = vld [vmem:[#allocation29_spill] sm:$0xff] }
 0x13b   : > { %1332 = vst.msk [vmem:[#allocation2 + $0x8] sm:$0xf] %vm1329_vm11, %v1238_v34 }
 0x13c   : > { %v1236_v2 = vpop.permute.xlu0 %1235  ;;  %1257 = vrot.lane.b32.xlu1 %v4529_v15, %s2766_s21 }
 0x13d   : > { %1331 = vst.msk [vmem:[#allocation2 + $0x4] sm:$0xf] %vm1329_vm11, %v1236_v2  ;;  %v4537_v2 = vld [vmem:[#allocation35_spill] sm:$0xff] }
 0x13e   : > { %1813 = vrot.lane.b32.xlu0 %v3402_v41, %s2770_s8  ;;  %v1371_v54 = vpop.permute.xlu1 %1370 }
 0x13f   : > { %1467 = vst.msk [vmem:[#allocation2] sm:$0xf] %vm1466_vm12, %v1371_v54  ;;  %v4538_v54 = vld [vmem:[#allocation36_spill] sm:$0xff] }
 0x140   : > { %v1240_v43 = vpop.permute.xlu0 %1239  ;;  %1261 = vrot.lane.b32.xlu1 %v4531_v56, %s2766_s21 }
 0x141   : > { %1333 = vst.msk [vmem:[#allocation2 + $0xc] sm:$0xf] %vm1329_vm11, %v1240_v43 }
 0x142   : > { %1259 = vrot.lane.b32.xlu0 %v4530_v36, %s2766_s21  ;;  %v1375_v49 = vpop.permute.xlu1 %1374 }
 0x143   : > { %1469 = vst.msk [vmem:[#allocation2 + $0x8] sm:$0xf] %vm1466_vm12, %v1375_v49 }
 0x144   : > { %v1373_v9 = vpop.permute.xlu0 %1372  ;;  %1394 = vrot.lane.b32.xlu1 %v3408_v13, %s2767_s22 }
 0x145   : > { %1468 = vst.msk [vmem:[#allocation2 + $0x4] sm:$0xf] %vm1466_vm12, %v1373_v9 }
 0x146   : > { %1263 = vrot.lane.b32.xlu0 %v4532_v0, %s2766_s21  ;;  %v1502_v59 = vpop.permute.xlu1 %1501 }
 0x147   : > { %1598 = vst.msk [vmem:[#allocation2] sm:$0xf] %vm1597_vm13, %v1502_v59 }
 0x148   : > { %v1377_v25 = vpop.permute.xlu0 %1376  ;;  %1398 = vrot.lane.b32.xlu1 %v3423_v38, %s2767_s22 }
 0x149   : > { %1470 = vst.msk [vmem:[#allocation2 + $0xc] sm:$0xf] %vm1466_vm12, %v1377_v25 }
 0x14a   : > { %1396 = vrot.lane.b32.xlu0 %v3402_v41, %s2767_s22  ;;  %v1506_v1 = vpop.permute.xlu1 %1505 }
 0x14b   : > { %1600 = vst.msk [vmem:[#allocation2 + $0x8] sm:$0xf] %vm1597_vm13, %v1506_v1 }
 0x14c   : > { %v1504_v13 = vpop.permute.xlu0 %1503  ;;  %1525 = vrot.lane.b32.xlu1 %v2983_v58, %s2768_s25 }
 0x14d   : > { %1599 = vst.msk [vmem:[#allocation2 + $0x4] sm:$0xf] %vm1597_vm13, %v1504_v13  ;;  %v4539_v13 = vld [vmem:[#allocation16_spill] sm:$0xff] }
 0x14e   : > { %1400 = vrot.lane.b32.xlu0 %v3417_v32, %s2767_s22  ;;  %v1655_v10 = vpop.permute.xlu1 %1654 }
 0x14f   : > { %1751 = vst.msk [vmem:[#allocation2] sm:$0xf] %vm1750_vm14, %v1655_v10  ;;  %v4540_v10 = vld [vmem:[#allocation18_spill] sm:$0xff] }
 0x150   : > { %v1508_v61 = vpop.permute.xlu0 %1507  ;;  %1529 = vrot.lane.b32.xlu1 %v4510_v5, %s2768_s25 }
 0x151   : > { %1601 = vst.msk [vmem:[#allocation2 + $0xc] sm:$0xf] %vm1597_vm13, %v1508_v61 }
 0x152   : > { %1527 = vrot.lane.b32.xlu0 %v2969_v50, %s2768_s25  ;;  %v1659_v41 = vpop.permute.xlu1 %1658  ;;  %v4533_v50 = vld [vmem:[#allocation32_spill] sm:$0xff] }
 0x153   : > { %1753 = vst.msk [vmem:[#allocation2 + $0x8] sm:$0xf] %vm1750_vm14, %v1659_v41 }
 0x154   : > { %v1657_v58 = vpop.permute.xlu0 %1656  ;;  %1678 = vrot.lane.b32.xlu1 %v4531_v56, %s2769_s30 }
 0x155   : > { %1752 = vst.msk [vmem:[#allocation2 + $0x4] sm:$0xf] %vm1750_vm14, %v1657_v58  ;;  %v4541_v58 = vld [vmem:[#allocation37_spill] sm:$0xff] }
 0x156   : > { %1531 = vrot.lane.b32.xlu0 %v2993_v4, %s2768_s25  ;;  %v1792_v20 = vpop.permute.xlu1 %1791 }
 0x157   : > { %1888 = vst.msk [vmem:[#allocation2] sm:$0xf] %vm1887_vm15, %v1792_v20  ;;  %v4542_v20 = vld [vmem:[#allocation38_spill] sm:$0xff] }
 0x158   : > { %v1661_v5 = vpop.permute.xlu0 %1660  ;;  %1682 = vrot.lane.b32.xlu1 %v4533_v50, %s2769_s30 }
 0x159   : > { %1754 = vst.msk [vmem:[#allocation2 + $0xc] sm:$0xf] %vm1750_vm14, %v1661_v5 }
 0x15a   : > { %1680 = vrot.lane.b32.xlu0 %v4532_v0, %s2769_s30  ;;  %v1796_v18 = vpop.permute.xlu1 %1795 }
 0x15b   : > { %1890 = vst.msk [vmem:[#allocation2 + $0x8] sm:$0xf] %vm1887_vm15, %v1796_v18 }
 0x15c   : > { %v1794_v23 = vpop.permute.xlu0 %1793  ;;  %1815 = vrot.lane.b32.xlu1 %v3423_v38, %s2770_s8 }
 0x15d   : > { %1889 = vst.msk [vmem:[#allocation2 + $0x4] sm:$0xf] %vm1887_vm15, %v1794_v23 }
 0x15e   : > { %1684 = vrot.lane.b32.xlu0 %v4534_v52, %s2769_s30  ;;  %v1242_v24 = vpop.permute.xlu1 %1241 }
 0x15f   : > { %1334 = vst.msk [vmem:[#allocation2 + $0x10] sm:$0xf] %vm1329_vm11, %v1242_v24 }
 0x160   : > { %v1798_v46 = vpop.permute.xlu0 %1797  ;;  %1819 = vrot.lane.b32.xlu1 %v3438_v39, %s2770_s8 }
 0x161   : > { %1891 = vst.msk [vmem:[#allocation2 + $0xc] sm:$0xf] %vm1887_vm15, %v1798_v46 }
 0x162   : > { %1817 = vrot.lane.b32.xlu0 %v3417_v32, %s2770_s8  ;;  %v1246_v11 = vpop.permute.xlu1 %1245 }
 0x163   : > { %1336 = vst.msk [vmem:[#allocation2 + $0x18] sm:$0xf] %vm1329_vm11, %v1246_v11  ;;  %v4544_v11 = vld [vmem:[#allocation19_spill] sm:$0xff] }
 0x164   : > { %v1244_v38 = vpop.permute.xlu0 %1243  ;;  %v2739_v33 = vld [vmem:[#allocation2] sm:$0xff]   ;;  %1114 = vrot.lane.b32.xlu1 %v2993_v4, %s2765_s20 }
 0x165   : > { %1335 = vst.msk [vmem:[#allocation2 + $0x14] sm:$0xf] %vm1329_vm11, %v1244_v38  ;;  %2673 = vmatprep.mubr.msk.bf16.mxu0 %vm2068_vm0, %v2739_v33  ;;  %v4545_v38 = vld [vmem:[#allocation21_spill] sm:$0xff] }
 0x166   : > { %1821 = vrot.lane.b32.xlu0 %v3432_v3, %s2770_s8  ;;  %v1379_v62 = vpop.permute.xlu1 %1378 }
 0x167   : > { %1471 = vst.msk [vmem:[#allocation2 + $0x10] sm:$0xf] %vm1466_vm12, %v1379_v62 }
 0x168   : > { %v1248_v32 = vpop.permute.xlu0 %1247  ;;  %v2740_v40 = vld [vmem:[#allocation2 + $0x8] sm:$0xff]   ;;  %1118 = vrot.lane.b32.xlu1 %v3014_v21, %s2765_s20 }
 0x169   : > { %1337 = vst.msk [vmem:[#allocation2 + $0x1c] sm:$0xf] %vm1329_vm11, %v1248_v32  ;;  %2674 = vmatmul.mubr.msk.bf16.vlgmr.msra.gmra.mxu0 %vm2068_vm0, %v2740_v40 }
 0x16a   : > { %1116 = vrot.lane.b32.xlu0 %v4511_v45, %s2765_s20  ;;  %v1383_v4 = vpop.permute.xlu1 %1382 }
 0x16b   : > { %1473 = vst.msk [vmem:[#allocation2 + $0x18] sm:$0xf] %vm1466_vm12, %v1383_v4 }
 0x16c   : > { %v1381_v26 = vpop.permute.xlu0 %1380  ;;  %1267 = vrot.lane.b32.xlu1 %v4534_v52, %s2766_s21  ;;  %v4543_v52 = vld [vmem:[#allocation23_spill] sm:$0xff] }
 0x16d   : > { %1472 = vst.msk [vmem:[#allocation2 + $0x14] sm:$0xf] %vm1466_vm12, %v1381_v26 }
 0x16e   : > { %1265 = vrot.lane.b32.xlu0 %v4533_v50, %s2766_s21  ;;  %v1510_v22 = vpop.permute.xlu1 %1509 }
 0x16f   : > { %1602 = vst.msk [vmem:[#allocation2 + $0x10] sm:$0xf] %vm1597_vm13, %v1510_v22  ;;  %v4546_v22 = vld [vmem:[#allocation39_spill] sm:$0xff] }
 0x170   : > { %v1385_v29 = vpop.permute.xlu0 %1384  ;;  %1271 = vrot.lane.b32.xlu1 %v4535_v44, %s2766_s21 }
 0x171   : > { %1474 = vst.msk [vmem:[#allocation2 + $0x1c] sm:$0xf] %vm1466_vm12, %v1385_v29  ;;  %v4547_v29 = vld [vmem:[#allocation40_spill] sm:$0xff] }
 0x172   : > { %1269 = vrot.lane.b32.xlu0 %v4536_v27, %s2766_s21  ;;  %v1514_v47 = vpop.permute.xlu1 %1513 }
 0x173   : > { %1604 = vst.msk [vmem:[#allocation2 + $0x18] sm:$0xf] %vm1597_vm13, %v1514_v47 }
 0x174   : > { %v1512_v15 = vpop.permute.xlu0 %1511  ;;  %1404 = vrot.lane.b32.xlu1 %v3432_v3, %s2767_s22 }
 0x175   : > { %1603 = vst.msk [vmem:[#allocation2 + $0x14] sm:$0xf] %vm1597_vm13, %v1512_v15 }
 0x176   : > { %1402 = vrot.lane.b32.xlu0 %v3438_v39, %s2767_s22  ;;  %v1663_v42 = vpop.permute.xlu1 %1662 }
 0x177   : > { %1755 = vst.msk [vmem:[#allocation2 + $0x10] sm:$0xf] %vm1750_vm14, %v1663_v42 }
 0x178   : > { %v1516_v17 = vpop.permute.xlu0 %1515  ;;  %1408 = vrot.lane.b32.xlu1 %v3447_v14, %s2767_s22 }
 0x179   : > { %1605 = vst.msk [vmem:[#allocation2 + $0x1c] sm:$0xf] %vm1597_vm13, %v1516_v17 }
 0x17a   : > { %1406 = vrot.lane.b32.xlu0 %v3453_v28, %s2767_s22  ;;  %v1667_v36 = vpop.permute.xlu1 %1666 }
 0x17b   : > { %1757 = vst.msk [vmem:[#allocation2 + $0x18] sm:$0xf] %vm1750_vm14, %v1667_v36 }
 0x17c   : > { %v1665_v37 = vpop.permute.xlu0 %1664  ;;  %1535 = vrot.lane.b32.xlu1 %v3014_v21, %s2768_s25 }
 0x17d   : > { %1756 = vst.msk [vmem:[#allocation2 + $0x14] sm:$0xf] %vm1750_vm14, %v1665_v37  ;;  %v4548_v37 = vld [vmem:[#allocation24_spill] sm:$0xff] }
 0x17e   : > { %1533 = vrot.lane.b32.xlu0 %v4511_v45, %s2768_s25  ;;  %v1800_v3 = vpop.permute.xlu1 %1799 }
 0x17f   : > { %1892 = vst.msk [vmem:[#allocation2 + $0x10] sm:$0xf] %vm1887_vm15, %v1800_v3 }
 0x180   : > { %v1669_v39 = vpop.permute.xlu0 %1668  ;;  %1539 = vrot.lane.b32.xlu1 %v3038_v53, %s2768_s25 }
 0x181   : > { %1758 = vst.msk [vmem:[#allocation2 + $0x1c] sm:$0xf] %vm1750_vm14, %v1669_v39 }
 0x182   : > { %1537 = vrot.lane.b32.xlu0 %v4514_v60, %s2768_s25  ;;  %v1804_v55 = vpop.permute.xlu1 %1803 }
 0x183   : > { %1894 = vst.msk [vmem:[#allocation2 + $0x18] sm:$0xf] %vm1887_vm15, %v1804_v55 }
 0x184   : > { %v1802_v34 = vpop.permute.xlu0 %1801  ;;  %1688 = vrot.lane.b32.xlu1 %v4535_v44, %s2769_s30 }
 0x185   : > { %1893 = vst.msk [vmem:[#allocation2 + $0x14] sm:$0xf] %vm1887_vm15, %v1802_v34 }
 0x186   : > { %1686 = vrot.lane.b32.xlu0 %v4536_v27, %s2769_s30  ;;  %v1250_v21 = vpop.permute.xlu1 %1249 }
 0x187   : > { %1338 = vst.msk [vmem:[#allocation2 + $0x20] sm:$0xf] %vm1329_vm11, %v1250_v21  ;;  %v4549_v21 = vld [vmem:[#allocation41_spill] sm:$0xff] }
 0x188   : > { %v1806_v45 = vpop.permute.xlu0 %1805  ;;  %1692 = vrot.lane.b32.xlu1 %v4537_v2, %s2769_s30 }
 0x189   : > { %1895 = vst.msk [vmem:[#allocation2 + $0x1c] sm:$0xf] %vm1887_vm15, %v1806_v45  ;;  %v4550_v45 = vld [vmem:[#allocation42_spill] sm:$0xff] }
 0x18a   : > { %1690 = vrot.lane.b32.xlu0 %v4538_v54, %s2769_s30  ;;  %v1254_v43 = vpop.permute.xlu1 %1253 }
 0x18b   : > { %1340 = vst.msk [vmem:[#allocation2 + $0x28] sm:$0xf] %vm1329_vm11, %v1254_v43 }
 0x18c   : > { %v1252_v56 = vpop.permute.xlu0 %1251  ;;  %v2741_v49 = vld [vmem:[#allocation2 + $0x10] sm:$0xff]   ;;  %1825 = vrot.lane.b32.xlu1 %v3447_v14, %s2770_s8 }
 0x18d   : > { %1339 = vst.msk [vmem:[#allocation2 + $0x24] sm:$0xf] %vm1329_vm11, %v1252_v56  ;;  %2677 = vmatprep.mubr.msk.bf16.mxu0 %vm2068_vm0, %v2741_v49 }
 0x18e   : > { %1823 = vrot.lane.b32.xlu0 %v3453_v28, %s2770_s8  ;;  %v1387_v9 = vpop.permute.xlu1 %1386 }
 0x18f   : > { %1475 = vst.msk [vmem:[#allocation2 + $0x20] sm:$0xf] %vm1466_vm12, %v1387_v9 }
 0x190   : > { %v1256_v0 = vpop.permute.xlu0 %1255  ;;  %v2742_v59 = vld [vmem:[#allocation2 + $0x18] sm:$0xff]   ;;  %1829 = vrot.lane.b32.xlu1 %v3462_v31, %s2770_s8 }
 0x191   : > { %1341 = vst.msk [vmem:[#allocation2 + $0x2c] sm:$0xf] %vm1329_vm11, %v1256_v0  ;;  %2678 = vmatmul.mubr.msk.bf16.gmra.mxu0 %vm2068_vm0, %v2742_v59 }
 0x192   : > { %1827 = vrot.lane.b32.xlu0 %v3468_v6, %s2770_s8  ;;  %v1391_v14 = vpop.permute.xlu1 %1390 }
 0x193   : > { %1477 = vst.msk [vmem:[#allocation2 + $0x28] sm:$0xf] %vm1466_vm12, %v1391_v14 }
 0x194   : > { %v1389_v28 = vpop.permute.xlu0 %1388  ;;  %1122 = vrot.lane.b32.xlu1 %v3038_v53, %s2765_s20 }
 0x195   : > { %1476 = vst.msk [vmem:[#allocation2 + $0x24] sm:$0xf] %vm1466_vm12, %v1389_v28 }
 0x196   : > { %1120 = vrot.lane.b32.xlu0 %v4514_v60, %s2765_s20  ;;  %v1518_v25 = vpop.permute.xlu1 %1517 }
 0x197   : > { %1606 = vst.msk [vmem:[#allocation2 + $0x20] sm:$0xf] %vm1597_vm13, %v1518_v25 }
 0x198   : > { %v1393_v1 = vpop.permute.xlu0 %1392  ;;  %1126 = vrot.lane.b32.xlu1 %v4539_v13, %s2765_s20 }
 0x199   : > { %1478 = vst.msk [vmem:[#allocation2 + $0x2c] sm:$0xf] %vm1466_vm12, %v1393_v1  ;;  %v4551_v1 = vld [vmem:[#allocation43_spill] sm:$0xff] }
 0x19a   : > { %1124 = vrot.lane.b32.xlu0 %v4540_v10, %s2765_s20  ;;  %v1522_v61 = vpop.permute.xlu1 %1521 }
 0x19b   : > { %1608 = vst.msk [vmem:[#allocation2 + $0x28] sm:$0xf] %vm1597_vm13, %v1522_v61  ;;  %v4053_v61 = vld [vmem:[%s2805_s17 + $0xc4] sm:$0xf] }
 0x19c   : > { %v1520_v41 = vpop.permute.xlu0 %1519  ;;  %1275 = vrot.lane.b32.xlu1 %v4537_v2, %s2766_s21 }
 0x19d   : > { %1607 = vst.msk [vmem:[#allocation2 + $0x24] sm:$0xf] %vm1597_vm13, %v1520_v41 }
 0x19e   : > { %1273 = vrot.lane.b32.xlu0 %v4538_v54, %s2766_s21  ;;  %v1671_v53 = vpop.permute.xlu1 %1670 }
 0x19f   : > { %1759 = vst.msk [vmem:[#allocation2 + $0x20] sm:$0xf] %vm1750_vm14, %v1671_v53  ;;  %v4057_v53 = vld [vmem:[%s2805_s17 + $0xc0] sm:$0xf] }
 0x1a0   : > { %v1524_v60 = vpop.permute.xlu0 %1523  ;;  %1279 = vrot.lane.b32.xlu1 %v4541_v58, %s2766_s21 }
 0x1a1   : > { %1609 = vst.msk [vmem:[#allocation2 + $0x2c] sm:$0xf] %vm1597_vm13, %v1524_v60  ;;  %v1219_v60 = vshll.u32 %v4053_v61, 16 }
 0x1a2   : > { %1277 = vrot.lane.b32.xlu0 %v4542_v20, %s2766_s21  ;;  %v1675_v5 = vpop.permute.xlu1 %1674 }
 0x1a3   : > { %1761 = vst.msk [vmem:[#allocation2 + $0x28] sm:$0xf] %vm1750_vm14, %v1675_v5  ;;  %v1210_v5 = vshrl.u32 %v4057_v53, 16 }
 0x1a4   : > { %v1673_v50 = vpop.permute.xlu0 %1672  ;;  %1412 = vrot.lane.b32.xlu1 %v3462_v31, %s2767_s22 }
 0x1a5   : > { %1760 = vst.msk [vmem:[#allocation2 + $0x24] sm:$0xf] %vm1750_vm14, %v1673_v50  ;;  %v1213_v50 = vshll.u32 %v4057_v53, 16 }
 0x1a6   : > { %1410 = vrot.lane.b32.xlu0 %v3468_v6, %s2767_s22  ;;  %v1808_v18 = vpop.permute.xlu1 %1807 }
 0x1a7   : > { %1896 = vst.msk [vmem:[#allocation2 + $0x20] sm:$0xf] %vm1887_vm15, %v1808_v18 }
 0x1a8   : > { %v1677_v23 = vpop.permute.xlu0 %1676  ;;  %1416 = vrot.lane.b32.xlu1 %v4543_v52, %s2767_s22 }
 0x1a9   : > { %1762 = vst.msk [vmem:[#allocation2 + $0x2c] sm:$0xf] %vm1750_vm14, %v1677_v23 }
 0x1aa   : > { %1414 = vrot.lane.b32.xlu0 %v3483_v30, %s2767_s22  ;;  %v1812_v24 = vpop.permute.xlu1 %1811 }
 0x1ab   : > { %1898 = vst.msk [vmem:[#allocation2 + $0x28] sm:$0xf] %vm1887_vm15, %v1812_v24  ;;  %v1212_v24 = vrot.slane %v1210_v5, 4 }
 0x1ac   : > { %v1810_v46 = vpop.permute.xlu0 %1809  ;;  %1543 = vrot.lane.b32.xlu1 %v4539_v13, %s2768_s25  ;;  %v4552_v13 = vld [vmem:[#allocation44_spill] sm:$0xff] }
 0x1ad   : > { %1897 = vst.msk [vmem:[#allocation2 + $0x24] sm:$0xf] %vm1887_vm15, %v1810_v46  ;;  %v1215_v46 = vrot.slane %v1213_v50, 5 }
 0x1ae   : > { %1541 = vrot.lane.b32.xlu0 %v4540_v10, %s2768_s25  ;;  %v1258_v31 = vpop.permute.xlu1 %1257 }
 0x1af   : > { %1342 = vst.msk [vmem:[#allocation2 + $0x30] sm:$0xf] %vm1329_vm11, %v1258_v31 }
 0x1b0   : > { %v1814_v6 = vpop.permute.xlu0 %1813  ;;  %1547 = vrot.lane.b32.xlu1 %v4544_v11, %s2768_s25 }
 0x1b1   : > { %1899 = vst.msk [vmem:[#allocation2 + $0x2c] sm:$0xf] %vm1887_vm15, %v1814_v6 }
 0x1b2   : > { %1545 = vrot.lane.b32.xlu0 %v4545_v38, %s2768_s25  ;;  %v1262_v33 = vpop.permute.xlu1 %1261 }
 0x1b3   : > { %1344 = vst.msk [vmem:[#allocation2 + $0x38] sm:$0xf] %vm1329_vm11, %v1262_v33  ;;  %v1216_v33 = vor.u32 %v1215_v46, %v1212_v24 }
 0x1b4   : > { %v1260_v62 = vpop.permute.xlu0 %1259  ;;  %v2743_v32 = vld [vmem:[#allocation2 + $0x20] sm:$0xff]   ;;  %1696 = vrot.lane.b32.xlu1 %v4541_v58, %s2769_s30  ;;  %v1223_v58 = vshrl.u32 %v4053_v61, 16 }
 0x1b5   : > { %1343 = vst.msk [vmem:[#allocation2 + $0x34] sm:$0xf] %vm1329_vm11, %v1260_v62  ;;  %2681 = vmatprep.mubr.msk.bf16.mxu0 %vm2068_vm0, %v2743_v32 }
 0x1b6   : > { %1694 = vrot.lane.b32.xlu0 %v4542_v20, %s2769_s30  ;;  %v1395_v40 = vpop.permute.xlu1 %1394 }
 0x1b7   : > { %1479 = vst.msk [vmem:[#allocation2 + $0x30] sm:$0xf] %vm1466_vm12, %v1395_v40 }
 0x1b8   : > { %v1264_v4 = vpop.permute.xlu0 %1263  ;;  %v2744_v26 = vld [vmem:[#allocation2 + $0x28] sm:$0xff]   ;;  %1700 = vrot.lane.b32.xlu1 %v4546_v22, %s2769_s30 }
 0x1b9   : > { %1345 = vst.msk [vmem:[#allocation2 + $0x3c] sm:$0xf] %vm1329_vm11, %v1264_v4  ;;  %2682 = vmatmul.mubr.msk.bf16.gmra.mxu0 %vm2068_vm0, %v2744_v26  ;;  %v1217_v4 = vrot.slane %v1216_v33, 4 }
 0x1ba   : > { %1698 = vrot.lane.b32.xlu0 %v4547_v29, %s2769_s30  ;;  %v1399_v44 = vpop.permute.xlu1 %1398 }
 0x1bb   : > { %1481 = vst.msk [vmem:[#allocation2 + $0x38] sm:$0xf] %vm1466_vm12, %v1399_v44 }
 0x1bc   : > { %v1397_v27 = vpop.permute.xlu0 %1396  ;;  %1833 = vrot.lane.b32.xlu1 %v4543_v52, %s2770_s8  ;;  %v233_v52 = vld [vmem:[%s2805_s17 + $0xc8] sm:$0x1] }
 0x1bd   : > { %1480 = vst.msk [vmem:[#allocation2 + $0x34] sm:$0xf] %vm1466_vm12, %v1397_v27 }
 0x1be   : > { %1831 = vrot.lane.b32.xlu0 %v3483_v30, %s2770_s8  ;;  %v1526_v47 = vpop.permute.xlu1 %1525 }
 0x1bf   : > { %1610 = vst.msk [vmem:[#allocation2 + $0x30] sm:$0xf] %vm1597_vm13, %v1526_v47 }
 0x1c0   : > { %v1401_v15 = vpop.permute.xlu0 %1400  ;;  %1837 = vrot.lane.b32.xlu1 %v3492_v35, %s2770_s8 }
 0x1c1   : > { %1482 = vst.msk [vmem:[#allocation2 + $0x3c] sm:$0xf] %vm1466_vm12, %v1401_v15 }
 0x1c2   : > { %1835 = vrot.lane.b32.xlu0 %v3498_v57, %s2770_s8  ;;  %v1530_v42 = vpop.permute.xlu1 %1529 }
 0x1c3   : > { %1612 = vst.msk [vmem:[#allocation2 + $0x38] sm:$0xf] %vm1597_vm13, %v1530_v42  ;;  %v1368_v42 = vrot.slane %v233_v52, 5 }
 0x1c4   : > { %v1528_v17 = vpop.permute.xlu0 %1527  ;;  %1130 = vrot.lane.b32.xlu1 %v4544_v11, %s2765_s20  ;;  %v1229_v11 = vshll.u32 %v233_v52, 16 }
 0x1c5   : > { %1611 = vst.msk [vmem:[#allocation2 + $0x34] sm:$0xf] %vm1597_vm13, %v1528_v17 }
 0x1c6   : > { %1128 = vrot.lane.b32.xlu0 %v4545_v38, %s2765_s20  ;;  %v1679_v30 = vpop.permute.xlu1 %1678 }
 0x1c7   : > { %1763 = vst.msk [vmem:[#allocation2 + $0x30] sm:$0xf] %vm1750_vm14, %v1679_v30  ;;  %v2600_v30 = vrot.slane %v4057_v53, 9 }
 0x1c8   : > { %v1532_v36 = vpop.permute.xlu0 %1531  ;;  %1134 = vrot.lane.b32.xlu1 %v4548_v37, %s2765_s20 }
 0x1c9   : > { %1613 = vst.msk [vmem:[#allocation2 + $0x3c] sm:$0xf] %vm1597_vm13, %v1532_v36  ;;  %v4107_v36 = vld [vmem:[%s2805_s17 + $0xd0] sm:$0xf] }
 0x1ca   : > { %1132 = vrot.lane.b32.xlu0 %v4516_v8, %s2765_s20  ;;  %v1683_v3 = vpop.permute.xlu1 %1682 }
 0x1cb   : > { %1765 = vst.msk [vmem:[#allocation2 + $0x38] sm:$0xf] %vm1750_vm14, %v1683_v3  ;;  %v4111_v3 = vld [vmem:[%s2805_s17 + $0xcc] sm:$0xf] }
 0x1cc   : > { %v1681_v39 = vpop.permute.xlu0 %1680  ;;  %1283 = vrot.lane.b32.xlu1 %v4546_v22, %s2766_s21 }
 0x1cd   : > { %1764 = vst.msk [vmem:[#allocation2 + $0x34] sm:$0xf] %vm1750_vm14, %v1681_v39 }
 0x1ce   : > { %1281 = vrot.lane.b32.xlu0 %v4547_v29, %s2766_s21  ;;  %v1816_v55 = vpop.permute.xlu1 %1815  ;;  %v1365_v29 = vrot.slane %v4053_v61, 5 }
 0x1cf   : > { %1900 = vst.msk [vmem:[#allocation2 + $0x30] sm:$0xf] %vm1887_vm15, %v1816_v55  ;;  %v1640_v55 = vshll.u32 %v4107_v36, 16 }
 0x1d0   : > { %v1685_v34 = vpop.permute.xlu0 %1684  ;;  %1287 = vrot.lane.b32.xlu1 %v4549_v21, %s2766_s21  ;;  %v1367_v15 = vrot.slane %v1365_v29, 4 }
 0x1d1   : > { %1766 = vst.msk [vmem:[#allocation2 + $0x3c] sm:$0xf] %vm1750_vm14, %v1685_v34  ;;  %v1644_v34 = vshrl.u32 %v4107_v36, 16 }
 0x1d2   : > { %1285 = vrot.lane.b32.xlu0 %v4550_v45, %s2766_s21  ;;  %v1820_v2 = vpop.permute.xlu1 %1819  ;;  %v1369_v39 = vsel %vm3273_vm6, %v1367_v15, %v1368_v42 }
 0x1d3   : > { %1902 = vst.msk [vmem:[#allocation2 + $0x38] sm:$0xf] %vm1887_vm15, %v1820_v2  ;;  %v1631_v2 = vshrl.u32 %v4111_v3, 16 }
 0x1d4   : > { %v1818_v54 = vpop.permute.xlu0 %1817  ;;  %1420 = vrot.lane.b32.xlu1 %v3492_v35, %s2767_s22 }
 0x1d5   : > { %1901 = vst.msk [vmem:[#allocation2 + $0x34] sm:$0xf] %vm1887_vm15, %v1818_v54  ;;  %v1634_v54 = vshll.u32 %v4111_v3, 16 }
 0x1d6   : > { %1418 = vrot.lane.b32.xlu0 %v3498_v57, %s2767_s22  ;;  %v1115_v43 = vpop.permute.xlu1 %1114 }
 0x1d7   : > { %1194 = vst.msk [vmem:[#allocation2 + $0x44] sm:$0xf] %vm1176_vm10, %v1115_v43  ;;  %v1642_v43 = vrot.slane %v1640_v55, 5 }
 0x1d8   : > { %v1822_v56 = vpop.permute.xlu0 %1821  ;;  %1424 = vrot.lane.b32.xlu1 %v3509_v16, %s2767_s22 }
 0x1d9   : > { %1903 = vst.msk [vmem:[#allocation2 + $0x3c] sm:$0xf] %vm1887_vm15, %v1822_v56  ;;  %v1646_v56 = vrot.slane %v1644_v34, 4 }
 0x1da   : > { %1422 = vrot.lane.b32.xlu0 %v3514_v19, %s2767_s22  ;;  %v1119_v49 = vpop.permute.xlu1 %1118 }
 0x1db   : > { %1196 = vst.msk [vmem:[#allocation2 + $0x4c] sm:$0xf] %vm1176_vm10, %v1119_v49 }
 0x1dc   : > { %v1117_v9 = vpop.permute.xlu0 %1116  ;;  %v2745_v35 = vld [vmem:[#allocation2 + $0x30] sm:$0xff]   ;;  %1551 = vrot.lane.b32.xlu1 %v4548_v37, %s2768_s25 }
 0x1dd   : > { %1195 = vst.msk [vmem:[#allocation2 + $0x48] sm:$0xf] %vm1176_vm10, %v1117_v9  ;;  %2685 = vmatprep.mubr.msk.bf16.mxu0 %vm2068_vm0, %v2745_v35  ;;  %v1633_v9 = vrot.slane %v1631_v2, 4  ;;  %v1636_v35 = vrot.slane %v1634_v54, 5 }
 0x1de   : > { %1549 = vrot.lane.b32.xlu0 %v4516_v8, %s2768_s25  ;;  %v1268_v57 = vpop.permute.xlu1 %1267 }
 0x1df   : > { %1347 = vst.msk [vmem:[#allocation2 + $0x44] sm:$0xf] %vm1329_vm11, %v1268_v57  ;;  %v236_v57 = vld [vmem:[%s2805_s17 + $0xd4] sm:$0x1] }
 0x1e0   : > { %v1266_v0 = vpop.permute.xlu0 %1265  ;;  %v2746_v59 = vld [vmem:[#allocation2 + $0x38] sm:$0xff]   ;;  %1555 = vrot.lane.b32.xlu1 %v3125_v12, %s2768_s25 }
 0x1e1   : > { %1346 = vst.msk [vmem:[#allocation2 + $0x40] sm:$0xf] %vm1329_vm11, %v1266_v0  ;;  %2686 = vmatmul.mubr.msk.bf16.gmra.mxu0 %vm2068_vm0, %v2746_v59 }
 0x1e2   : > { %1553 = vrot.lane.b32.xlu0 %v3142_v51, %s2768_s25  ;;  %v1272_v14 = vpop.permute.xlu1 %1271 }
 0x1e3   : > { %1349 = vst.msk [vmem:[#allocation2 + $0x4c] sm:$0xf] %vm1329_vm11, %v1272_v14  ;;  %v1647_v14 = vor.u32 %v1646_v56, %v1642_v43 }
 0x1e4   : > { %v1270_v8 = vpop.permute.xlu0 %1269  ;;  %1704 = vrot.lane.b32.xlu1 %v4549_v21, %s2769_s30 }
 0x1e5   : > { %1348 = vst.msk [vmem:[#allocation2 + $0x48] sm:$0xf] %vm1329_vm11, %v1270_v8  ;;  %v1650_v8 = vshll.u32 %v236_v57, 16 }
 0x1e6   : > { %1702 = vrot.lane.b32.xlu0 %v4550_v45, %s2769_s30  ;;  %v1405_v28 = vpop.permute.xlu1 %1404  ;;  %v1366_v45 = vsel %vm3273_vm6, %v2600_v30, %v1365_v29 }
 0x1e7   : > { %1484 = vst.msk [vmem:[#allocation2 + $0x44] sm:$0xf] %vm1466_vm12, %v1405_v28 }
 0x1e8   : > { %v1403_v25 = vpop.permute.xlu0 %1402  ;;  %1708 = vrot.lane.b32.xlu1 %v4551_v1, %s2769_s30 }
 0x1e9   : > { %1483 = vst.msk [vmem:[#allocation2 + $0x40] sm:$0xf] %vm1466_vm12, %v1403_v25  ;;  %v1637_v25 = vor.u32 %v1636_v35, %v1633_v9 }
 0x1ea   : > { %1706 = vrot.lane.b32.xlu0 %v4552_v13, %s2769_s30  ;;  %v1409_v10 = vpop.permute.xlu1 %1408 }
 0x1eb   : > { %1486 = vst.msk [vmem:[#allocation2 + $0x4c] sm:$0xf] %vm1466_vm12, %v1409_v10  ;;  %v1652_v10 = vrot.slane %v1650_v8, 5 }
 0x1ec   : > { %v1407_v41 = vpop.permute.xlu0 %1406  ;;  %1841 = vrot.lane.b32.xlu1 %v3509_v16, %s2770_s8  ;;  %v1221_v16 = vrot.slane %v1219_v60, 5  ;;  %v1786_v60 = vrot.slane %v4107_v36, 5 }
 0x1ed   : > { %1485 = vst.msk [vmem:[#allocation2 + $0x48] sm:$0xf] %vm1466_vm12, %v1407_v41  ;;  %v1638_v41 = vrot.slane %v1637_v25, 4 }
 0x1ee   : > { %1839 = vrot.lane.b32.xlu0 %v3514_v19, %s2770_s8  ;;  %v1536_v20 = vpop.permute.xlu1 %1535  ;;  %v1225_v19 = vrot.slane %v1223_v58, 4  ;;  %v1222_v27 = vsel %vm2854_vm3, %v1217_v4, %v1221_v16 }
 0x1ef   : > { %1615 = vst.msk [vmem:[#allocation2 + $0x44] sm:$0xf] %vm1597_vm13, %v1536_v20  ;;  %v1643_v5 = vsel %vm2854_vm3, %v1638_v41, %v1642_v43 }
 0x1f0   : > { %v1534_v18 = vpop.permute.xlu0 %1533  ;;  %1845 = vrot.lane.b32.xlu1 %v3525_v7, %s2770_s8  ;;  %v1226_v6 = vor.u32 %v1225_v19, %v1221_v16  ;;  %v1789_v16 = vrot.slane %v236_v57, 5  ;;  %v2601_v19 = vrot.slane %v4111_v3, 9 }
 0x1f1   : > { %1614 = vst.msk [vmem:[#allocation2 + $0x40] sm:$0xf] %vm1597_vm13, %v1534_v18  ;;  %v1788_v18 = vrot.slane %v1786_v60, 4 }
 0x1f2   : > { %1843 = vrot.lane.b32.xlu0 %v3529_v48, %s2770_s8  ;;  %v1540_v23 = vpop.permute.xlu1 %1539  ;;  %v1227_v32 = vrot.slane %v1226_v6, 4 }
 0x1f3   : > { %1617 = vst.msk [vmem:[#allocation2 + $0x4c] sm:$0xf] %vm1597_vm13, %v1540_v23  ;;  %v1790_v24 = vsel %vm3273_vm6, %v1788_v18, %v1789_v16 }
 0x1f4   : > { %v1538_v31 = vpop.permute.xlu0 %1537  ;;  %1138 = vrot.lane.b32.xlu1 %v3125_v12, %s2765_s20  ;;  %v1231_v12 = vrot.slane %v1229_v11, 5 }
 0x1f5   : > { %1616 = vst.msk [vmem:[#allocation2 + $0x48] sm:$0xf] %vm1597_vm13, %v1538_v31  ;;  %v1787_v31 = vsel %vm3273_vm6, %v2601_v19, %v1786_v60 }
 0x1f6   : > { %1136 = vrot.lane.b32.xlu0 %v3142_v51, %s2765_s20  ;;  %v1689_v38 = vpop.permute.xlu1 %1688  ;;  %v4095_v22 = vsel %vm2854_vm3, %v1227_v32, %v1231_v12 }
 0x1f7   : > { %1768 = vst.msk [vmem:[#allocation2 + $0x44] sm:$0xf] %vm1750_vm14, %v1689_v38 }
 0x1f8   : > { %v1687_v62 = vpop.permute.xlu0 %1686  ;;  %1142 = vrot.lane.b32.xlu1 %v4053_v61, %s2765_s20 }
 0x1f9   : > { %1767 = vst.msk [vmem:[#allocation2 + $0x40] sm:$0xf] %vm1750_vm14, %v1687_v62 }
 0x1fa   : > { %1140 = vrot.lane.b32.xlu0 %v4057_v53, %s2765_s20  ;;  %v1693_v40 = vpop.permute.xlu1 %1692 }
 0x1fb   : > { %1770 = vst.msk [vmem:[#allocation2 + $0x4c] sm:$0xf] %vm1750_vm14, %v1693_v40 }
 0x1fc   : > { %v1691_v51 = vpop.permute.xlu0 %1690  ;;  %1291 = vrot.lane.b32.xlu1 %v4551_v1, %s2766_s21 }
 0x1fd   : > { %1769 = vst.msk [vmem:[#allocation2 + $0x48] sm:$0xf] %vm1750_vm14, %v1691_v51 }
 0x1fe   : > { %1289 = vrot.lane.b32.xlu0 %v4552_v13, %s2766_s21  ;;  %v1826_v44 = vpop.permute.xlu1 %1825  ;;  %v1648_v13 = vrot.slane %v1647_v14, 4 }
 0x1ff   : > { %1905 = vst.msk [vmem:[#allocation2 + $0x44] sm:$0xf] %vm1887_vm15, %v1826_v44 }
 0x200   : > { %v1824_v47 = vpop.permute.xlu0 %1823  ;;  %1295 = vrot.lane.b32.xlu1 %v4095_v22, %s2766_s21  ;;  %v1653_v58 = vsel %vm2854_vm3, %v1648_v13, %v1652_v10  ;;  %vm2455_vm3 = vcmask 58368  }
 0x201   : > { %1904 = vst.msk [vmem:[#allocation2 + $0x40] sm:$0xf] %vm1887_vm15, %v1824_v47 }
 0x202   : > { %1293 = vrot.lane.b32.xlu0 %v1222_v27, %s2766_s21  ;;  %v1830_v17 = vpop.permute.xlu1 %1829 }
 0x203   : > { %1907 = vst.msk [vmem:[#allocation2 + $0x4c] sm:$0xf] %vm1887_vm15, %v1830_v17 }
 0x204   : > { %v1828_v37 = vpop.permute.xlu0 %1827  ;;  %1428 = vrot.lane.b32.xlu1 %v3525_v7, %s2767_s22 }
 0x205   : > { %1906 = vst.msk [vmem:[#allocation2 + $0x48] sm:$0xf] %vm1887_vm15, %v1828_v37 }
 0x206   : > { %1426 = vrot.lane.b32.xlu0 %v3529_v48, %s2767_s22  ;;  %v1123_v21 = vpop.permute.xlu1 %1122 }
 0x207   : > { %1198 = vst.msk [vmem:[#allocation2 + $0x54] sm:$0xf] %vm1176_vm10, %v1123_v21 }
 0x208   : > { %v1121_v7 = vpop.permute.xlu0 %1120  ;;  %v2747_v48 = vld [vmem:[#allocation2 + $0x40] sm:$0xff]   ;;  %1432 = vrot.lane.b32.xlu1 %v1369_v39, %s2767_s22 }
 0x209   : > { %1197 = vst.msk [vmem:[#allocation2 + $0x50] sm:$0xf] %vm1176_vm10, %v1121_v7  ;;  %2689 = vmatprep.mubr.msk.bf16.mxu1 %vm2068_vm0, %v2747_v48 }
 0x20a   : > { %1430 = vrot.lane.b32.xlu0 %v1366_v45, %s2767_s22  ;;  %v1127_v49 = vpop.permute.xlu1 %1126 }
 0x20b   : > { %1200 = vst.msk [vmem:[#allocation2 + $0x5c] sm:$0xf] %vm1176_vm10, %v1127_v49 }
 0x20c   : > { %v1125_v0 = vpop.permute.xlu0 %1124  ;;  %v2748_v59 = vld [vmem:[#allocation2 + $0x48] sm:$0xff]   ;;  %1559 = vrot.lane.b32.xlu1 %v4053_v61, %s2768_s25 }
 0x20d   : > { %1199 = vst.msk [vmem:[#allocation2 + $0x58] sm:$0xf] %vm1176_vm10, %v1125_v0  ;;  %2690 = vmatmul.mubr.msk.bf16.vlgmr.msra.gmra.mxu1 %vm2068_vm0, %v2748_v59 }
 0x20e   : > { %1557 = vrot.lane.b32.xlu0 %v4057_v53, %s2768_s25  ;;  %v1276_v28 = vpop.permute.xlu1 %1275 }
 0x20f   : > { %1351 = vst.msk [vmem:[#allocation2 + $0x54] sm:$0xf] %vm1329_vm11, %v1276_v28 }
 0x210   : > { %v1274_v1 = vpop.permute.xlu0 %1273  ;;  %1563 = vrot.lane.b32.xlu1 %v4107_v36, %s2768_s25 }
 0x211   : > { %1350 = vst.msk [vmem:[#allocation2 + $0x50] sm:$0xf] %vm1329_vm11, %v1274_v1 }
 0x212   : > { %1561 = vrot.lane.b32.xlu0 %v4111_v3, %s2768_s25  ;;  %v1280_v61 = vpop.permute.xlu1 %1279 }
 0x213   : > { %1353 = vst.msk [vmem:[#allocation2 + $0x5c] sm:$0xf] %vm1329_vm11, %v1280_v61 }
 0x214   : > { %v1278_v53 = vpop.permute.xlu0 %1277  ;;  %1712 = vrot.lane.b32.xlu1 %v4095_v22, %s2769_s30 }
 0x215   : > { %1352 = vst.msk [vmem:[#allocation2 + $0x58] sm:$0xf] %vm1329_vm11, %v1278_v53 }
 0x216   : > { %1710 = vrot.lane.b32.xlu0 %v1222_v27, %s2769_s30  ;;  %v1413_v20 = vpop.permute.xlu1 %1412 }
 0x217   : > { %1488 = vst.msk [vmem:[#allocation2 + $0x54] sm:$0xf] %vm1466_vm12, %v1413_v20 }
 0x218   : > { %v1411_v50 = vpop.permute.xlu0 %1410  ;;  %1716 = vrot.lane.b32.xlu1 %v1653_v58, %s2769_s30 }
 0x219   : > { %1487 = vst.msk [vmem:[#allocation2 + $0x50] sm:$0xf] %vm1466_vm12, %v1411_v50 }
 0x21a   : > { %1714 = vrot.lane.b32.xlu0 %v1643_v5, %s2769_s30  ;;  %v1417_v23 = vpop.permute.xlu1 %1416 }
 0x21b   : > { %1490 = vst.msk [vmem:[#allocation2 + $0x5c] sm:$0xf] %vm1466_vm12, %v1417_v23 }
 0x21c   : > { %v1415_v52 = vpop.permute.xlu0 %1414  ;;  %1849 = vrot.lane.b32.xlu1 %v1369_v39, %s2770_s8 }
 0x21d   : > { %1489 = vst.msk [vmem:[#allocation2 + $0x58] sm:$0xf] %vm1466_vm12, %v1415_v52 }
 0x21e   : > { %1847 = vrot.lane.b32.xlu0 %v1366_v45, %s2770_s8  ;;  %v1544_v46 = vpop.permute.xlu1 %1543 }
 0x21f   : > { %1619 = vst.msk [vmem:[#allocation2 + $0x54] sm:$0xf] %vm1597_vm13, %v1544_v46 }
 0x220   : > { %v1542_v6 = vpop.permute.xlu0 %1541  ;;  %1853 = vrot.lane.b32.xlu1 %v1790_v24, %s2770_s8 }
 0x221   : > { %1618 = vst.msk [vmem:[#allocation2 + $0x50] sm:$0xf] %vm1597_vm13, %v1542_v6 }
 0x222   : > { %1851 = vrot.lane.b32.xlu0 %v1787_v31, %s2770_s8  ;;  %v1548_v11 = vpop.permute.xlu1 %1547 }
 0x223   : > { %1621 = vst.msk [vmem:[#allocation2 + $0x5c] sm:$0xf] %vm1597_vm13, %v1548_v11 }
 0x224   : > { %v1546_v38 = vpop.permute.xlu0 %1545 }
 0x225   : > { %1620 = vst.msk [vmem:[#allocation2 + $0x58] sm:$0xf] %vm1597_vm13, %v1546_v38 }
 0x226   : > { %v1697_v33 = vpop.permute.xlu1 %1696 }
 0x227   : > { %1772 = vst.msk [vmem:[#allocation2 + $0x54] sm:$0xf] %vm1750_vm14, %v1697_v33 }
 0x228   : > { %v1695_v63 = vpop.permute.xlu0 %1694 }
 0x229   : > { %1771 = vst.msk [vmem:[#allocation2 + $0x50] sm:$0xf] %vm1750_vm14, %v1695_v63  ;;  %v2675_v62 = vpop.f32.mrf.mxu0 }
 0x22a   : > { %2459 = vst.msk [vmem:[%s4179_s14 + $0x10] sm:$0xff] %vm2282_vm1, %v2675_v62  ;;  %v1701_v32 = vpop.permute.xlu1 %1700  ;;  %v2354_v44 = vmul.f32 %v2675_v62, %v2675_v62  ;;  %v2286_v17 = vsel %vm2282_vm1, %v2675_v62, 0.0 }
 0x22b   : > { %1774 = vst.msk [vmem:[#allocation2 + $0x5c] sm:$0xf] %vm1750_vm14, %v1701_v32  ;;  %v2155_v40 = vpop.f32.mrf.mxu0 }
 0x22c   : > { %v1699_v12 = vpop.permute.xlu0 %1698  ;;  %2457 = vst.msk [vmem:[%s4179_s14] sm:$0xff] %vm2282_vm1, %v2155_v40  ;;  %v2352_v51 = vmul.f32 %v2155_v40, %v2155_v40  ;;  %v2283_v27 = vsel %vm2282_vm1, %v2155_v40, 0.0  ;;  %v2387_v21 = vsel %vm2282_vm1, %v2354_v44, 0.0 }
 0x22d   : > { %1773 = vst.msk [vmem:[#allocation2 + $0x58] sm:$0xf] %vm1750_vm14, %v1699_v12  ;;  %v2676_v4 = vpop.f32.mrf.mxu0 }
 0x22e   : > { %2460 = vst.msk [vmem:[%s4179_s14 + $0x18] sm:$0xff] %vm2282_vm1, %v2676_v4  ;;  %v1834_v26 = vpop.permute.xlu1 %1833  ;;  %v2384_v30 = vsel %vm2282_vm1, %v2352_v51, 0.0  ;;  %v2355_v36 = vmul.f32 %v2676_v4, %v2676_v4  ;;  %v2288_v45 = vsel %vm2282_vm1, %v2676_v4, 0.0 }
 0x22f   : > { %1909 = vst.msk [vmem:[#allocation2 + $0x54] sm:$0xf] %vm1887_vm15, %v1834_v26  ;;  %v2158_v29 = vpop.f32.mrf.mxu0 }
 0x230   : > { %v1832_v22 = vpop.permute.xlu0 %1831  ;;  %v2284_v47 = vsel %vm2282_vm1, %v2158_v29, 0.0  ;;  %v2353_v15 = vmul.f32 %v2158_v29, %v2158_v29  ;;  %2458 = vst.msk [vmem:[%s4179_s14 + $0x8] sm:$0xff] %vm2282_vm1, %v2158_v29  ;;  %v2389_v7 = vsel %vm2282_vm1, %v2355_v36, 0.0 }
 0x231   : > { %1908 = vst.msk [vmem:[#allocation2 + $0x50] sm:$0xf] %vm1887_vm15, %v1832_v22  ;;  %v2285_v42 = vadd.f32 %v2284_v47, %v2283_v27 }
 0x232   : > { %v2385_v37 = vsel %vm2282_vm1, %v2353_v15, 0.0  ;;  %v1838_v3 = vpop.permute.xlu1 %1837 }
 0x233   : > { %v2287_v39 = vadd.f32 %v2286_v17, %v2285_v42  ;;  %v2386_v55 = vadd.f32 %v2385_v37, %v2384_v30  ;;  %1911 = vst.msk [vmem:[#allocation2 + $0x5c] sm:$0xf] %vm1887_vm15, %v1838_v3 }
 0x234   : > { %v1836_v34 = vpop.permute.xlu0 %1835 }
 0x235   : > { %1910 = vst.msk [vmem:[#allocation2 + $0x58] sm:$0xf] %vm1887_vm15, %v1836_v34  ;;  %v2388_v2 = vadd.f32 %v2387_v21, %v2386_v55  ;;  %v2289_v54 = vadd.f32 %v2288_v45, %v2287_v39 }
 0x236   : > { %v1131_v48 = vpop.permute.xlu1 %1130 }
 0x237   : > { %1202 = vst.msk [vmem:[#allocation2 + $0x64] sm:$0xf] %vm1176_vm10, %v1131_v48  ;;  %v2390_v49 = vadd.f32 %v2389_v7, %v2388_v2 }
 0x238   : > { %v1129_v43 = vpop.permute.xlu0 %1128  ;;  %v2749_v56 = vld [vmem:[#allocation2 + $0x50] sm:$0xff]  }
 0x239   : > { %1201 = vst.msk [vmem:[#allocation2 + $0x60] sm:$0xf] %vm1176_vm10, %v1129_v43  ;;  %2693 = vmatprep.mubr.msk.bf16.mxu1 %vm2068_vm0, %v2749_v56 }
 0x23a   : > { %v1135_v9 = vpop.permute.xlu1 %1134 }
 0x23b   : > { %1204 = vst.msk [vmem:[#allocation2 + $0x6c] sm:$0xf] %vm1176_vm10, %v1135_v9 }
 0x23c   : > { %v1133_v35 = vpop.permute.xlu0 %1132  ;;  %v2750_v57 = vld [vmem:[#allocation2 + $0x58] sm:$0xff]  }
 0x23d   : > { %1203 = vst.msk [vmem:[#allocation2 + $0x68] sm:$0xf] %vm1176_vm10, %v1133_v35  ;;  %2694 = vmatmul.mubr.msk.bf16.gmra.mxu1 %vm2068_vm0, %v2750_v57 }
 0x23e   : > { %v1284_v0 = vpop.permute.xlu1 %1283 }
 0x23f   : > { %1355 = vst.msk [vmem:[#allocation2 + $0x64] sm:$0xf] %vm1329_vm11, %v1284_v0 }
 0x240   : > { %v1282_v59 = vpop.permute.xlu0 %1281 }
 0x241   : > { %1354 = vst.msk [vmem:[#allocation2 + $0x60] sm:$0xf] %vm1329_vm11, %v1282_v59 }
 0x242   : > { %v1288_v14 = vpop.permute.xlu1 %1287 }
 0x243   : > { %1357 = vst.msk [vmem:[#allocation2 + $0x6c] sm:$0xf] %vm1329_vm11, %v1288_v14 }
 0x244   : > { %v1286_v8 = vpop.permute.xlu0 %1285 }
 0x245   : > { %1356 = vst.msk [vmem:[#allocation2 + $0x68] sm:$0xf] %vm1329_vm11, %v1286_v8 }
 0x246   : > { %v1421_v28 = vpop.permute.xlu1 %1420 }
 0x247   : > { %1492 = vst.msk [vmem:[#allocation2 + $0x64] sm:$0xf] %vm1466_vm12, %v1421_v28 }
 0x248   : > { %v1419_v25 = vpop.permute.xlu0 %1418 }
 0x249   : > { %1491 = vst.msk [vmem:[#allocation2 + $0x60] sm:$0xf] %vm1466_vm12, %v1419_v25 }
 0x24a   : > { %v1425_v1 = vpop.permute.xlu1 %1424 }
 0x24b   : > { %1494 = vst.msk [vmem:[#allocation2 + $0x6c] sm:$0xf] %vm1466_vm12, %v1425_v1 }
 0x24c   : > { %v1423_v13 = vpop.permute.xlu0 %1422 }
 0x24d   : > { %1493 = vst.msk [vmem:[#allocation2 + $0x68] sm:$0xf] %vm1466_vm12, %v1423_v13 }
 0x24e   : > { %v1552_v10 = vpop.permute.xlu1 %1551 }
 0x24f   : > { %1623 = vst.msk [vmem:[#allocation2 + $0x64] sm:$0xf] %vm1597_vm13, %v1552_v10 }
 0x250   : > { %v1550_v61 = vpop.permute.xlu0 %1549 }
 0x251   : > { %1622 = vst.msk [vmem:[#allocation2 + $0x60] sm:$0xf] %vm1597_vm13, %v1550_v61  ;;  %v2679_v41 = vpop.f32.mrf.mxu0 }
 0x252   : > { %2463 = vst.msk [vmem:[%s4179_s14 + $0x30] sm:$0xff] %vm2282_vm1, %v2679_v41  ;;  %v1556_v53 = vpop.permute.xlu1 %1555  ;;  %v2358_v46 = vmul.f32 %v2679_v41, %v2679_v41  ;;  %v2294_v38 = vsel %vm2282_vm1, %v2679_v41, 0.0 }
 0x253   : > { %1625 = vst.msk [vmem:[#allocation2 + $0x6c] sm:$0xf] %vm1597_vm13, %v1556_v53  ;;  %v2171_v58 = vpop.f32.mrf.mxu0 }
 0x254   : > { %v1554_v60 = vpop.permute.xlu0 %1553  ;;  %v2290_v20 = vsel %vm2282_vm1, %v2171_v58, 0.0  ;;  %v2356_v5 = vmul.f32 %v2171_v58, %v2171_v58  ;;  %2461 = vst.msk [vmem:[%s4179_s14 + $0x20] sm:$0xff] %vm2282_vm1, %v2171_v58  ;;  %v2395_v4 = vsel %vm2282_vm1, %v2358_v46, 0.0 }
 0x255   : > { %1624 = vst.msk [vmem:[#allocation2 + $0x68] sm:$0xf] %vm1597_vm13, %v1554_v60  ;;  %v2291_v50 = vadd.f32 %v2290_v20, %v2289_v54  ;;  %v2680_v18 = vpop.f32.mrf.mxu0 }
 0x256   : > { %v2391_v16 = vsel %vm2282_vm1, %v2356_v5, 0.0  ;;  %2464 = vst.msk [vmem:[%s4179_s14 + $0x38] sm:$0xff] %vm2282_vm1, %v2680_v18  ;;  %v1705_v19 = vpop.permute.xlu1 %1704  ;;  %v2359_v33 = vmul.f32 %v2680_v18, %v2680_v18  ;;  %v2296_v51 = vsel %vm2282_vm1, %v2680_v18, 0.0 }
 0x257   : > { %v2392_v23 = vadd.f32 %v2391_v16, %v2390_v49  ;;  %1776 = vst.msk [vmem:[#allocation2 + $0x64] sm:$0xf] %vm1750_vm14, %v1705_v19  ;;  %v2174_v24 = vpop.f32.mrf.mxu0 }
 0x258   : > { %v1703_v52 = vpop.permute.xlu0 %1702  ;;  %v2292_v31 = vsel %vm2282_vm1, %v2174_v24, 0.0  ;;  %v2357_v6 = vmul.f32 %v2174_v24, %v2174_v24  ;;  %2462 = vst.msk [vmem:[%s4179_s14 + $0x28] sm:$0xff] %vm2282_vm1, %v2174_v24  ;;  %v2397_v29 = vsel %vm2282_vm1, %v2359_v33, 0.0 }
 0x259   : > { %1775 = vst.msk [vmem:[#allocation2 + $0x60] sm:$0xf] %vm1750_vm14, %v1703_v52  ;;  %v2293_v11 = vadd.f32 %v2292_v31, %v2291_v50 }
 0x25a   : > { %v2393_v63 = vsel %vm2282_vm1, %v2357_v6, 0.0  ;;  %v1709_v62 = vpop.permute.xlu1 %1708 }
 0x25b   : > { %v2295_v32 = vadd.f32 %v2294_v38, %v2293_v11  ;;  %v2394_v12 = vadd.f32 %v2393_v63, %v2392_v23  ;;  %1778 = vst.msk [vmem:[#allocation2 + $0x6c] sm:$0xf] %vm1750_vm14, %v1709_v62 }
 0x25c   : > { %v1707_v40 = vpop.permute.xlu0 %1706 }
 0x25d   : > { %1777 = vst.msk [vmem:[#allocation2 + $0x68] sm:$0xf] %vm1750_vm14, %v1707_v40  ;;  %v2396_v26 = vadd.f32 %v2395_v4, %v2394_v12  ;;  %v2297_v22 = vadd.f32 %v2296_v51, %v2295_v32 }
 0x25e   : > { %v1842_v44 = vpop.permute.xlu1 %1841 }
 0x25f   : > { %1913 = vst.msk [vmem:[#allocation2 + $0x64] sm:$0xf] %vm1887_vm15, %v1842_v44  ;;  %v2398_v47 = vadd.f32 %v2397_v29, %v2396_v26 }
 0x260   : > { %v1840_v27 = vpop.permute.xlu0 %1839 }
 0x261   : > { %1912 = vst.msk [vmem:[#allocation2 + $0x60] sm:$0xf] %vm1887_vm15, %v1840_v27 }
 0x262   : > { %v1846_v15 = vpop.permute.xlu1 %1845 }
 0x263   : > { %1915 = vst.msk [vmem:[#allocation2 + $0x6c] sm:$0xf] %vm1887_vm15, %v1846_v15 }
 0x264   : > { %v1844_v42 = vpop.permute.xlu0 %1843 }
 0x265   : > { %1914 = vst.msk [vmem:[#allocation2 + $0x68] sm:$0xf] %vm1887_vm15, %v1844_v42 }
 0x266   : > { %v1139_v17 = vpop.permute.xlu1 %1138 }
 0x267   : > { %1206 = vst.msk [vmem:[#allocation2 + $0x74] sm:$0xf] %vm1176_vm10, %v1139_v17 }
 0x268   : > { %v1137_v30 = vpop.permute.xlu0 %1136  ;;  %v2751_v36 = vld [vmem:[#allocation2 + $0x60] sm:$0xff]  }
 0x269   : > { %1205 = vst.msk [vmem:[#allocation2 + $0x70] sm:$0xf] %vm1176_vm10, %v1137_v30  ;;  %2697 = vmatprep.mubr.msk.bf16.mxu1 %vm2068_vm0, %v2751_v36 }
 0x26a   : > { %v1143_v37 = vpop.permute.xlu1 %1142 }
 0x26b   : > { %1208 = vst.msk [vmem:[#allocation2 + $0x7c] sm:$0xf] %vm1176_vm10, %v1143_v37 }
 0x26c   : > { %v1141_v3 = vpop.permute.xlu0 %1140  ;;  %v2752_v39 = vld [vmem:[#allocation2 + $0x68] sm:$0xff]  }
 0x26d   : > { %1207 = vst.msk [vmem:[#allocation2 + $0x78] sm:$0xf] %vm1176_vm10, %v1141_v3  ;;  %2698 = vmatmul.mubr.msk.bf16.gmra.mxu1 %vm2068_vm0, %v2752_v39 }
 0x26e   : > { %v1292_v55 = vpop.permute.xlu1 %1291 }
 0x26f   : > { %1359 = vst.msk [vmem:[#allocation2 + $0x74] sm:$0xf] %vm1329_vm11, %v1292_v55 }
 0x270   : > { %v1290_v34 = vpop.permute.xlu0 %1289 }
 0x271   : > { %1358 = vst.msk [vmem:[#allocation2 + $0x70] sm:$0xf] %vm1329_vm11, %v1290_v34 }
 0x272   : > { %v1296_v21 = vpop.permute.xlu1 %1295 }
 0x273   : > { %1361 = vst.msk [vmem:[#allocation2 + $0x7c] sm:$0xf] %vm1329_vm11, %v1296_v21 }
 0x274   : > { %v1294_v45 = vpop.permute.xlu0 %1293 }
 0x275   : > { %1360 = vst.msk [vmem:[#allocation2 + $0x78] sm:$0xf] %vm1329_vm11, %v1294_v45 }
 0x276   : > { %v1429_v2 = vpop.permute.xlu1 %1428 }
 0x277   : > { %1496 = vst.msk [vmem:[#allocation2 + $0x74] sm:$0xf] %vm1466_vm12, %v1429_v2 }
 0x278   : > { %v1427_v54 = vpop.permute.xlu0 %1426 }
 0x279   : > { %1495 = vst.msk [vmem:[#allocation2 + $0x70] sm:$0xf] %vm1466_vm12, %v1427_v54  ;;  %v2683_v7 = vpop.f32.mrf.mxu0 }
 0x27a   : > { %2467 = vst.msk [vmem:[%s4179_s14 + $0x50] sm:$0xff] %vm2282_vm1, %v2683_v7  ;;  %v1433_v48 = vpop.permute.xlu1 %1432  ;;  %v2362_v25 = vmul.f32 %v2683_v7, %v2683_v7  ;;  %v2302_v61 = vsel %vm2282_vm1, %v2683_v7, 0.0 }
 0x27b   : > { %1498 = vst.msk [vmem:[#allocation2 + $0x7c] sm:$0xf] %vm1466_vm12, %v1433_v48  ;;  %v2187_v56 = vpop.f32.mrf.mxu0 }
 0x27c   : > { %v1431_v43 = vpop.permute.xlu0 %1430  ;;  %v2298_v49 = vsel %vm2282_vm1, %v2187_v56, 0.0  ;;  %v2360_v9 = vmul.f32 %v2187_v56, %v2187_v56  ;;  %2465 = vst.msk [vmem:[%s4179_s14 + $0x40] sm:$0xff] %vm2282_vm1, %v2187_v56  ;;  %v2403_v50 = vsel %vm2282_vm1, %v2362_v25, 0.0 }
 0x27d   : > { %1497 = vst.msk [vmem:[#allocation2 + $0x78] sm:$0xf] %vm1466_vm12, %v1431_v43  ;;  %v2299_v35 = vadd.f32 %v2298_v49, %v2297_v22  ;;  %v2684_v57 = vpop.f32.mrf.mxu0 }
 0x27e   : > { %v2399_v0 = vsel %vm2282_vm1, %v2360_v9, 0.0  ;;  %2468 = vst.msk [vmem:[%s4179_s14 + $0x58] sm:$0xff] %vm2282_vm1, %v2684_v57  ;;  %v1560_v59 = vpop.permute.xlu1 %1559  ;;  %v2363_v41 = vmul.f32 %v2684_v57, %v2684_v57  ;;  %v2304_v18 = vsel %vm2282_vm1, %v2684_v57, 0.0 }
 0x27f   : > { %v2400_v14 = vadd.f32 %v2399_v0, %v2398_v47  ;;  %1627 = vst.msk [vmem:[#allocation2 + $0x74] sm:$0xf] %vm1597_vm13, %v1560_v59  ;;  %v2190_v28 = vpop.f32.mrf.mxu0 }
 0x280   : > { %v1558_v8 = vpop.permute.xlu0 %1557  ;;  %v2300_v1 = vsel %vm2282_vm1, %v2190_v28, 0.0  ;;  %v2361_v13 = vmul.f32 %v2190_v28, %v2190_v28  ;;  %2466 = vst.msk [vmem:[%s4179_s14 + $0x48] sm:$0xff] %vm2282_vm1, %v2190_v28  ;;  %v2405_v23 = vsel %vm2282_vm1, %v2363_v41, 0.0 }
 0x281   : > { %1626 = vst.msk [vmem:[#allocation2 + $0x70] sm:$0xf] %vm1597_vm13, %v1558_v8  ;;  %v2301_v10 = vadd.f32 %v2300_v1, %v2299_v35 }
 0x282   : > { %v2401_v53 = vsel %vm2282_vm1, %v2361_v13, 0.0  ;;  %v1564_v60 = vpop.permute.xlu1 %1563 }
 0x283   : > { %v2303_v58 = vadd.f32 %v2302_v61, %v2301_v10  ;;  %v2402_v20 = vadd.f32 %v2401_v53, %v2400_v14  ;;  %1629 = vst.msk [vmem:[#allocation2 + $0x7c] sm:$0xf] %vm1597_vm13, %v1564_v60 }
 0x284   : > { %v1562_v5 = vpop.permute.xlu0 %1561 }
 0x285   : > { %1628 = vst.msk [vmem:[#allocation2 + $0x78] sm:$0xf] %vm1597_vm13, %v1562_v5  ;;  %v2404_v16 = vadd.f32 %v2403_v50, %v2402_v20  ;;  %v2305_v19 = vadd.f32 %v2304_v18, %v2303_v58 }
 0x286   : > { %v1713_v52 = vpop.permute.xlu1 %1712 }
 0x287   : > { %1780 = vst.msk [vmem:[#allocation2 + $0x74] sm:$0xf] %vm1750_vm14, %v1713_v52  ;;  %v2406_v46 = vadd.f32 %v2405_v23, %v2404_v16 }
 0x288   : > { %v1711_v24 = vpop.permute.xlu0 %1710 }
 0x289   : > { %1779 = vst.msk [vmem:[#allocation2 + $0x70] sm:$0xf] %vm1750_vm14, %v1711_v24 }
 0x28a   : > { %v1717_v31 = vpop.permute.xlu1 %1716 }
 0x28b   : > { %1782 = vst.msk [vmem:[#allocation2 + $0x7c] sm:$0xf] %vm1750_vm14, %v1717_v31 }
 0x28c   : > { %v1715_v6 = vpop.permute.xlu0 %1714 }
 0x28d   : > { %1781 = vst.msk [vmem:[#allocation2 + $0x78] sm:$0xf] %vm1750_vm14, %v1715_v6 }
 0x28e   : > { %v1850_v11 = vpop.permute.xlu1 %1849 }
 0x28f   : > { %1917 = vst.msk [vmem:[#allocation2 + $0x74] sm:$0xf] %vm1887_vm15, %v1850_v11 }
 0x290   : > { %v1848_v38 = vpop.permute.xlu0 %1847 }
 0x291   : > { %1916 = vst.msk [vmem:[#allocation2 + $0x70] sm:$0xf] %vm1887_vm15, %v1848_v38 }
 0x292   : > { %v1854_v33 = vpop.permute.xlu1 %1853 }
 0x293   : > { %1919 = vst.msk [vmem:[#allocation2 + $0x7c] sm:$0xf] %vm1887_vm15, %v1854_v33 }
 0x294   : > { %v1852_v63 = vpop.permute.xlu0 %1851 }
 0x295   : > { %1918 = vst.msk [vmem:[#allocation2 + $0x78] sm:$0xf] %vm1887_vm15, %v1852_v63 }
 0x298   : > { %v2753_v62 = vld [vmem:[#allocation2 + $0x70] sm:$0xff]  }
 0x299   : > { %2701 = vmatprep.mubr.msk.bf16.mxu1 %vm2068_vm0, %v2753_v62 }
 0x29c   : > { %v2754_v32 = vld [vmem:[#allocation2 + $0x78] sm:$0xff]  }
 0x29d   : > { %2702 = vmatmul.mubr.msk.bf16.gmra.mxu1 %vm2068_vm0, %v2754_v32 }
 0x2a1   : > { %v2687_v12 = vpop.f32.mrf.mxu0 }
 0x2a2   : > { %2471 = vst.msk [vmem:[%s4179_s14 + $0x70] sm:$0xff] %vm2282_vm1, %v2687_v12  ;;  %v2366_v47 = vmul.f32 %v2687_v12, %v2687_v12  ;;  %v2310_v30 = vsel %vm2282_vm1, %v2687_v12, 0.0 }
 0x2a3   : > { %v2203_v40 = vpop.f32.mrf.mxu0 }
 0x2a4   : > { %v2306_v4 = vsel %vm2282_vm1, %v2203_v40, 0.0  ;;  %v2364_v51 = vmul.f32 %v2203_v40, %v2203_v40  ;;  %2469 = vst.msk [vmem:[%s4179_s14 + $0x60] sm:$0xff] %vm2282_vm1, %v2203_v40  ;;  %v2411_v55 = vsel %vm2282_vm1, %v2366_v47, 0.0 }
 0x2a5   : > { %v2307_v26 = vadd.f32 %v2306_v4, %v2305_v19  ;;  %v2688_v22 = vpop.f32.mrf.mxu0 }
 0x2a6   : > { %v2407_v29 = vsel %vm2282_vm1, %v2364_v51, 0.0  ;;  %2472 = vst.msk [vmem:[%s4179_s14 + $0x78] sm:$0xff] %vm2282_vm1, %v2688_v22  ;;  %v2367_v36 = vmul.f32 %v2688_v22, %v2688_v22  ;;  %v2312_v34 = vsel %vm2282_vm1, %v2688_v22, 0.0 }
 0x2a7   : > { %v2408_v44 = vadd.f32 %v2407_v29, %v2406_v46  ;;  %v2206_v27 = vpop.f32.mrf.mxu0 }
 0x2a8   : > { %v2308_v15 = vsel %vm2282_vm1, %v2206_v27, 0.0  ;;  %v2365_v42 = vmul.f32 %v2206_v27, %v2206_v27  ;;  %2470 = vst.msk [vmem:[%s4179_s14 + $0x68] sm:$0xff] %vm2282_vm1, %v2206_v27  ;;  %v2413_v2 = vsel %vm2282_vm1, %v2367_v36, 0.0 }
 0x2a9   : > { %v2309_v17 = vadd.f32 %v2308_v15, %v2307_v26 }
 0x2aa   : > { %v2409_v37 = vsel %vm2282_vm1, %v2365_v42, 0.0 }
 0x2ab   : > { %v2311_v3 = vadd.f32 %v2310_v30, %v2309_v17  ;;  %v2410_v39 = vadd.f32 %v2409_v37, %v2408_v44 }
 0x2ad   : > { %v2412_v21 = vadd.f32 %v2411_v55, %v2410_v39  ;;  %v2313_v45 = vadd.f32 %v2312_v34, %v2311_v3 }
 0x2af   : > { %v2414_v54 = vadd.f32 %v2413_v2, %v2412_v21 }
 0x2cd   : > { %v2691_v7 = vpop.f32.mrf.mxu1 }
 0x2ce   : > { %2475 = vst.msk [vmem:[%s4179_s14 + $0x90] sm:$0xff] %vm2282_vm1, %v2691_v7  ;;  %v2370_v59 = vmul.f32 %v2691_v7, %v2691_v7  ;;  %v2318_v25 = vsel %vm2282_vm1, %v2691_v7, 0.0 }
 0x2cf   : > { %v2219_v48 = vpop.f32.mrf.mxu1 }
 0x2d0   : > { %v2314_v43 = vsel %vm2282_vm1, %v2219_v48, 0.0  ;;  %v2368_v56 = vmul.f32 %v2219_v48, %v2219_v48  ;;  %2473 = vst.msk [vmem:[%s4179_s14 + $0x80] sm:$0xff] %vm2282_vm1, %v2219_v48  ;;  %v2419_v41 = vsel %vm2282_vm1, %v2370_v59, 0.0 }
 0x2d1   : > { %v2315_v49 = vadd.f32 %v2314_v43, %v2313_v45  ;;  %v2692_v9 = vpop.f32.mrf.mxu1 }
 0x2d2   : > { %v2415_v35 = vsel %vm2282_vm1, %v2368_v56, 0.0  ;;  %2476 = vst.msk [vmem:[%s4179_s14 + $0x98] sm:$0xff] %vm2282_vm1, %v2692_v9  ;;  %v2371_v1 = vmul.f32 %v2692_v9, %v2692_v9  ;;  %v2320_v53 = vsel %vm2282_vm1, %v2692_v9, 0.0 }
 0x2d3   : > { %v2416_v57 = vadd.f32 %v2415_v35, %v2414_v54  ;;  %v2222_v0 = vpop.f32.mrf.mxu1 }
 0x2d4   : > { %v2316_v14 = vsel %vm2282_vm1, %v2222_v0, 0.0  ;;  %v2369_v8 = vmul.f32 %v2222_v0, %v2222_v0  ;;  %2474 = vst.msk [vmem:[%s4179_s14 + $0x88] sm:$0xff] %vm2282_vm1, %v2222_v0  ;;  %v2421_v20 = vsel %vm2282_vm1, %v2371_v1, 0.0 }
 0x2d5   : > { %v2317_v28 = vadd.f32 %v2316_v14, %v2315_v49 }
 0x2d6   : > { %v2417_v13 = vsel %vm2282_vm1, %v2369_v8, 0.0 }
 0x2d7   : > { %v2319_v10 = vadd.f32 %v2318_v25, %v2317_v28  ;;  %v2418_v61 = vadd.f32 %v2417_v13, %v2416_v57 }
 0x2d9   : > { %v2420_v60 = vadd.f32 %v2419_v41, %v2418_v61  ;;  %v2321_v58 = vadd.f32 %v2320_v53, %v2319_v10 }
 0x2db   : > { %v2422_v5 = vadd.f32 %v2421_v20, %v2420_v60 }
 0x2fd   : > { %v2695_v50 = vpop.f32.mrf.mxu1 }
 0x2fe   : > { %2479 = vst.msk [vmem:[%s4179_s14 + $0xb0] sm:$0xff] %vm2282_vm1, %v2695_v50  ;;  %v2374_v6 = vmul.f32 %v2695_v50, %v2695_v50  ;;  %v2326_v63 = vsel %vm2282_vm1, %v2695_v50, 0.0 }
 0x2ff   : > { %v2235_v18 = vpop.f32.mrf.mxu1 }
 0x300   : > { %v2322_v16 = vsel %vm2282_vm1, %v2235_v18, 0.0  ;;  %v2372_v19 = vmul.f32 %v2235_v18, %v2235_v18  ;;  %2477 = vst.msk [vmem:[%s4179_s14 + $0xa0] sm:$0xff] %vm2282_vm1, %v2235_v18  ;;  %v2427_v4 = vsel %vm2282_vm1, %v2374_v6, 0.0 }
 0x301   : > { %v2323_v23 = vadd.f32 %v2322_v16, %v2321_v58  ;;  %v2696_v52 = vpop.f32.mrf.mxu1 }
 0x302   : > { %v2423_v24 = vsel %vm2282_vm1, %v2372_v19, 0.0  ;;  %2480 = vst.msk [vmem:[%s4179_s14 + $0xb8] sm:$0xff] %vm2282_vm1, %v2696_v52  ;;  %v2375_v62 = vmul.f32 %v2696_v52, %v2696_v52  ;;  %v2328_v51 = vsel %vm2282_vm1, %v2696_v52, 0.0 }
 0x303   : > { %v2424_v46 = vadd.f32 %v2423_v24, %v2422_v5  ;;  %v2238_v31 = vpop.f32.mrf.mxu1 }
 0x304   : > { %v2324_v11 = vsel %vm2282_vm1, %v2238_v31, 0.0  ;;  %v2373_v38 = vmul.f32 %v2238_v31, %v2238_v31  ;;  %2478 = vst.msk [vmem:[%s4179_s14 + $0xa8] sm:$0xff] %vm2282_vm1, %v2238_v31  ;;  %v2429_v29 = vsel %vm2282_vm1, %v2375_v62, 0.0 }
 0x305   : > { %v2325_v33 = vadd.f32 %v2324_v11, %v2323_v23 }
 0x306   : > { %v2425_v32 = vsel %vm2282_vm1, %v2373_v38, 0.0 }
 0x307   : > { %v2327_v12 = vadd.f32 %v2326_v63, %v2325_v33  ;;  %v2426_v40 = vadd.f32 %v2425_v32, %v2424_v46 }
 0x309   : > { %v2428_v26 = vadd.f32 %v2427_v4, %v2426_v40  ;;  %v2329_v22 = vadd.f32 %v2328_v51, %v2327_v12 }
 0x30b   : > { %v2430_v44 = vadd.f32 %v2429_v29, %v2428_v26 }
 0x32d   : > { %v2699_v27 = vpop.f32.mrf.mxu1 }
 0x32e   : > { %2483 = vst.msk [vmem:[%s4179_s14 + $0xd0] sm:$0xff] %vm2282_vm1, %v2699_v27  ;;  %v2378_v45 = vmul.f32 %v2699_v27, %v2699_v27  ;;  %v2334_v54 = vsel %vm2282_vm1, %v2699_v27, 0.0 }
 0x32f   : > { %v2251_v47 = vpop.f32.mrf.mxu1 }
 0x330   : > { %2481 = vst.msk [vmem:[%s4179_s14 + $0xc0] sm:$0xff] %vm2282_vm1, %v2251_v47  ;;  %v2376_v17 = vmul.f32 %v2251_v47, %v2251_v47  ;;  %v2330_v30 = vsel %vm2282_vm1, %v2251_v47, 0.0  ;;  %v2435_v43 = vsel %vm2282_vm1, %v2378_v45, 0.0 }
 0x331   : > { %v2700_v15 = vpop.f32.mrf.mxu1  ;;  %v2331_v39 = vadd.f32 %v2330_v30, %v2329_v22 }
 0x332   : > { %2484 = vst.msk [vmem:[%s4179_s14 + $0xd8] sm:$0xff] %vm2282_vm1, %v2700_v15  ;;  %v2431_v37 = vsel %vm2282_vm1, %v2376_v17, 0.0  ;;  %v2379_v56 = vmul.f32 %v2700_v15, %v2700_v15  ;;  %v2336_v35 = vsel %vm2282_vm1, %v2700_v15, 0.0 }
 0x333   : > { %v2254_v42 = vpop.f32.mrf.mxu1  ;;  %v2432_v34 = vadd.f32 %v2431_v37, %v2430_v44 }
 0x334   : > { %2482 = vst.msk [vmem:[%s4179_s14 + $0xc8] sm:$0xff] %vm2282_vm1, %v2254_v42  ;;  %v2377_v36 = vmul.f32 %v2254_v42, %v2254_v42  ;;  %v2332_v3 = vsel %vm2282_vm1, %v2254_v42, 0.0  ;;  %v2437_v8 = vsel %vm2282_vm1, %v2379_v56, 0.0 }
 0x335   : > { %v2333_v21 = vadd.f32 %v2332_v3, %v2331_v39 }
 0x336   : > { %v2433_v55 = vsel %vm2282_vm1, %v2377_v36, 0.0 }
 0x337   : > { %v2434_v2 = vadd.f32 %v2433_v55, %v2432_v34  ;;  %v2335_v7 = vadd.f32 %v2334_v54, %v2333_v21 }
 0x339   : > { %v2436_v49 = vadd.f32 %v2435_v43, %v2434_v2  ;;  %v2337_v59 = vadd.f32 %v2336_v35, %v2335_v7 }
 0x33b   : > { %v2438_v1 = vadd.f32 %v2437_v8, %v2436_v49 }
 0x35d   : > { %v2703_v48 = vpop.f32.mrf.mxu1 }
 0x35e   : > { %2487 = vst.msk [vmem:[%s4179_s14 + $0xf0] sm:$0xff] %vm2282_vm1, %v2703_v48  ;;  %v2382_v10 = vmul.f32 %v2703_v48, %v2703_v48  ;;  %v2342_v58 = vsel %vm2282_vm1, %v2703_v48, 0.0 }
 0x35f   : > { %v2267_v9 = vpop.f32.mrf.mxu1 }
 0x360   : > { %v2338_v57 = vsel %vm2282_vm1, %v2267_v9, 0.0  ;;  %v2380_v0 = vmul.f32 %v2267_v9, %v2267_v9  ;;  %2485 = vst.msk [vmem:[%s4179_s14 + $0xe0] sm:$0xff] %vm2282_vm1, %v2267_v9  ;;  %v2443_v16 = vsel %vm2282_vm1, %v2382_v10, 0.0 }
 0x361   : > { %v2704_v14 = vpop.f32.mrf.mxu1  ;;  %v2339_v25 = vadd.f32 %v2338_v57, %v2337_v59 }
 0x362   : > { %v2439_v28 = vsel %vm2282_vm1, %v2380_v0, 0.0  ;;  %2488 = vst.msk [vmem:[%s4179_s14 + $0xf8] sm:$0xff] %vm2282_vm1, %v2704_v14  ;;  %v2383_v20 = vmul.f32 %v2704_v14, %v2704_v14  ;;  %v2344_v19 = vsel %vm2282_vm1, %v2704_v14, 0.0 }
 0x363   : > { %v2270_v13 = vpop.f32.mrf.mxu1  ;;  %v2440_v53 = vadd.f32 %v2439_v28, %v2438_v1 }
 0x364   : > { %v2340_v61 = vsel %vm2282_vm1, %v2270_v13, 0.0  ;;  %v2381_v41 = vmul.f32 %v2270_v13, %v2270_v13  ;;  %2486 = vst.msk [vmem:[%s4179_s14 + $0xe8] sm:$0xff] %vm2282_vm1, %v2270_v13  ;;  %v2445_v24 = vsel %vm2282_vm1, %v2383_v20, 0.0 }
 0x365   : > { %v2341_v60 = vadd.f32 %v2340_v61, %v2339_v25 }
 0x366   : > { %v2441_v5 = vsel %vm2282_vm1, %v2381_v41, 0.0 }
 0x367   : > { %v2343_v50 = vadd.f32 %v2342_v58, %v2341_v60  ;;  %v2442_v18 = vadd.f32 %v2441_v5, %v2440_v53 }
 0x369   : > { %v2345_v23 = vadd.f32 %v2344_v19, %v2343_v50  ;;  %v2444_v52 = vadd.f32 %v2443_v16, %v2442_v18 }
 0x36b   : > { %v2346_v46 = vrot.slane %v2345_v23, 4  ;;  %v2446_v31 = vadd.f32 %v2445_v24, %v2444_v52 }
 0x36d   : > { %v2347_v6 = vadd.f32 %v2346_v46, %v2345_v23  ;;  %v2447_v11 = vrot.slane %v2446_v31, 4 }
 0x36f   : > { %v2348_v38 = vrot.slane %v2347_v6, 2  ;;  %v2448_v33 = vadd.f32 %v2447_v11, %v2446_v31 }
 0x371   : > { %v2349_v63 = vadd.f32 %v2348_v38, %v2347_v6  ;;  %v2449_v62 = vrot.slane %v2448_v33, 2 }
 0x373   : > { %v2350_v32 = vrot.slane %v2349_v63, 1  ;;  %v2450_v12 = vadd.f32 %v2449_v62, %v2448_v33 }
 0x375   : > { %v2451_v40 = vrot.slane %v2450_v12, 1  ;;  %v2351_v4 = vadd.f32 %v2350_v32, %v2349_v63 }
 0x377   : > { %v2452_v51 = vadd.f32 %v2451_v40, %v2450_v12 }
 0x379   : > { %v2454_v26 = vsel %vm2453_vm2, %v2351_v4, %v2452_v51 }
 0x37a   : > { %2456 = vst.msk [vmem:[%s181_s18] sm:$0x3] %vm2455_vm3, %v2454_v26 }
 0x37b PF: > { %s14_s12 = sadd.s32 1, %s2761_s12  }
 0x37c   : > { %p11_p4 = scmp.ge.s32.totalorder %s14_s12, 4  }
 0x37e   :  { %13 = sbr.rel (!%p11_p4) target bundleno = 1 (0x1), region = 70 }

</bundles_post_ra>
